<compile_context>
chip_gen: v7x
topology: tpu7x:2x2x1
jax: 0.10.0
libtpu: 0.0.40
codegen_flags: <defaults>
</compile_context>

<pallas_src>
import jax
import jax.numpy as jnp
from jax import lax
from jax.experimental import pallas as pl
from jax.experimental.pallas import tpu as pltpu

KH, KW = 3, 3
BN_EPS = 1e-5


def _fused_convblock_kernel(x_ref, wtab_ref, gamma_ref, beta_ref, o_ref):
    # x_ref:     (N, Cin, H, W)       f32 VMEM  raw NCHW input (no halo pad)
    # wtab_ref:  (Cin*KH*KW, Cout*W)  f32 VMEM  weight table, block-replicated rows
    # gamma_ref: (1, Cout*W)          f32 VMEM  gamma replicated per 16-lane block
    # beta_ref:  (1, Cout*W)          f32 VMEM  beta  replicated per 16-lane block
    # o_ref:     (N, H, Cout*W)       f32 VMEM  lane-dense output (lane = o*W + w)
    N, Cin, H, W = x_ref.shape
    LANES = o_ref.shape[-1]                      # Cout * W == 128
    Cout = LANES // W

    # Hoisted index constants (lane column j = lane % W, row h).
    col = lax.broadcasted_iota(jnp.int32, (H, LANES), 1) % W
    row = lax.broadcasted_iota(jnp.int32, (H, LANES), 0)

    def shift_rows(t, dy):
        # out[h, :] = t[h + dy, :], zero-filled outside [0, H)   (halo rows)
        if dy == 0:
            return t
        r = pltpu.roll(t, (-dy) % H, axis=0)
        if dy < 0:
            return jnp.where(row < -dy, 0.0, r)
        return jnp.where(row >= H - dy, 0.0, r)

    def shift_cols(t, dx):
        # Per 16-lane block: out[:, j] = t[:, j + dx], zero outside [0, W) (halo cols).
        # t is block-replicated, so a full-128-lane roll acts as a per-block shift;
        # the wrapped-in boundary lanes are exactly the ones masked to zero.
        if dx == 0:
            return t
        r = pltpu.roll(t, (-dx) % LANES, axis=1)
        if dx < 0:
            return jnp.where(col < -dx, 0.0, r)
        return jnp.where(col >= W - dx, 0.0, r)

    # ---- conv: lane-dense VPU shifted FMAs; bias omitted (cancels under batch-stat
    # ---- BN).  TODO(synk): at larger channel counts switch this to an MXU matmul. ----
    acc = [jnp.zeros((H, LANES), jnp.float32) for _ in range(N)]
    for c in range(Cin):
        # Replicate each (H, W) plane across the Cout lane blocks once per (n, c).
        tiles = [jnp.concatenate([x_ref[n, c]] * Cout, axis=-1) for n in range(N)]
        for kh in range(KH):
            rows_kh = [shift_rows(t, kh - 1) for t in tiles]
            for kw in range(KW):
                wrow = wtab_ref[pl.ds((c * KH + kh) * KW + kw, 1), :]   # (1, LANES)
                for n in range(N):
                    acc[n] = acc[n] + shift_cols(rows_kh[n], kw - 1) * wrow

    # ---- BatchNorm batch statistics (training mode), one pass ----
    total = acc[0]
    total_sq = acc[0] * acc[0]
    for n in range(1, N):
        total = total + acc[n]
        total_sq = total_sq + acc[n] * acc[n]
    stats = jnp.concatenate(
        [jnp.sum(total, axis=0, keepdims=True),
         jnp.sum(total_sq, axis=0, keepdims=True)], axis=0)              # (2, LANES)

    # Segmented lane reduction: 4-step roll+add window sum (block total lands on the
    # last lane of each 16-lane block), then mask + 4-step backward propagate so every
    # lane of a block holds its channel's total.
    v = stats
    s = 1
    while s < W:
        v = v + pltpu.roll(v, s, axis=1)
        s *= 2
    col2 = lax.broadcasted_iota(jnp.int32, (2, LANES), 1) % W
    v = jnp.where(col2 == W - 1, v, 0.0)
    s = 1
    while s < W:
        v = v + pltpu.roll(v, (LANES - s) % LANES, axis=1)
        s *= 2

    inv_count = 1.0 / float(N * H * W)
    mean = v[0:1, :] * inv_count                          # (1, LANES) block-replicated
    var = jnp.maximum(v[1:2, :] * inv_count - mean * mean, 0.0)   # biased, clamped
    inv_std = lax.rsqrt(var + BN_EPS)
    scale = gamma_ref[...] * inv_std                      # (1, LANES)
    shift = beta_ref[...] - mean * scale                  # (1, LANES)

    # ---- normalize + ReLU, unmasked full-128-lane stores ----
    for n in range(N):
        o_ref[n] = jnp.maximum(acc[n] * scale + shift, 0.0)


def conv_block_forward(x_nchw, w_oihw, bias, gamma, beta):
    """ConvBlock forward. x_nchw: (N, Cin, H, W) f32 -> (N, Cout, H, W) f32."""
    N, Cin, H, W = x_nchw.shape
    Cout = w_oihw.shape[0]
    del bias  # cancels exactly under batch-statistics (training-mode) BatchNorm

    # Lane-dense packing relies on (Cout, W) filling exactly 128 lanes and on the
    # power-of-two roll reduction; other shapes need padding/grouping.
    assert Cout * W == 128, "kernel packs (Cout, W) onto the 128-lane axis"
    assert W & (W - 1) == 0, "roll-based segmented reduction assumes power-of-two W"

    # Tiny parameter-only prep (the activation goes in raw -- no wrapper pad).
    wtab = jnp.repeat(
        jnp.transpose(w_oihw, (1, 2, 3, 0)).reshape(Cin * KH * KW, Cout), W, axis=1)
    gamma_rep = jnp.repeat(gamma, W)[None, :]             # (1, Cout*W)
    beta_rep = jnp.repeat(beta, W)[None, :]               # (1, Cout*W)

    # TODO(synk): for production H/W/C, add a grid over N/H with
    # dimension_semantics=("parallel", ...) to shard across v7x's 2 TensorCores and
    # re-derive block sizes / vmem_limit_bytes against v7x's 64 MiB VMEM.
    y = pl.pallas_call(
        _fused_convblock_kernel,
        out_shape=jax.ShapeDtypeStruct((N, H, Cout * W), jnp.float32),
        in_specs=[
            pl.BlockSpec(memory_space=pltpu.MemorySpace.VMEM),
            pl.BlockSpec(memory_space=pltpu.MemorySpace.VMEM),
            pl.BlockSpec(memory_space=pltpu.MemorySpace.VMEM),
            pl.BlockSpec(memory_space=pltpu.MemorySpace.VMEM),
        ],
        out_specs=pl.BlockSpec(memory_space=pltpu.MemorySpace.VMEM),
    )(x_nchw, wtab, gamma_rep, beta_rep)

    # Lane-dense (N, H, Cout*W) -> NCHW.  TODO(synk): keep the lane-dense layout
    # between ops / fuse this relayout into the consumer kernel at these sizes.
    return jnp.transpose(y.reshape(N, H, Cout, W), (0, 2, 1, 3))


def _reference(x_nchw, w_oihw, bias, gamma, beta):
    """Pure-JAX reference matching PyTorch ConvBlock forward (training-mode BN)."""
    conv = lax.conv_general_dilated(
        x_nchw, w_oihw, window_strides=(1, 1),
        padding=((1, 1), (1, 1)),
        dimension_numbers=("NCHW", "OIHW", "NCHW"))
    conv = conv + bias[None, :, None, None]
    mean = jnp.mean(conv, axis=(0, 2, 3), keepdims=True)
    var = jnp.mean((conv - mean) ** 2, axis=(0, 2, 3), keepdims=True)  # biased
    bn = (conv - mean) / jnp.sqrt(var + BN_EPS)
    bn = bn * gamma[None, :, None, None] + beta[None, :, None, None]
    return jnp.maximum(bn, 0.0)


if __name__ == "__main__":
    # Small shapes consistent with the module: batch=2, in_channels=4,
    # out_channels=8, spatial=16x16.
    N, Cin, Cout, H, W = 2, 4, 8, 16, 16

    key = jax.random.PRNGKey(0)
    kx, kwt, kb = jax.random.split(key, 3)

    x = jax.random.normal(kx, (N, Cin, H, W), dtype=jnp.float32)

    # Deterministic parameter init (Conv2d-style uniform; BN: gamma=1, beta=0).
    fan_in = Cin * KH * KW
    bound = 1.0 / (fan_in ** 0.5)
    w = jax.random.uniform(kwt, (Cout, Cin, KH, KW), jnp.float32, -bound, bound)
    b = jax.random.uniform(kb, (Cout,), jnp.float32, -bound, bound)
    gamma = jnp.ones((Cout,), jnp.float32)
    beta = jnp.zeros((Cout,), jnp.float32)

    fwd = jax.jit(conv_block_forward)
    out = jax.block_until_ready(fwd(x, w, b, gamma, beta))

    ref = _reference(x, w, b, gamma, beta)
    assert out.shape == (N, Cout, H, W)
    assert jnp.allclose(out, ref, atol=1e-4, rtol=1e-4), "mismatch vs reference"

    print("KERNEL_OK")
</pallas_src>

<mosaic_0001>
module attributes {stable_mosaic.version = 11 : i64} {
  func.func @_fused_convblock_kernel(%arg0: memref<2x4x16x16xf32, #tpu.memory_space<vmem>>, %arg1: memref<36x128xf32, #tpu.memory_space<vmem>>, %arg2: memref<1x128xf32, #tpu.memory_space<vmem>>, %arg3: memref<1x128xf32, #tpu.memory_space<vmem>>, %arg4: memref<2x16x128xf32, #tpu.memory_space<vmem>>) attributes {dimension_semantics = [], scalar_prefetch = 0 : i64, scratch_operands = 0 : i64, tpu.core_type = #tpu.core_type<tc>} {
    %0 = tpu.iota {dimensions = array<i32: 1>} : vector<16x128xi32>
    %c16_i32 = arith.constant 16 : i32
    %c0_i32 = arith.constant 0 : i32
    %1 = arith.cmpi eq, %c16_i32, %c0_i32 : i32
    %c1_i32 = arith.constant 1 : i32
    %2 = arith.select %1, %c1_i32, %c16_i32 : i32
    %3 = vector.broadcast %2 : i32 to vector<16x128xi32>
    %4 = arith.remsi %0, %3 : vector<16x128xi32>
    %c0_i32_0 = arith.constant 0 : i32
    %5 = vector.broadcast %c0_i32_0 : i32 to vector<16x128xi32>
    %6 = arith.cmpi ne, %4, %5 : vector<16x128xi32>
    %c0_i32_1 = arith.constant 0 : i32
    %7 = vector.broadcast %c0_i32_1 : i32 to vector<16x128xi32>
    %8 = arith.cmpi slt, %4, %7 : vector<16x128xi32>
    %c0_i32_2 = arith.constant 0 : i32
    %9 = arith.cmpi slt, %2, %c0_i32_2 : i32
    %10 = vector.broadcast %9 : i1 to vector<16x128xi1>
    %11 = vector.broadcast %10 : vector<16x128xi1> to vector<16x128xi1>
    %12 = arith.xori %8, %11 : vector<16x128xi1>
    %13 = arith.andi %12, %6 : vector<16x128xi1>
    %14 = vector.broadcast %2 : i32 to vector<16x128xi32>
    %15 = arith.addi %4, %14 : vector<16x128xi32>
    %16 = arith.select %13, %15, %4 : vector<16x128xi1>, vector<16x128xi32>
    %17 = tpu.iota {dimensions = array<i32: 0>} : vector<16x128xi32>
    %cst = arith.constant 0.000000e+00 : f32
    %18 = vector.broadcast %cst : f32 to vector<16x128xf32>
    %cst_3 = arith.constant 0.000000e+00 : f32
    %19 = vector.broadcast %cst_3 : f32 to vector<16x128xf32>
    %c0 = arith.constant 0 : index
    %c0_4 = arith.constant 0 : index
    %c0_5 = arith.constant 0 : index
    %c0_6 = arith.constant 0 : index
    %20 = vector.load %arg0[%c0, %c0_4, %c0_5, %c0_6] : memref<2x4x16x16xf32, #tpu.memory_space<vmem>>, vector<1x1x16x16xf32>
    %21 = vector.shape_cast %20 : vector<1x1x16x16xf32> to vector<16x16xf32>
    %22 = tpu.concatenate %21, %21, %21, %21, %21, %21, %21, %21 in 1 : vector<16x16xf32>, vector<16x16xf32>, vector<16x16xf32>, vector<16x16xf32>, vector<16x16xf32>, vector<16x16xf32>, vector<16x16xf32>, vector<16x16xf32> -> vector<16x128xf32>
    %c1 = arith.constant 1 : index
    %c0_7 = arith.constant 0 : index
    %c0_8 = arith.constant 0 : index
    %c0_9 = arith.constant 0 : index
    %23 = vector.load %arg0[%c1, %c0_7, %c0_8, %c0_9] : memref<2x4x16x16xf32, #tpu.memory_space<vmem>>, vector<1x1x16x16xf32>
    %24 = vector.shape_cast %23 : vector<1x1x16x16xf32> to vector<16x16xf32>
    %25 = tpu.concatenate %24, %24, %24, %24, %24, %24, %24, %24 in 1 : vector<16x16xf32>, vector<16x16xf32>, vector<16x16xf32>, vector<16x16xf32>, vector<16x16xf32>, vector<16x16xf32>, vector<16x16xf32>, vector<16x16xf32> -> vector<16x128xf32>
    %c1_i32_10 = arith.constant 1 : i32
    %26 = tpu.dynamic_rotate %22 by %c1_i32_10 dim 0 : vector<16x128xf32>, i32 -> vector<16x128xf32>
    %c1_i32_11 = arith.constant 1 : i32
    %27 = vector.broadcast %c1_i32_11 : i32 to vector<16x128xi32>
    %28 = arith.cmpi slt, %17, %27 : vector<16x128xi32>
    %cst_12 = arith.constant 0.000000e+00 : f32
    %29 = vector.broadcast %cst_12 : f32 to vector<16x128xf32>
    %30 = arith.select %28, %29, %26 : vector<16x128xi1>, vector<16x128xf32>
    %c1_i32_13 = arith.constant 1 : i32
    %31 = tpu.dynamic_rotate %25 by %c1_i32_13 dim 0 : vector<16x128xf32>, i32 -> vector<16x128xf32>
    %c1_i32_14 = arith.constant 1 : i32
    %32 = vector.broadcast %c1_i32_14 : i32 to vector<16x128xi32>
    %33 = arith.cmpi slt, %17, %32 : vector<16x128xi32>
    %cst_15 = arith.constant 0.000000e+00 : f32
    %34 = vector.broadcast %cst_15 : f32 to vector<16x128xf32>
    %35 = arith.select %33, %34, %31 : vector<16x128xi1>, vector<16x128xf32>
    %c0_16 = arith.constant 0 : index
    %c0_17 = arith.constant 0 : index
    %36 = vector.load %arg1[%c0_16, %c0_17] : memref<36x128xf32, #tpu.memory_space<vmem>>, vector<1x128xf32>
    %c1_i32_18 = arith.constant 1 : i32
    %37 = tpu.dynamic_rotate %30 by %c1_i32_18 dim 1 : vector<16x128xf32>, i32 -> vector<16x128xf32>
    %c1_i32_19 = arith.constant 1 : i32
    %38 = vector.broadcast %c1_i32_19 : i32 to vector<16x128xi32>
    %39 = arith.cmpi slt, %16, %38 : vector<16x128xi32>
    %cst_20 = arith.constant 0.000000e+00 : f32
    %40 = vector.broadcast %cst_20 : f32 to vector<16x128xf32>
    %41 = arith.select %39, %40, %37 : vector<16x128xi1>, vector<16x128xf32>
    %42 = vector.broadcast %36 : vector<1x128xf32> to vector<16x128xf32>
    %43 = arith.mulf %41, %42 : vector<16x128xf32>
    %44 = arith.addf %18, %43 : vector<16x128xf32>
    %c1_i32_21 = arith.constant 1 : i32
    %45 = tpu.dynamic_rotate %35 by %c1_i32_21 dim 1 : vector<16x128xf32>, i32 -> vector<16x128xf32>
    %c1_i32_22 = arith.constant 1 : i32
    %46 = vector.broadcast %c1_i32_22 : i32 to vector<16x128xi32>
    %47 = arith.cmpi slt, %16, %46 : vector<16x128xi32>
    %cst_23 = arith.constant 0.000000e+00 : f32
    %48 = vector.broadcast %cst_23 : f32 to vector<16x128xf32>
    %49 = arith.select %47, %48, %45 : vector<16x128xi1>, vector<16x128xf32>
    %50 = vector.broadcast %36 : vector<1x128xf32> to vector<16x128xf32>
    %51 = arith.mulf %49, %50 : vector<16x128xf32>
    %52 = arith.addf %19, %51 : vector<16x128xf32>
    %c1_24 = arith.constant 1 : index
    %c0_25 = arith.constant 0 : index
    %53 = vector.load %arg1[%c1_24, %c0_25] : memref<36x128xf32, #tpu.memory_space<vmem>>, vector<1x128xf32>
    %54 = vector.broadcast %53 : vector<1x128xf32> to vector<16x128xf32>
    %55 = arith.mulf %30, %54 : vector<16x128xf32>
    %56 = arith.addf %44, %55 : vector<16x128xf32>
    %57 = vector.broadcast %53 : vector<1x128xf32> to vector<16x128xf32>
    %58 = arith.mulf %35, %57 : vector<16x128xf32>
    %59 = arith.addf %52, %58 : vector<16x128xf32>
    %c2 = arith.constant 2 : index
    %c0_26 = arith.constant 0 : index
    %60 = vector.load %arg1[%c2, %c0_26] : memref<36x128xf32, #tpu.memory_space<vmem>>, vector<1x128xf32>
    %c127_i32 = arith.constant 127 : i32
    %61 = tpu.dynamic_rotate %30 by %c127_i32 dim 1 : vector<16x128xf32>, i32 -> vector<16x128xf32>
    %c15_i32 = arith.constant 15 : i32
    %62 = vector.broadcast %c15_i32 : i32 to vector<16x128xi32>
    %63 = arith.cmpi sge, %16, %62 : vector<16x128xi32>
    %cst_27 = arith.constant 0.000000e+00 : f32
    %64 = vector.broadcast %cst_27 : f32 to vector<16x128xf32>
    %65 = arith.select %63, %64, %61 : vector<16x128xi1>, vector<16x128xf32>
    %66 = vector.broadcast %60 : vector<1x128xf32> to vector<16x128xf32>
    %67 = arith.mulf %65, %66 : vector<16x128xf32>
    %68 = arith.addf %56, %67 : vector<16x128xf32>
    %c127_i32_28 = arith.constant 127 : i32
    %69 = tpu.dynamic_rotate %35 by %c127_i32_28 dim 1 : vector<16x128xf32>, i32 -> vector<16x128xf32>
    %c15_i32_29 = arith.constant 15 : i32
    %70 = vector.broadcast %c15_i32_29 : i32 to vector<16x128xi32>
    %71 = arith.cmpi sge, %16, %70 : vector<16x128xi32>
    %cst_30 = arith.constant 0.000000e+00 : f32
    %72 = vector.broadcast %cst_30 : f32 to vector<16x128xf32>
    %73 = arith.select %71, %72, %69 : vector<16x128xi1>, vector<16x128xf32>
    %74 = vector.broadcast %60 : vector<1x128xf32> to vector<16x128xf32>
    %75 = arith.mulf %73, %74 : vector<16x128xf32>
    %76 = arith.addf %59, %75 : vector<16x128xf32>
    %c3 = arith.constant 3 : index
    %c0_31 = arith.constant 0 : index
    %77 = vector.load %arg1[%c3, %c0_31] : memref<36x128xf32, #tpu.memory_space<vmem>>, vector<1x128xf32>
    %c1_i32_32 = arith.constant 1 : i32
    %78 = tpu.dynamic_rotate %22 by %c1_i32_32 dim 1 : vector<16x128xf32>, i32 -> vector<16x128xf32>
    %c1_i32_33 = arith.constant 1 : i32
    %79 = vector.broadcast %c1_i32_33 : i32 to vector<16x128xi32>
    %80 = arith.cmpi slt, %16, %79 : vector<16x128xi32>
    %cst_34 = arith.constant 0.000000e+00 : f32
    %81 = vector.broadcast %cst_34 : f32 to vector<16x128xf32>
    %82 = arith.select %80, %81, %78 : vector<16x128xi1>, vector<16x128xf32>
    %83 = vector.broadcast %77 : vector<1x128xf32> to vector<16x128xf32>
    %84 = arith.mulf %82, %83 : vector<16x128xf32>
    %85 = arith.addf %68, %84 : vector<16x128xf32>
    %c1_i32_35 = arith.constant 1 : i32
    %86 = tpu.dynamic_rotate %25 by %c1_i32_35 dim 1 : vector<16x128xf32>, i32 -> vector<16x128xf32>
    %c1_i32_36 = arith.constant 1 : i32
    %87 = vector.broadcast %c1_i32_36 : i32 to vector<16x128xi32>
    %88 = arith.cmpi slt, %16, %87 : vector<16x128xi32>
    %cst_37 = arith.constant 0.000000e+00 : f32
    %89 = vector.broadcast %cst_37 : f32 to vector<16x128xf32>
    %90 = arith.select %88, %89, %86 : vector<16x128xi1>, vector<16x128xf32>
    %91 = vector.broadcast %77 : vector<1x128xf32> to vector<16x128xf32>
    %92 = arith.mulf %90, %91 : vector<16x128xf32>
    %93 = arith.addf %76, %92 : vector<16x128xf32>
    %c4 = arith.constant 4 : index
    %c0_38 = arith.constant 0 : index
    %94 = vector.load %arg1[%c4, %c0_38] : memref<36x128xf32, #tpu.memory_space<vmem>>, vector<1x128xf32>
    %95 = vector.broadcast %94 : vector<1x128xf32> to vector<16x128xf32>
    %96 = arith.mulf %22, %95 : vector<16x128xf32>
    %97 = arith.addf %85, %96 : vector<16x128xf32>
    %98 = vector.broadcast %94 : vector<1x128xf32> to vector<16x128xf32>
    %99 = arith.mulf %25, %98 : vector<16x128xf32>
    %100 = arith.addf %93, %99 : vector<16x128xf32>
    %c5 = arith.constant 5 : index
    %c0_39 = arith.constant 0 : index
    %101 = vector.load %arg1[%c5, %c0_39] : memref<36x128xf32, #tpu.memory_space<vmem>>, vector<1x128xf32>
    %c127_i32_40 = arith.constant 127 : i32
    %102 = tpu.dynamic_rotate %22 by %c127_i32_40 dim 1 : vector<16x128xf32>, i32 -> vector<16x128xf32>
    %c15_i32_41 = arith.constant 15 : i32
    %103 = vector.broadcast %c15_i32_41 : i32 to vector<16x128xi32>
    %104 = arith.cmpi sge, %16, %103 : vector<16x128xi32>
    %cst_42 = arith.constant 0.000000e+00 : f32
    %105 = vector.broadcast %cst_42 : f32 to vector<16x128xf32>
    %106 = arith.select %104, %105, %102 : vector<16x128xi1>, vector<16x128xf32>
    %107 = vector.broadcast %101 : vector<1x128xf32> to vector<16x128xf32>
    %108 = arith.mulf %106, %107 : vector<16x128xf32>
    %109 = arith.addf %97, %108 : vector<16x128xf32>
    %c127_i32_43 = arith.constant 127 : i32
    %110 = tpu.dynamic_rotate %25 by %c127_i32_43 dim 1 : vector<16x128xf32>, i32 -> vector<16x128xf32>
    %c15_i32_44 = arith.constant 15 : i32
    %111 = vector.broadcast %c15_i32_44 : i32 to vector<16x128xi32>
    %112 = arith.cmpi sge, %16, %111 : vector<16x128xi32>
    %cst_45 = arith.constant 0.000000e+00 : f32
    %113 = vector.broadcast %cst_45 : f32 to vector<16x128xf32>
    %114 = arith.select %112, %113, %110 : vector<16x128xi1>, vector<16x128xf32>
    %115 = vector.broadcast %101 : vector<1x128xf32> to vector<16x128xf32>
    %116 = arith.mulf %114, %115 : vector<16x128xf32>
    %117 = arith.addf %100, %116 : vector<16x128xf32>
    %c15_i32_46 = arith.constant 15 : i32
    %118 = tpu.dynamic_rotate %22 by %c15_i32_46 dim 0 : vector<16x128xf32>, i32 -> vector<16x128xf32>
    %c15_i32_47 = arith.constant 15 : i32
    %119 = vector.broadcast %c15_i32_47 : i32 to vector<16x128xi32>
    %120 = arith.cmpi sge, %17, %119 : vector<16x128xi32>
    %cst_48 = arith.constant 0.000000e+00 : f32
    %121 = vector.broadcast %cst_48 : f32 to vector<16x128xf32>
    %122 = arith.select %120, %121, %118 : vector<16x128xi1>, vector<16x128xf32>
    %c15_i32_49 = arith.constant 15 : i32
    %123 = tpu.dynamic_rotate %25 by %c15_i32_49 dim 0 : vector<16x128xf32>, i32 -> vector<16x128xf32>
    %c15_i32_50 = arith.constant 15 : i32
    %124 = vector.broadcast %c15_i32_50 : i32 to vector<16x128xi32>
    %125 = arith.cmpi sge, %17, %124 : vector<16x128xi32>
    %cst_51 = arith.constant 0.000000e+00 : f32
    %126 = vector.broadcast %cst_51 : f32 to vector<16x128xf32>
    %127 = arith.select %125, %126, %123 : vector<16x128xi1>, vector<16x128xf32>
    %c6 = arith.constant 6 : index
    %c0_52 = arith.constant 0 : index
    %128 = vector.load %arg1[%c6, %c0_52] : memref<36x128xf32, #tpu.memory_space<vmem>>, vector<1x128xf32>
    %c1_i32_53 = arith.constant 1 : i32
    %129 = tpu.dynamic_rotate %122 by %c1_i32_53 dim 1 : vector<16x128xf32>, i32 -> vector<16x128xf32>
    %c1_i32_54 = arith.constant 1 : i32
    %130 = vector.broadcast %c1_i32_54 : i32 to vector<16x128xi32>
    %131 = arith.cmpi slt, %16, %130 : vector<16x128xi32>
    %cst_55 = arith.constant 0.000000e+00 : f32
    %132 = vector.broadcast %cst_55 : f32 to vector<16x128xf32>
    %133 = arith.select %131, %132, %129 : vector<16x128xi1>, vector<16x128xf32>
    %134 = vector.broadcast %128 : vector<1x128xf32> to vector<16x128xf32>
    %135 = arith.mulf %133, %134 : vector<16x128xf32>
    %136 = arith.addf %109, %135 : vector<16x128xf32>
    %c1_i32_56 = arith.constant 1 : i32
    %137 = tpu.dynamic_rotate %127 by %c1_i32_56 dim 1 : vector<16x128xf32>, i32 -> vector<16x128xf32>
    %c1_i32_57 = arith.constant 1 : i32
    %138 = vector.broadcast %c1_i32_57 : i32 to vector<16x128xi32>
    %139 = arith.cmpi slt, %16, %138 : vector<16x128xi32>
    %cst_58 = arith.constant 0.000000e+00 : f32
    %140 = vector.broadcast %cst_58 : f32 to vector<16x128xf32>
    %141 = arith.select %139, %140, %137 : vector<16x128xi1>, vector<16x128xf32>
    %142 = vector.broadcast %128 : vector<1x128xf32> to vector<16x128xf32>
    %143 = arith.mulf %141, %142 : vector<16x128xf32>
    %144 = arith.addf %117, %143 : vector<16x128xf32>
    %c7 = arith.constant 7 : index
    %c0_59 = arith.constant 0 : index
    %145 = vector.load %arg1[%c7, %c0_59] : memref<36x128xf32, #tpu.memory_space<vmem>>, vector<1x128xf32>
    %146 = vector.broadcast %145 : vector<1x128xf32> to vector<16x128xf32>
    %147 = arith.mulf %122, %146 : vector<16x128xf32>
    %148 = arith.addf %136, %147 : vector<16x128xf32>
    %149 = vector.broadcast %145 : vector<1x128xf32> to vector<16x128xf32>
    %150 = arith.mulf %127, %149 : vector<16x128xf32>
    %151 = arith.addf %144, %150 : vector<16x128xf32>
    %c8 = arith.constant 8 : index
    %c0_60 = arith.constant 0 : index
    %152 = vector.load %arg1[%c8, %c0_60] : memref<36x128xf32, #tpu.memory_space<vmem>>, vector<1x128xf32>
    %c127_i32_61 = arith.constant 127 : i32
    %153 = tpu.dynamic_rotate %122 by %c127_i32_61 dim 1 : vector<16x128xf32>, i32 -> vector<16x128xf32>
    %c15_i32_62 = arith.constant 15 : i32
    %154 = vector.broadcast %c15_i32_62 : i32 to vector<16x128xi32>
    %155 = arith.cmpi sge, %16, %154 : vector<16x128xi32>
    %cst_63 = arith.constant 0.000000e+00 : f32
    %156 = vector.broadcast %cst_63 : f32 to vector<16x128xf32>
    %157 = arith.select %155, %156, %153 : vector<16x128xi1>, vector<16x128xf32>
    %158 = vector.broadcast %152 : vector<1x128xf32> to vector<16x128xf32>
    %159 = arith.mulf %157, %158 : vector<16x128xf32>
    %160 = arith.addf %148, %159 : vector<16x128xf32>
    %c127_i32_64 = arith.constant 127 : i32
    %161 = tpu.dynamic_rotate %127 by %c127_i32_64 dim 1 : vector<16x128xf32>, i32 -> vector<16x128xf32>
    %c15_i32_65 = arith.constant 15 : i32
    %162 = vector.broadcast %c15_i32_65 : i32 to vector<16x128xi32>
    %163 = arith.cmpi sge, %16, %162 : vector<16x128xi32>
    %cst_66 = arith.constant 0.000000e+00 : f32
    %164 = vector.broadcast %cst_66 : f32 to vector<16x128xf32>
    %165 = arith.select %163, %164, %161 : vector<16x128xi1>, vector<16x128xf32>
    %166 = vector.broadcast %152 : vector<1x128xf32> to vector<16x128xf32>
    %167 = arith.mulf %165, %166 : vector<16x128xf32>
    %168 = arith.addf %151, %167 : vector<16x128xf32>
    %c0_67 = arith.constant 0 : index
    %c1_68 = arith.constant 1 : index
    %c0_69 = arith.constant 0 : index
    %c0_70 = arith.constant 0 : index
    %169 = vector.load %arg0[%c0_67, %c1_68, %c0_69, %c0_70] : memref<2x4x16x16xf32, #tpu.memory_space<vmem>>, vector<1x1x16x16xf32>
    %170 = vector.shape_cast %169 : vector<1x1x16x16xf32> to vector<16x16xf32>
    %171 = tpu.concatenate %170, %170, %170, %170, %170, %170, %170, %170 in 1 : vector<16x16xf32>, vector<16x16xf32>, vector<16x16xf32>, vector<16x16xf32>, vector<16x16xf32>, vector<16x16xf32>, vector<16x16xf32>, vector<16x16xf32> -> vector<16x128xf32>
    %c1_71 = arith.constant 1 : index
    %c1_72 = arith.constant 1 : index
    %c0_73 = arith.constant 0 : index
    %c0_74 = arith.constant 0 : index
    %172 = vector.load %arg0[%c1_71, %c1_72, %c0_73, %c0_74] : memref<2x4x16x16xf32, #tpu.memory_space<vmem>>, vector<1x1x16x16xf32>
    %173 = vector.shape_cast %172 : vector<1x1x16x16xf32> to vector<16x16xf32>
    %174 = tpu.concatenate %173, %173, %173, %173, %173, %173, %173, %173 in 1 : vector<16x16xf32>, vector<16x16xf32>, vector<16x16xf32>, vector<16x16xf32>, vector<16x16xf32>, vector<16x16xf32>, vector<16x16xf32>, vector<16x16xf32> -> vector<16x128xf32>
    %c1_i32_75 = arith.constant 1 : i32
    %175 = tpu.dynamic_rotate %171 by %c1_i32_75 dim 0 : vector<16x128xf32>, i32 -> vector<16x128xf32>
    %c1_i32_76 = arith.constant 1 : i32
    %176 = vector.broadcast %c1_i32_76 : i32 to vector<16x128xi32>
    %177 = arith.cmpi slt, %17, %176 : vector<16x128xi32>
    %cst_77 = arith.constant 0.000000e+00 : f32
    %178 = vector.broadcast %cst_77 : f32 to vector<16x128xf32>
    %179 = arith.select %177, %178, %175 : vector<16x128xi1>, vector<16x128xf32>
    %c1_i32_78 = arith.constant 1 : i32
    %180 = tpu.dynamic_rotate %174 by %c1_i32_78 dim 0 : vector<16x128xf32>, i32 -> vector<16x128xf32>
    %c1_i32_79 = arith.constant 1 : i32
    %181 = vector.broadcast %c1_i32_79 : i32 to vector<16x128xi32>
    %182 = arith.cmpi slt, %17, %181 : vector<16x128xi32>
    %cst_80 = arith.constant 0.000000e+00 : f32
    %183 = vector.broadcast %cst_80 : f32 to vector<16x128xf32>
    %184 = arith.select %182, %183, %180 : vector<16x128xi1>, vector<16x128xf32>
    %c9 = arith.constant 9 : index
    %c0_81 = arith.constant 0 : index
    %185 = vector.load %arg1[%c9, %c0_81] : memref<36x128xf32, #tpu.memory_space<vmem>>, vector<1x128xf32>
    %c1_i32_82 = arith.constant 1 : i32
    %186 = tpu.dynamic_rotate %179 by %c1_i32_82 dim 1 : vector<16x128xf32>, i32 -> vector<16x128xf32>
    %c1_i32_83 = arith.constant 1 : i32
    %187 = vector.broadcast %c1_i32_83 : i32 to vector<16x128xi32>
    %188 = arith.cmpi slt, %16, %187 : vector<16x128xi32>
    %cst_84 = arith.constant 0.000000e+00 : f32
    %189 = vector.broadcast %cst_84 : f32 to vector<16x128xf32>
    %190 = arith.select %188, %189, %186 : vector<16x128xi1>, vector<16x128xf32>
    %191 = vector.broadcast %185 : vector<1x128xf32> to vector<16x128xf32>
    %192 = arith.mulf %190, %191 : vector<16x128xf32>
    %193 = arith.addf %160, %192 : vector<16x128xf32>
    %c1_i32_85 = arith.constant 1 : i32
    %194 = tpu.dynamic_rotate %184 by %c1_i32_85 dim 1 : vector<16x128xf32>, i32 -> vector<16x128xf32>
    %c1_i32_86 = arith.constant 1 : i32
    %195 = vector.broadcast %c1_i32_86 : i32 to vector<16x128xi32>
    %196 = arith.cmpi slt, %16, %195 : vector<16x128xi32>
    %cst_87 = arith.constant 0.000000e+00 : f32
    %197 = vector.broadcast %cst_87 : f32 to vector<16x128xf32>
    %198 = arith.select %196, %197, %194 : vector<16x128xi1>, vector<16x128xf32>
    %199 = vector.broadcast %185 : vector<1x128xf32> to vector<16x128xf32>
    %200 = arith.mulf %198, %199 : vector<16x128xf32>
    %201 = arith.addf %168, %200 : vector<16x128xf32>
    %c10 = arith.constant 10 : index
    %c0_88 = arith.constant 0 : index
    %202 = vector.load %arg1[%c10, %c0_88] : memref<36x128xf32, #tpu.memory_space<vmem>>, vector<1x128xf32>
    %203 = vector.broadcast %202 : vector<1x128xf32> to vector<16x128xf32>
    %204 = arith.mulf %179, %203 : vector<16x128xf32>
    %205 = arith.addf %193, %204 : vector<16x128xf32>
    %206 = vector.broadcast %202 : vector<1x128xf32> to vector<16x128xf32>
    %207 = arith.mulf %184, %206 : vector<16x128xf32>
    %208 = arith.addf %201, %207 : vector<16x128xf32>
    %c11 = arith.constant 11 : index
    %c0_89 = arith.constant 0 : index
    %209 = vector.load %arg1[%c11, %c0_89] : memref<36x128xf32, #tpu.memory_space<vmem>>, vector<1x128xf32>
    %c127_i32_90 = arith.constant 127 : i32
    %210 = tpu.dynamic_rotate %179 by %c127_i32_90 dim 1 : vector<16x128xf32>, i32 -> vector<16x128xf32>
    %c15_i32_91 = arith.constant 15 : i32
    %211 = vector.broadcast %c15_i32_91 : i32 to vector<16x128xi32>
    %212 = arith.cmpi sge, %16, %211 : vector<16x128xi32>
    %cst_92 = arith.constant 0.000000e+00 : f32
    %213 = vector.broadcast %cst_92 : f32 to vector<16x128xf32>
    %214 = arith.select %212, %213, %210 : vector<16x128xi1>, vector<16x128xf32>
    %215 = vector.broadcast %209 : vector<1x128xf32> to vector<16x128xf32>
    %216 = arith.mulf %214, %215 : vector<16x128xf32>
    %217 = arith.addf %205, %216 : vector<16x128xf32>
    %c127_i32_93 = arith.constant 127 : i32
    %218 = tpu.dynamic_rotate %184 by %c127_i32_93 dim 1 : vector<16x128xf32>, i32 -> vector<16x128xf32>
    %c15_i32_94 = arith.constant 15 : i32
    %219 = vector.broadcast %c15_i32_94 : i32 to vector<16x128xi32>
    %220 = arith.cmpi sge, %16, %219 : vector<16x128xi32>
    %cst_95 = arith.constant 0.000000e+00 : f32
    %221 = vector.broadcast %cst_95 : f32 to vector<16x128xf32>
    %222 = arith.select %220, %221, %218 : vector<16x128xi1>, vector<16x128xf32>
    %223 = vector.broadcast %209 : vector<1x128xf32> to vector<16x128xf32>
    %224 = arith.mulf %222, %223 : vector<16x128xf32>
    %225 = arith.addf %208, %224 : vector<16x128xf32>
    %c12 = arith.constant 12 : index
    %c0_96 = arith.constant 0 : index
    %226 = vector.load %arg1[%c12, %c0_96] : memref<36x128xf32, #tpu.memory_space<vmem>>, vector<1x128xf32>
    %c1_i32_97 = arith.constant 1 : i32
    %227 = tpu.dynamic_rotate %171 by %c1_i32_97 dim 1 : vector<16x128xf32>, i32 -> vector<16x128xf32>
    %c1_i32_98 = arith.constant 1 : i32
    %228 = vector.broadcast %c1_i32_98 : i32 to vector<16x128xi32>
    %229 = arith.cmpi slt, %16, %228 : vector<16x128xi32>
    %cst_99 = arith.constant 0.000000e+00 : f32
    %230 = vector.broadcast %cst_99 : f32 to vector<16x128xf32>
    %231 = arith.select %229, %230, %227 : vector<16x128xi1>, vector<16x128xf32>
    %232 = vector.broadcast %226 : vector<1x128xf32> to vector<16x128xf32>
    %233 = arith.mulf %231, %232 : vector<16x128xf32>
    %234 = arith.addf %217, %233 : vector<16x128xf32>
    %c1_i32_100 = arith.constant 1 : i32
    %235 = tpu.dynamic_rotate %174 by %c1_i32_100 dim 1 : vector<16x128xf32>, i32 -> vector<16x128xf32>
    %c1_i32_101 = arith.constant 1 : i32
    %236 = vector.broadcast %c1_i32_101 : i32 to vector<16x128xi32>
    %237 = arith.cmpi slt, %16, %236 : vector<16x128xi32>
    %cst_102 = arith.constant 0.000000e+00 : f32
    %238 = vector.broadcast %cst_102 : f32 to vector<16x128xf32>
    %239 = arith.select %237, %238, %235 : vector<16x128xi1>, vector<16x128xf32>
    %240 = vector.broadcast %226 : vector<1x128xf32> to vector<16x128xf32>
    %241 = arith.mulf %239, %240 : vector<16x128xf32>
    %242 = arith.addf %225, %241 : vector<16x128xf32>
    %c13 = arith.constant 13 : index
    %c0_103 = arith.constant 0 : index
    %243 = vector.load %arg1[%c13, %c0_103] : memref<36x128xf32, #tpu.memory_space<vmem>>, vector<1x128xf32>
    %244 = vector.broadcast %243 : vector<1x128xf32> to vector<16x128xf32>
    %245 = arith.mulf %171, %244 : vector<16x128xf32>
    %246 = arith.addf %234, %245 : vector<16x128xf32>
    %247 = vector.broadcast %243 : vector<1x128xf32> to vector<16x128xf32>
    %248 = arith.mulf %174, %247 : vector<16x128xf32>
    %249 = arith.addf %242, %248 : vector<16x128xf32>
    %c14 = arith.constant 14 : index
    %c0_104 = arith.constant 0 : index
    %250 = vector.load %arg1[%c14, %c0_104] : memref<36x128xf32, #tpu.memory_space<vmem>>, vector<1x128xf32>
    %c127_i32_105 = arith.constant 127 : i32
    %251 = tpu.dynamic_rotate %171 by %c127_i32_105 dim 1 : vector<16x128xf32>, i32 -> vector<16x128xf32>
    %c15_i32_106 = arith.constant 15 : i32
    %252 = vector.broadcast %c15_i32_106 : i32 to vector<16x128xi32>
    %253 = arith.cmpi sge, %16, %252 : vector<16x128xi32>
    %cst_107 = arith.constant 0.000000e+00 : f32
    %254 = vector.broadcast %cst_107 : f32 to vector<16x128xf32>
    %255 = arith.select %253, %254, %251 : vector<16x128xi1>, vector<16x128xf32>
    %256 = vector.broadcast %250 : vector<1x128xf32> to vector<16x128xf32>
    %257 = arith.mulf %255, %256 : vector<16x128xf32>
    %258 = arith.addf %246, %257 : vector<16x128xf32>
    %c127_i32_108 = arith.constant 127 : i32
    %259 = tpu.dynamic_rotate %174 by %c127_i32_108 dim 1 : vector<16x128xf32>, i32 -> vector<16x128xf32>
    %c15_i32_109 = arith.constant 15 : i32
    %260 = vector.broadcast %c15_i32_109 : i32 to vector<16x128xi32>
    %261 = arith.cmpi sge, %16, %260 : vector<16x128xi32>
    %cst_110 = arith.constant 0.000000e+00 : f32
    %262 = vector.broadcast %cst_110 : f32 to vector<16x128xf32>
    %263 = arith.select %261, %262, %259 : vector<16x128xi1>, vector<16x128xf32>
    %264 = vector.broadcast %250 : vector<1x128xf32> to vector<16x128xf32>
    %265 = arith.mulf %263, %264 : vector<16x128xf32>
    %266 = arith.addf %249, %265 : vector<16x128xf32>
    %c15_i32_111 = arith.constant 15 : i32
    %267 = tpu.dynamic_rotate %171 by %c15_i32_111 dim 0 : vector<16x128xf32>, i32 -> vector<16x128xf32>
    %c15_i32_112 = arith.constant 15 : i32
    %268 = vector.broadcast %c15_i32_112 : i32 to vector<16x128xi32>
    %269 = arith.cmpi sge, %17, %268 : vector<16x128xi32>
    %cst_113 = arith.constant 0.000000e+00 : f32
    %270 = vector.broadcast %cst_113 : f32 to vector<16x128xf32>
    %271 = arith.select %269, %270, %267 : vector<16x128xi1>, vector<16x128xf32>
    %c15_i32_114 = arith.constant 15 : i32
    %272 = tpu.dynamic_rotate %174 by %c15_i32_114 dim 0 : vector<16x128xf32>, i32 -> vector<16x128xf32>
    %c15_i32_115 = arith.constant 15 : i32
    %273 = vector.broadcast %c15_i32_115 : i32 to vector<16x128xi32>
    %274 = arith.cmpi sge, %17, %273 : vector<16x128xi32>
    %cst_116 = arith.constant 0.000000e+00 : f32
    %275 = vector.broadcast %cst_116 : f32 to vector<16x128xf32>
    %276 = arith.select %274, %275, %272 : vector<16x128xi1>, vector<16x128xf32>
    %c15 = arith.constant 15 : index
    %c0_117 = arith.constant 0 : index
    %277 = vector.load %arg1[%c15, %c0_117] : memref<36x128xf32, #tpu.memory_space<vmem>>, vector<1x128xf32>
    %c1_i32_118 = arith.constant 1 : i32
    %278 = tpu.dynamic_rotate %271 by %c1_i32_118 dim 1 : vector<16x128xf32>, i32 -> vector<16x128xf32>
    %c1_i32_119 = arith.constant 1 : i32
    %279 = vector.broadcast %c1_i32_119 : i32 to vector<16x128xi32>
    %280 = arith.cmpi slt, %16, %279 : vector<16x128xi32>
    %cst_120 = arith.constant 0.000000e+00 : f32
    %281 = vector.broadcast %cst_120 : f32 to vector<16x128xf32>
    %282 = arith.select %280, %281, %278 : vector<16x128xi1>, vector<16x128xf32>
    %283 = vector.broadcast %277 : vector<1x128xf32> to vector<16x128xf32>
    %284 = arith.mulf %282, %283 : vector<16x128xf32>
    %285 = arith.addf %258, %284 : vector<16x128xf32>
    %c1_i32_121 = arith.constant 1 : i32
    %286 = tpu.dynamic_rotate %276 by %c1_i32_121 dim 1 : vector<16x128xf32>, i32 -> vector<16x128xf32>
    %c1_i32_122 = arith.constant 1 : i32
    %287 = vector.broadcast %c1_i32_122 : i32 to vector<16x128xi32>
    %288 = arith.cmpi slt, %16, %287 : vector<16x128xi32>
    %cst_123 = arith.constant 0.000000e+00 : f32
    %289 = vector.broadcast %cst_123 : f32 to vector<16x128xf32>
    %290 = arith.select %288, %289, %286 : vector<16x128xi1>, vector<16x128xf32>
    %291 = vector.broadcast %277 : vector<1x128xf32> to vector<16x128xf32>
    %292 = arith.mulf %290, %291 : vector<16x128xf32>
    %293 = arith.addf %266, %292 : vector<16x128xf32>
    %c16 = arith.constant 16 : index
    %c0_124 = arith.constant 0 : index
    %294 = vector.load %arg1[%c16, %c0_124] : memref<36x128xf32, #tpu.memory_space<vmem>>, vector<1x128xf32>
    %295 = vector.broadcast %294 : vector<1x128xf32> to vector<16x128xf32>
    %296 = arith.mulf %271, %295 : vector<16x128xf32>
    %297 = arith.addf %285, %296 : vector<16x128xf32>
    %298 = vector.broadcast %294 : vector<1x128xf32> to vector<16x128xf32>
    %299 = arith.mulf %276, %298 : vector<16x128xf32>
    %300 = arith.addf %293, %299 : vector<16x128xf32>
    %c17 = arith.constant 17 : index
    %c0_125 = arith.constant 0 : index
    %301 = vector.load %arg1[%c17, %c0_125] : memref<36x128xf32, #tpu.memory_space<vmem>>, vector<1x128xf32>
    %c127_i32_126 = arith.constant 127 : i32
    %302 = tpu.dynamic_rotate %271 by %c127_i32_126 dim 1 : vector<16x128xf32>, i32 -> vector<16x128xf32>
    %c15_i32_127 = arith.constant 15 : i32
    %303 = vector.broadcast %c15_i32_127 : i32 to vector<16x128xi32>
    %304 = arith.cmpi sge, %16, %303 : vector<16x128xi32>
    %cst_128 = arith.constant 0.000000e+00 : f32
    %305 = vector.broadcast %cst_128 : f32 to vector<16x128xf32>
    %306 = arith.select %304, %305, %302 : vector<16x128xi1>, vector<16x128xf32>
    %307 = vector.broadcast %301 : vector<1x128xf32> to vector<16x128xf32>
    %308 = arith.mulf %306, %307 : vector<16x128xf32>
    %309 = arith.addf %297, %308 : vector<16x128xf32>
    %c127_i32_129 = arith.constant 127 : i32
    %310 = tpu.dynamic_rotate %276 by %c127_i32_129 dim 1 : vector<16x128xf32>, i32 -> vector<16x128xf32>
    %c15_i32_130 = arith.constant 15 : i32
    %311 = vector.broadcast %c15_i32_130 : i32 to vector<16x128xi32>
    %312 = arith.cmpi sge, %16, %311 : vector<16x128xi32>
    %cst_131 = arith.constant 0.000000e+00 : f32
    %313 = vector.broadcast %cst_131 : f32 to vector<16x128xf32>
    %314 = arith.select %312, %313, %310 : vector<16x128xi1>, vector<16x128xf32>
    %315 = vector.broadcast %301 : vector<1x128xf32> to vector<16x128xf32>
    %316 = arith.mulf %314, %315 : vector<16x128xf32>
    %317 = arith.addf %300, %316 : vector<16x128xf32>
    %c0_132 = arith.constant 0 : index
    %c2_133 = arith.constant 2 : index
    %c0_134 = arith.constant 0 : index
    %c0_135 = arith.constant 0 : index
    %318 = vector.load %arg0[%c0_132, %c2_133, %c0_134, %c0_135] : memref<2x4x16x16xf32, #tpu.memory_space<vmem>>, vector<1x1x16x16xf32>
    %319 = vector.shape_cast %318 : vector<1x1x16x16xf32> to vector<16x16xf32>
    %320 = tpu.concatenate %319, %319, %319, %319, %319, %319, %319, %319 in 1 : vector<16x16xf32>, vector<16x16xf32>, vector<16x16xf32>, vector<16x16xf32>, vector<16x16xf32>, vector<16x16xf32>, vector<16x16xf32>, vector<16x16xf32> -> vector<16x128xf32>
    %c1_136 = arith.constant 1 : index
    %c2_137 = arith.constant 2 : index
    %c0_138 = arith.constant 0 : index
    %c0_139 = arith.constant 0 : index
    %321 = vector.load %arg0[%c1_136, %c2_137, %c0_138, %c0_139] : memref<2x4x16x16xf32, #tpu.memory_space<vmem>>, vector<1x1x16x16xf32>
    %322 = vector.shape_cast %321 : vector<1x1x16x16xf32> to vector<16x16xf32>
    %323 = tpu.concatenate %322, %322, %322, %322, %322, %322, %322, %322 in 1 : vector<16x16xf32>, vector<16x16xf32>, vector<16x16xf32>, vector<16x16xf32>, vector<16x16xf32>, vector<16x16xf32>, vector<16x16xf32>, vector<16x16xf32> -> vector<16x128xf32>
    %c1_i32_140 = arith.constant 1 : i32
    %324 = tpu.dynamic_rotate %320 by %c1_i32_140 dim 0 : vector<16x128xf32>, i32 -> vector<16x128xf32>
    %c1_i32_141 = arith.constant 1 : i32
    %325 = vector.broadcast %c1_i32_141 : i32 to vector<16x128xi32>
    %326 = arith.cmpi slt, %17, %325 : vector<16x128xi32>
    %cst_142 = arith.constant 0.000000e+00 : f32
    %327 = vector.broadcast %cst_142 : f32 to vector<16x128xf32>
    %328 = arith.select %326, %327, %324 : vector<16x128xi1>, vector<16x128xf32>
    %c1_i32_143 = arith.constant 1 : i32
    %329 = tpu.dynamic_rotate %323 by %c1_i32_143 dim 0 : vector<16x128xf32>, i32 -> vector<16x128xf32>
    %c1_i32_144 = arith.constant 1 : i32
    %330 = vector.broadcast %c1_i32_144 : i32 to vector<16x128xi32>
    %331 = arith.cmpi slt, %17, %330 : vector<16x128xi32>
    %cst_145 = arith.constant 0.000000e+00 : f32
    %332 = vector.broadcast %cst_145 : f32 to vector<16x128xf32>
    %333 = arith.select %331, %332, %329 : vector<16x128xi1>, vector<16x128xf32>
    %c18 = arith.constant 18 : index
    %c0_146 = arith.constant 0 : index
    %334 = vector.load %arg1[%c18, %c0_146] : memref<36x128xf32, #tpu.memory_space<vmem>>, vector<1x128xf32>
    %c1_i32_147 = arith.constant 1 : i32
    %335 = tpu.dynamic_rotate %328 by %c1_i32_147 dim 1 : vector<16x128xf32>, i32 -> vector<16x128xf32>
    %c1_i32_148 = arith.constant 1 : i32
    %336 = vector.broadcast %c1_i32_148 : i32 to vector<16x128xi32>
    %337 = arith.cmpi slt, %16, %336 : vector<16x128xi32>
    %cst_149 = arith.constant 0.000000e+00 : f32
    %338 = vector.broadcast %cst_149 : f32 to vector<16x128xf32>
    %339 = arith.select %337, %338, %335 : vector<16x128xi1>, vector<16x128xf32>
    %340 = vector.broadcast %334 : vector<1x128xf32> to vector<16x128xf32>
    %341 = arith.mulf %339, %340 : vector<16x128xf32>
    %342 = arith.addf %309, %341 : vector<16x128xf32>
    %c1_i32_150 = arith.constant 1 : i32
    %343 = tpu.dynamic_rotate %333 by %c1_i32_150 dim 1 : vector<16x128xf32>, i32 -> vector<16x128xf32>
    %c1_i32_151 = arith.constant 1 : i32
    %344 = vector.broadcast %c1_i32_151 : i32 to vector<16x128xi32>
    %345 = arith.cmpi slt, %16, %344 : vector<16x128xi32>
    %cst_152 = arith.constant 0.000000e+00 : f32
    %346 = vector.broadcast %cst_152 : f32 to vector<16x128xf32>
    %347 = arith.select %345, %346, %343 : vector<16x128xi1>, vector<16x128xf32>
    %348 = vector.broadcast %334 : vector<1x128xf32> to vector<16x128xf32>
    %349 = arith.mulf %347, %348 : vector<16x128xf32>
    %350 = arith.addf %317, %349 : vector<16x128xf32>
    %c19 = arith.constant 19 : index
    %c0_153 = arith.constant 0 : index
    %351 = vector.load %arg1[%c19, %c0_153] : memref<36x128xf32, #tpu.memory_space<vmem>>, vector<1x128xf32>
    %352 = vector.broadcast %351 : vector<1x128xf32> to vector<16x128xf32>
    %353 = arith.mulf %328, %352 : vector<16x128xf32>
    %354 = arith.addf %342, %353 : vector<16x128xf32>
    %355 = vector.broadcast %351 : vector<1x128xf32> to vector<16x128xf32>
    %356 = arith.mulf %333, %355 : vector<16x128xf32>
    %357 = arith.addf %350, %356 : vector<16x128xf32>
    %c20 = arith.constant 20 : index
    %c0_154 = arith.constant 0 : index
    %358 = vector.load %arg1[%c20, %c0_154] : memref<36x128xf32, #tpu.memory_space<vmem>>, vector<1x128xf32>
    %c127_i32_155 = arith.constant 127 : i32
    %359 = tpu.dynamic_rotate %328 by %c127_i32_155 dim 1 : vector<16x128xf32>, i32 -> vector<16x128xf32>
    %c15_i32_156 = arith.constant 15 : i32
    %360 = vector.broadcast %c15_i32_156 : i32 to vector<16x128xi32>
    %361 = arith.cmpi sge, %16, %360 : vector<16x128xi32>
    %cst_157 = arith.constant 0.000000e+00 : f32
    %362 = vector.broadcast %cst_157 : f32 to vector<16x128xf32>
    %363 = arith.select %361, %362, %359 : vector<16x128xi1>, vector<16x128xf32>
    %364 = vector.broadcast %358 : vector<1x128xf32> to vector<16x128xf32>
    %365 = arith.mulf %363, %364 : vector<16x128xf32>
    %366 = arith.addf %354, %365 : vector<16x128xf32>
    %c127_i32_158 = arith.constant 127 : i32
    %367 = tpu.dynamic_rotate %333 by %c127_i32_158 dim 1 : vector<16x128xf32>, i32 -> vector<16x128xf32>
    %c15_i32_159 = arith.constant 15 : i32
    %368 = vector.broadcast %c15_i32_159 : i32 to vector<16x128xi32>
    %369 = arith.cmpi sge, %16, %368 : vector<16x128xi32>
    %cst_160 = arith.constant 0.000000e+00 : f32
    %370 = vector.broadcast %cst_160 : f32 to vector<16x128xf32>
    %371 = arith.select %369, %370, %367 : vector<16x128xi1>, vector<16x128xf32>
    %372 = vector.broadcast %358 : vector<1x128xf32> to vector<16x128xf32>
    %373 = arith.mulf %371, %372 : vector<16x128xf32>
    %374 = arith.addf %357, %373 : vector<16x128xf32>
    %c21 = arith.constant 21 : index
    %c0_161 = arith.constant 0 : index
    %375 = vector.load %arg1[%c21, %c0_161] : memref<36x128xf32, #tpu.memory_space<vmem>>, vector<1x128xf32>
    %c1_i32_162 = arith.constant 1 : i32
    %376 = tpu.dynamic_rotate %320 by %c1_i32_162 dim 1 : vector<16x128xf32>, i32 -> vector<16x128xf32>
    %c1_i32_163 = arith.constant 1 : i32
    %377 = vector.broadcast %c1_i32_163 : i32 to vector<16x128xi32>
    %378 = arith.cmpi slt, %16, %377 : vector<16x128xi32>
    %cst_164 = arith.constant 0.000000e+00 : f32
    %379 = vector.broadcast %cst_164 : f32 to vector<16x128xf32>
    %380 = arith.select %378, %379, %376 : vector<16x128xi1>, vector<16x128xf32>
    %381 = vector.broadcast %375 : vector<1x128xf32> to vector<16x128xf32>
    %382 = arith.mulf %380, %381 : vector<16x128xf32>
    %383 = arith.addf %366, %382 : vector<16x128xf32>
    %c1_i32_165 = arith.constant 1 : i32
    %384 = tpu.dynamic_rotate %323 by %c1_i32_165 dim 1 : vector<16x128xf32>, i32 -> vector<16x128xf32>
    %c1_i32_166 = arith.constant 1 : i32
    %385 = vector.broadcast %c1_i32_166 : i32 to vector<16x128xi32>
    %386 = arith.cmpi slt, %16, %385 : vector<16x128xi32>
    %cst_167 = arith.constant 0.000000e+00 : f32
    %387 = vector.broadcast %cst_167 : f32 to vector<16x128xf32>
    %388 = arith.select %386, %387, %384 : vector<16x128xi1>, vector<16x128xf32>
    %389 = vector.broadcast %375 : vector<1x128xf32> to vector<16x128xf32>
    %390 = arith.mulf %388, %389 : vector<16x128xf32>
    %391 = arith.addf %374, %390 : vector<16x128xf32>
    %c22 = arith.constant 22 : index
    %c0_168 = arith.constant 0 : index
    %392 = vector.load %arg1[%c22, %c0_168] : memref<36x128xf32, #tpu.memory_space<vmem>>, vector<1x128xf32>
    %393 = vector.broadcast %392 : vector<1x128xf32> to vector<16x128xf32>
    %394 = arith.mulf %320, %393 : vector<16x128xf32>
    %395 = arith.addf %383, %394 : vector<16x128xf32>
    %396 = vector.broadcast %392 : vector<1x128xf32> to vector<16x128xf32>
    %397 = arith.mulf %323, %396 : vector<16x128xf32>
    %398 = arith.addf %391, %397 : vector<16x128xf32>
    %c23 = arith.constant 23 : index
    %c0_169 = arith.constant 0 : index
    %399 = vector.load %arg1[%c23, %c0_169] : memref<36x128xf32, #tpu.memory_space<vmem>>, vector<1x128xf32>
    %c127_i32_170 = arith.constant 127 : i32
    %400 = tpu.dynamic_rotate %320 by %c127_i32_170 dim 1 : vector<16x128xf32>, i32 -> vector<16x128xf32>
    %c15_i32_171 = arith.constant 15 : i32
    %401 = vector.broadcast %c15_i32_171 : i32 to vector<16x128xi32>
    %402 = arith.cmpi sge, %16, %401 : vector<16x128xi32>
    %cst_172 = arith.constant 0.000000e+00 : f32
    %403 = vector.broadcast %cst_172 : f32 to vector<16x128xf32>
    %404 = arith.select %402, %403, %400 : vector<16x128xi1>, vector<16x128xf32>
    %405 = vector.broadcast %399 : vector<1x128xf32> to vector<16x128xf32>
    %406 = arith.mulf %404, %405 : vector<16x128xf32>
    %407 = arith.addf %395, %406 : vector<16x128xf32>
    %c127_i32_173 = arith.constant 127 : i32
    %408 = tpu.dynamic_rotate %323 by %c127_i32_173 dim 1 : vector<16x128xf32>, i32 -> vector<16x128xf32>
    %c15_i32_174 = arith.constant 15 : i32
    %409 = vector.broadcast %c15_i32_174 : i32 to vector<16x128xi32>
    %410 = arith.cmpi sge, %16, %409 : vector<16x128xi32>
    %cst_175 = arith.constant 0.000000e+00 : f32
    %411 = vector.broadcast %cst_175 : f32 to vector<16x128xf32>
    %412 = arith.select %410, %411, %408 : vector<16x128xi1>, vector<16x128xf32>
    %413 = vector.broadcast %399 : vector<1x128xf32> to vector<16x128xf32>
    %414 = arith.mulf %412, %413 : vector<16x128xf32>
    %415 = arith.addf %398, %414 : vector<16x128xf32>
    %c15_i32_176 = arith.constant 15 : i32
    %416 = tpu.dynamic_rotate %320 by %c15_i32_176 dim 0 : vector<16x128xf32>, i32 -> vector<16x128xf32>
    %c15_i32_177 = arith.constant 15 : i32
    %417 = vector.broadcast %c15_i32_177 : i32 to vector<16x128xi32>
    %418 = arith.cmpi sge, %17, %417 : vector<16x128xi32>
    %cst_178 = arith.constant 0.000000e+00 : f32
    %419 = vector.broadcast %cst_178 : f32 to vector<16x128xf32>
    %420 = arith.select %418, %419, %416 : vector<16x128xi1>, vector<16x128xf32>
    %c15_i32_179 = arith.constant 15 : i32
    %421 = tpu.dynamic_rotate %323 by %c15_i32_179 dim 0 : vector<16x128xf32>, i32 -> vector<16x128xf32>
    %c15_i32_180 = arith.constant 15 : i32
    %422 = vector.broadcast %c15_i32_180 : i32 to vector<16x128xi32>
    %423 = arith.cmpi sge, %17, %422 : vector<16x128xi32>
    %cst_181 = arith.constant 0.000000e+00 : f32
    %424 = vector.broadcast %cst_181 : f32 to vector<16x128xf32>
    %425 = arith.select %423, %424, %421 : vector<16x128xi1>, vector<16x128xf32>
    %c24 = arith.constant 24 : index
    %c0_182 = arith.constant 0 : index
    %426 = vector.load %arg1[%c24, %c0_182] : memref<36x128xf32, #tpu.memory_space<vmem>>, vector<1x128xf32>
    %c1_i32_183 = arith.constant 1 : i32
    %427 = tpu.dynamic_rotate %420 by %c1_i32_183 dim 1 : vector<16x128xf32>, i32 -> vector<16x128xf32>
    %c1_i32_184 = arith.constant 1 : i32
    %428 = vector.broadcast %c1_i32_184 : i32 to vector<16x128xi32>
    %429 = arith.cmpi slt, %16, %428 : vector<16x128xi32>
    %cst_185 = arith.constant 0.000000e+00 : f32
    %430 = vector.broadcast %cst_185 : f32 to vector<16x128xf32>
    %431 = arith.select %429, %430, %427 : vector<16x128xi1>, vector<16x128xf32>
    %432 = vector.broadcast %426 : vector<1x128xf32> to vector<16x128xf32>
    %433 = arith.mulf %431, %432 : vector<16x128xf32>
    %434 = arith.addf %407, %433 : vector<16x128xf32>
    %c1_i32_186 = arith.constant 1 : i32
    %435 = tpu.dynamic_rotate %425 by %c1_i32_186 dim 1 : vector<16x128xf32>, i32 -> vector<16x128xf32>
    %c1_i32_187 = arith.constant 1 : i32
    %436 = vector.broadcast %c1_i32_187 : i32 to vector<16x128xi32>
    %437 = arith.cmpi slt, %16, %436 : vector<16x128xi32>
    %cst_188 = arith.constant 0.000000e+00 : f32
    %438 = vector.broadcast %cst_188 : f32 to vector<16x128xf32>
    %439 = arith.select %437, %438, %435 : vector<16x128xi1>, vector<16x128xf32>
    %440 = vector.broadcast %426 : vector<1x128xf32> to vector<16x128xf32>
    %441 = arith.mulf %439, %440 : vector<16x128xf32>
    %442 = arith.addf %415, %441 : vector<16x128xf32>
    %c25 = arith.constant 25 : index
    %c0_189 = arith.constant 0 : index
    %443 = vector.load %arg1[%c25, %c0_189] : memref<36x128xf32, #tpu.memory_space<vmem>>, vector<1x128xf32>
    %444 = vector.broadcast %443 : vector<1x128xf32> to vector<16x128xf32>
    %445 = arith.mulf %420, %444 : vector<16x128xf32>
    %446 = arith.addf %434, %445 : vector<16x128xf32>
    %447 = vector.broadcast %443 : vector<1x128xf32> to vector<16x128xf32>
    %448 = arith.mulf %425, %447 : vector<16x128xf32>
    %449 = arith.addf %442, %448 : vector<16x128xf32>
    %c26 = arith.constant 26 : index
    %c0_190 = arith.constant 0 : index
    %450 = vector.load %arg1[%c26, %c0_190] : memref<36x128xf32, #tpu.memory_space<vmem>>, vector<1x128xf32>
    %c127_i32_191 = arith.constant 127 : i32
    %451 = tpu.dynamic_rotate %420 by %c127_i32_191 dim 1 : vector<16x128xf32>, i32 -> vector<16x128xf32>
    %c15_i32_192 = arith.constant 15 : i32
    %452 = vector.broadcast %c15_i32_192 : i32 to vector<16x128xi32>
    %453 = arith.cmpi sge, %16, %452 : vector<16x128xi32>
    %cst_193 = arith.constant 0.000000e+00 : f32
    %454 = vector.broadcast %cst_193 : f32 to vector<16x128xf32>
    %455 = arith.select %453, %454, %451 : vector<16x128xi1>, vector<16x128xf32>
    %456 = vector.broadcast %450 : vector<1x128xf32> to vector<16x128xf32>
    %457 = arith.mulf %455, %456 : vector<16x128xf32>
    %458 = arith.addf %446, %457 : vector<16x128xf32>
    %c127_i32_194 = arith.constant 127 : i32
    %459 = tpu.dynamic_rotate %425 by %c127_i32_194 dim 1 : vector<16x128xf32>, i32 -> vector<16x128xf32>
    %c15_i32_195 = arith.constant 15 : i32
    %460 = vector.broadcast %c15_i32_195 : i32 to vector<16x128xi32>
    %461 = arith.cmpi sge, %16, %460 : vector<16x128xi32>
    %cst_196 = arith.constant 0.000000e+00 : f32
    %462 = vector.broadcast %cst_196 : f32 to vector<16x128xf32>
    %463 = arith.select %461, %462, %459 : vector<16x128xi1>, vector<16x128xf32>
    %464 = vector.broadcast %450 : vector<1x128xf32> to vector<16x128xf32>
    %465 = arith.mulf %463, %464 : vector<16x128xf32>
    %466 = arith.addf %449, %465 : vector<16x128xf32>
    %c0_197 = arith.constant 0 : index
    %c3_198 = arith.constant 3 : index
    %c0_199 = arith.constant 0 : index
    %c0_200 = arith.constant 0 : index
    %467 = vector.load %arg0[%c0_197, %c3_198, %c0_199, %c0_200] : memref<2x4x16x16xf32, #tpu.memory_space<vmem>>, vector<1x1x16x16xf32>
    %468 = vector.shape_cast %467 : vector<1x1x16x16xf32> to vector<16x16xf32>
    %469 = tpu.concatenate %468, %468, %468, %468, %468, %468, %468, %468 in 1 : vector<16x16xf32>, vector<16x16xf32>, vector<16x16xf32>, vector<16x16xf32>, vector<16x16xf32>, vector<16x16xf32>, vector<16x16xf32>, vector<16x16xf32> -> vector<16x128xf32>
    %c1_201 = arith.constant 1 : index
    %c3_202 = arith.constant 3 : index
    %c0_203 = arith.constant 0 : index
    %c0_204 = arith.constant 0 : index
    %470 = vector.load %arg0[%c1_201, %c3_202, %c0_203, %c0_204] : memref<2x4x16x16xf32, #tpu.memory_space<vmem>>, vector<1x1x16x16xf32>
    %471 = vector.shape_cast %470 : vector<1x1x16x16xf32> to vector<16x16xf32>
    %472 = tpu.concatenate %471, %471, %471, %471, %471, %471, %471, %471 in 1 : vector<16x16xf32>, vector<16x16xf32>, vector<16x16xf32>, vector<16x16xf32>, vector<16x16xf32>, vector<16x16xf32>, vector<16x16xf32>, vector<16x16xf32> -> vector<16x128xf32>
    %c1_i32_205 = arith.constant 1 : i32
    %473 = tpu.dynamic_rotate %469 by %c1_i32_205 dim 0 : vector<16x128xf32>, i32 -> vector<16x128xf32>
    %c1_i32_206 = arith.constant 1 : i32
    %474 = vector.broadcast %c1_i32_206 : i32 to vector<16x128xi32>
    %475 = arith.cmpi slt, %17, %474 : vector<16x128xi32>
    %cst_207 = arith.constant 0.000000e+00 : f32
    %476 = vector.broadcast %cst_207 : f32 to vector<16x128xf32>
    %477 = arith.select %475, %476, %473 : vector<16x128xi1>, vector<16x128xf32>
    %c1_i32_208 = arith.constant 1 : i32
    %478 = tpu.dynamic_rotate %472 by %c1_i32_208 dim 0 : vector<16x128xf32>, i32 -> vector<16x128xf32>
    %c1_i32_209 = arith.constant 1 : i32
    %479 = vector.broadcast %c1_i32_209 : i32 to vector<16x128xi32>
    %480 = arith.cmpi slt, %17, %479 : vector<16x128xi32>
    %cst_210 = arith.constant 0.000000e+00 : f32
    %481 = vector.broadcast %cst_210 : f32 to vector<16x128xf32>
    %482 = arith.select %480, %481, %478 : vector<16x128xi1>, vector<16x128xf32>
    %c27 = arith.constant 27 : index
    %c0_211 = arith.constant 0 : index
    %483 = vector.load %arg1[%c27, %c0_211] : memref<36x128xf32, #tpu.memory_space<vmem>>, vector<1x128xf32>
    %c1_i32_212 = arith.constant 1 : i32
    %484 = tpu.dynamic_rotate %477 by %c1_i32_212 dim 1 : vector<16x128xf32>, i32 -> vector<16x128xf32>
    %c1_i32_213 = arith.constant 1 : i32
    %485 = vector.broadcast %c1_i32_213 : i32 to vector<16x128xi32>
    %486 = arith.cmpi slt, %16, %485 : vector<16x128xi32>
    %cst_214 = arith.constant 0.000000e+00 : f32
    %487 = vector.broadcast %cst_214 : f32 to vector<16x128xf32>
    %488 = arith.select %486, %487, %484 : vector<16x128xi1>, vector<16x128xf32>
    %489 = vector.broadcast %483 : vector<1x128xf32> to vector<16x128xf32>
    %490 = arith.mulf %488, %489 : vector<16x128xf32>
    %491 = arith.addf %458, %490 : vector<16x128xf32>
    %c1_i32_215 = arith.constant 1 : i32
    %492 = tpu.dynamic_rotate %482 by %c1_i32_215 dim 1 : vector<16x128xf32>, i32 -> vector<16x128xf32>
    %c1_i32_216 = arith.constant 1 : i32
    %493 = vector.broadcast %c1_i32_216 : i32 to vector<16x128xi32>
    %494 = arith.cmpi slt, %16, %493 : vector<16x128xi32>
    %cst_217 = arith.constant 0.000000e+00 : f32
    %495 = vector.broadcast %cst_217 : f32 to vector<16x128xf32>
    %496 = arith.select %494, %495, %492 : vector<16x128xi1>, vector<16x128xf32>
    %497 = vector.broadcast %483 : vector<1x128xf32> to vector<16x128xf32>
    %498 = arith.mulf %496, %497 : vector<16x128xf32>
    %499 = arith.addf %466, %498 : vector<16x128xf32>
    %c28 = arith.constant 28 : index
    %c0_218 = arith.constant 0 : index
    %500 = vector.load %arg1[%c28, %c0_218] : memref<36x128xf32, #tpu.memory_space<vmem>>, vector<1x128xf32>
    %501 = vector.broadcast %500 : vector<1x128xf32> to vector<16x128xf32>
    %502 = arith.mulf %477, %501 : vector<16x128xf32>
    %503 = arith.addf %491, %502 : vector<16x128xf32>
    %504 = vector.broadcast %500 : vector<1x128xf32> to vector<16x128xf32>
    %505 = arith.mulf %482, %504 : vector<16x128xf32>
    %506 = arith.addf %499, %505 : vector<16x128xf32>
    %c29 = arith.constant 29 : index
    %c0_219 = arith.constant 0 : index
    %507 = vector.load %arg1[%c29, %c0_219] : memref<36x128xf32, #tpu.memory_space<vmem>>, vector<1x128xf32>
    %c127_i32_220 = arith.constant 127 : i32
    %508 = tpu.dynamic_rotate %477 by %c127_i32_220 dim 1 : vector<16x128xf32>, i32 -> vector<16x128xf32>
    %c15_i32_221 = arith.constant 15 : i32
    %509 = vector.broadcast %c15_i32_221 : i32 to vector<16x128xi32>
    %510 = arith.cmpi sge, %16, %509 : vector<16x128xi32>
    %cst_222 = arith.constant 0.000000e+00 : f32
    %511 = vector.broadcast %cst_222 : f32 to vector<16x128xf32>
    %512 = arith.select %510, %511, %508 : vector<16x128xi1>, vector<16x128xf32>
    %513 = vector.broadcast %507 : vector<1x128xf32> to vector<16x128xf32>
    %514 = arith.mulf %512, %513 : vector<16x128xf32>
    %515 = arith.addf %503, %514 : vector<16x128xf32>
    %c127_i32_223 = arith.constant 127 : i32
    %516 = tpu.dynamic_rotate %482 by %c127_i32_223 dim 1 : vector<16x128xf32>, i32 -> vector<16x128xf32>
    %c15_i32_224 = arith.constant 15 : i32
    %517 = vector.broadcast %c15_i32_224 : i32 to vector<16x128xi32>
    %518 = arith.cmpi sge, %16, %517 : vector<16x128xi32>
    %cst_225 = arith.constant 0.000000e+00 : f32
    %519 = vector.broadcast %cst_225 : f32 to vector<16x128xf32>
    %520 = arith.select %518, %519, %516 : vector<16x128xi1>, vector<16x128xf32>
    %521 = vector.broadcast %507 : vector<1x128xf32> to vector<16x128xf32>
    %522 = arith.mulf %520, %521 : vector<16x128xf32>
    %523 = arith.addf %506, %522 : vector<16x128xf32>
    %c30 = arith.constant 30 : index
    %c0_226 = arith.constant 0 : index
    %524 = vector.load %arg1[%c30, %c0_226] : memref<36x128xf32, #tpu.memory_space<vmem>>, vector<1x128xf32>
    %c1_i32_227 = arith.constant 1 : i32
    %525 = tpu.dynamic_rotate %469 by %c1_i32_227 dim 1 : vector<16x128xf32>, i32 -> vector<16x128xf32>
    %c1_i32_228 = arith.constant 1 : i32
    %526 = vector.broadcast %c1_i32_228 : i32 to vector<16x128xi32>
    %527 = arith.cmpi slt, %16, %526 : vector<16x128xi32>
    %cst_229 = arith.constant 0.000000e+00 : f32
    %528 = vector.broadcast %cst_229 : f32 to vector<16x128xf32>
    %529 = arith.select %527, %528, %525 : vector<16x128xi1>, vector<16x128xf32>
    %530 = vector.broadcast %524 : vector<1x128xf32> to vector<16x128xf32>
    %531 = arith.mulf %529, %530 : vector<16x128xf32>
    %532 = arith.addf %515, %531 : vector<16x128xf32>
    %c1_i32_230 = arith.constant 1 : i32
    %533 = tpu.dynamic_rotate %472 by %c1_i32_230 dim 1 : vector<16x128xf32>, i32 -> vector<16x128xf32>
    %c1_i32_231 = arith.constant 1 : i32
    %534 = vector.broadcast %c1_i32_231 : i32 to vector<16x128xi32>
    %535 = arith.cmpi slt, %16, %534 : vector<16x128xi32>
    %cst_232 = arith.constant 0.000000e+00 : f32
    %536 = vector.broadcast %cst_232 : f32 to vector<16x128xf32>
    %537 = arith.select %535, %536, %533 : vector<16x128xi1>, vector<16x128xf32>
    %538 = vector.broadcast %524 : vector<1x128xf32> to vector<16x128xf32>
    %539 = arith.mulf %537, %538 : vector<16x128xf32>
    %540 = arith.addf %523, %539 : vector<16x128xf32>
    %c31 = arith.constant 31 : index
    %c0_233 = arith.constant 0 : index
    %541 = vector.load %arg1[%c31, %c0_233] : memref<36x128xf32, #tpu.memory_space<vmem>>, vector<1x128xf32>
    %542 = vector.broadcast %541 : vector<1x128xf32> to vector<16x128xf32>
    %543 = arith.mulf %469, %542 : vector<16x128xf32>
    %544 = arith.addf %532, %543 : vector<16x128xf32>
    %545 = vector.broadcast %541 : vector<1x128xf32> to vector<16x128xf32>
    %546 = arith.mulf %472, %545 : vector<16x128xf32>
    %547 = arith.addf %540, %546 : vector<16x128xf32>
    %c32 = arith.constant 32 : index
    %c0_234 = arith.constant 0 : index
    %548 = vector.load %arg1[%c32, %c0_234] : memref<36x128xf32, #tpu.memory_space<vmem>>, vector<1x128xf32>
    %c127_i32_235 = arith.constant 127 : i32
    %549 = tpu.dynamic_rotate %469 by %c127_i32_235 dim 1 : vector<16x128xf32>, i32 -> vector<16x128xf32>
    %c15_i32_236 = arith.constant 15 : i32
    %550 = vector.broadcast %c15_i32_236 : i32 to vector<16x128xi32>
    %551 = arith.cmpi sge, %16, %550 : vector<16x128xi32>
    %cst_237 = arith.constant 0.000000e+00 : f32
    %552 = vector.broadcast %cst_237 : f32 to vector<16x128xf32>
    %553 = arith.select %551, %552, %549 : vector<16x128xi1>, vector<16x128xf32>
    %554 = vector.broadcast %548 : vector<1x128xf32> to vector<16x128xf32>
    %555 = arith.mulf %553, %554 : vector<16x128xf32>
    %556 = arith.addf %544, %555 : vector<16x128xf32>
    %c127_i32_238 = arith.constant 127 : i32
    %557 = tpu.dynamic_rotate %472 by %c127_i32_238 dim 1 : vector<16x128xf32>, i32 -> vector<16x128xf32>
    %c15_i32_239 = arith.constant 15 : i32
    %558 = vector.broadcast %c15_i32_239 : i32 to vector<16x128xi32>
    %559 = arith.cmpi sge, %16, %558 : vector<16x128xi32>
    %cst_240 = arith.constant 0.000000e+00 : f32
    %560 = vector.broadcast %cst_240 : f32 to vector<16x128xf32>
    %561 = arith.select %559, %560, %557 : vector<16x128xi1>, vector<16x128xf32>
    %562 = vector.broadcast %548 : vector<1x128xf32> to vector<16x128xf32>
    %563 = arith.mulf %561, %562 : vector<16x128xf32>
    %564 = arith.addf %547, %563 : vector<16x128xf32>
    %c15_i32_241 = arith.constant 15 : i32
    %565 = tpu.dynamic_rotate %469 by %c15_i32_241 dim 0 : vector<16x128xf32>, i32 -> vector<16x128xf32>
    %c15_i32_242 = arith.constant 15 : i32
    %566 = vector.broadcast %c15_i32_242 : i32 to vector<16x128xi32>
    %567 = arith.cmpi sge, %17, %566 : vector<16x128xi32>
    %cst_243 = arith.constant 0.000000e+00 : f32
    %568 = vector.broadcast %cst_243 : f32 to vector<16x128xf32>
    %569 = arith.select %567, %568, %565 : vector<16x128xi1>, vector<16x128xf32>
    %c15_i32_244 = arith.constant 15 : i32
    %570 = tpu.dynamic_rotate %472 by %c15_i32_244 dim 0 : vector<16x128xf32>, i32 -> vector<16x128xf32>
    %c15_i32_245 = arith.constant 15 : i32
    %571 = vector.broadcast %c15_i32_245 : i32 to vector<16x128xi32>
    %572 = arith.cmpi sge, %17, %571 : vector<16x128xi32>
    %cst_246 = arith.constant 0.000000e+00 : f32
    %573 = vector.broadcast %cst_246 : f32 to vector<16x128xf32>
    %574 = arith.select %572, %573, %570 : vector<16x128xi1>, vector<16x128xf32>
    %c33 = arith.constant 33 : index
    %c0_247 = arith.constant 0 : index
    %575 = vector.load %arg1[%c33, %c0_247] : memref<36x128xf32, #tpu.memory_space<vmem>>, vector<1x128xf32>
    %c1_i32_248 = arith.constant 1 : i32
    %576 = tpu.dynamic_rotate %569 by %c1_i32_248 dim 1 : vector<16x128xf32>, i32 -> vector<16x128xf32>
    %c1_i32_249 = arith.constant 1 : i32
    %577 = vector.broadcast %c1_i32_249 : i32 to vector<16x128xi32>
    %578 = arith.cmpi slt, %16, %577 : vector<16x128xi32>
    %cst_250 = arith.constant 0.000000e+00 : f32
    %579 = vector.broadcast %cst_250 : f32 to vector<16x128xf32>
    %580 = arith.select %578, %579, %576 : vector<16x128xi1>, vector<16x128xf32>
    %581 = vector.broadcast %575 : vector<1x128xf32> to vector<16x128xf32>
    %582 = arith.mulf %580, %581 : vector<16x128xf32>
    %583 = arith.addf %556, %582 : vector<16x128xf32>
    %c1_i32_251 = arith.constant 1 : i32
    %584 = tpu.dynamic_rotate %574 by %c1_i32_251 dim 1 : vector<16x128xf32>, i32 -> vector<16x128xf32>
    %c1_i32_252 = arith.constant 1 : i32
    %585 = vector.broadcast %c1_i32_252 : i32 to vector<16x128xi32>
    %586 = arith.cmpi slt, %16, %585 : vector<16x128xi32>
    %cst_253 = arith.constant 0.000000e+00 : f32
    %587 = vector.broadcast %cst_253 : f32 to vector<16x128xf32>
    %588 = arith.select %586, %587, %584 : vector<16x128xi1>, vector<16x128xf32>
    %589 = vector.broadcast %575 : vector<1x128xf32> to vector<16x128xf32>
    %590 = arith.mulf %588, %589 : vector<16x128xf32>
    %591 = arith.addf %564, %590 : vector<16x128xf32>
    %c34 = arith.constant 34 : index
    %c0_254 = arith.constant 0 : index
    %592 = vector.load %arg1[%c34, %c0_254] : memref<36x128xf32, #tpu.memory_space<vmem>>, vector<1x128xf32>
    %593 = vector.broadcast %592 : vector<1x128xf32> to vector<16x128xf32>
    %594 = arith.mulf %569, %593 : vector<16x128xf32>
    %595 = arith.addf %583, %594 : vector<16x128xf32>
    %596 = vector.broadcast %592 : vector<1x128xf32> to vector<16x128xf32>
    %597 = arith.mulf %574, %596 : vector<16x128xf32>
    %598 = arith.addf %591, %597 : vector<16x128xf32>
    %c35 = arith.constant 35 : index
    %c0_255 = arith.constant 0 : index
    %599 = vector.load %arg1[%c35, %c0_255] : memref<36x128xf32, #tpu.memory_space<vmem>>, vector<1x128xf32>
    %c127_i32_256 = arith.constant 127 : i32
    %600 = tpu.dynamic_rotate %569 by %c127_i32_256 dim 1 : vector<16x128xf32>, i32 -> vector<16x128xf32>
    %c15_i32_257 = arith.constant 15 : i32
    %601 = vector.broadcast %c15_i32_257 : i32 to vector<16x128xi32>
    %602 = arith.cmpi sge, %16, %601 : vector<16x128xi32>
    %cst_258 = arith.constant 0.000000e+00 : f32
    %603 = vector.broadcast %cst_258 : f32 to vector<16x128xf32>
    %604 = arith.select %602, %603, %600 : vector<16x128xi1>, vector<16x128xf32>
    %605 = vector.broadcast %599 : vector<1x128xf32> to vector<16x128xf32>
    %606 = arith.mulf %604, %605 : vector<16x128xf32>
    %607 = arith.addf %595, %606 : vector<16x128xf32>
    %c127_i32_259 = arith.constant 127 : i32
    %608 = tpu.dynamic_rotate %574 by %c127_i32_259 dim 1 : vector<16x128xf32>, i32 -> vector<16x128xf32>
    %c15_i32_260 = arith.constant 15 : i32
    %609 = vector.broadcast %c15_i32_260 : i32 to vector<16x128xi32>
    %610 = arith.cmpi sge, %16, %609 : vector<16x128xi32>
    %cst_261 = arith.constant 0.000000e+00 : f32
    %611 = vector.broadcast %cst_261 : f32 to vector<16x128xf32>
    %612 = arith.select %610, %611, %608 : vector<16x128xi1>, vector<16x128xf32>
    %613 = vector.broadcast %599 : vector<1x128xf32> to vector<16x128xf32>
    %614 = arith.mulf %612, %613 : vector<16x128xf32>
    %615 = arith.addf %598, %614 : vector<16x128xf32>
    %616 = arith.mulf %607, %607 : vector<16x128xf32>
    %617 = arith.addf %607, %615 : vector<16x128xf32>
    %618 = arith.mulf %615, %615 : vector<16x128xf32>
    %619 = arith.addf %616, %618 : vector<16x128xf32>
    %cst_262 = arith.constant dense<0.000000e+00> : vector<128xf32>
    %620 = vector.multi_reduction <add>, %617, %cst_262 [0] : vector<16x128xf32> to vector<128xf32>
    %621 = vector.shape_cast %620 : vector<128xf32> to vector<1x128xf32>
    %cst_263 = arith.constant dense<0.000000e+00> : vector<128xf32>
    %622 = vector.multi_reduction <add>, %619, %cst_263 [0] : vector<16x128xf32> to vector<128xf32>
    %623 = vector.shape_cast %622 : vector<128xf32> to vector<1x128xf32>
    %624 = tpu.concatenate %621, %623 in 0 : vector<1x128xf32>, vector<1x128xf32> -> vector<2x128xf32>
    %c1_i32_264 = arith.constant 1 : i32
    %625 = tpu.dynamic_rotate %624 by %c1_i32_264 dim 1 : vector<2x128xf32>, i32 -> vector<2x128xf32>
    %626 = arith.addf %624, %625 : vector<2x128xf32>
    %c2_i32 = arith.constant 2 : i32
    %627 = tpu.dynamic_rotate %626 by %c2_i32 dim 1 : vector<2x128xf32>, i32 -> vector<2x128xf32>
    %628 = arith.addf %626, %627 : vector<2x128xf32>
    %c4_i32 = arith.constant 4 : i32
    %629 = tpu.dynamic_rotate %628 by %c4_i32 dim 1 : vector<2x128xf32>, i32 -> vector<2x128xf32>
    %630 = arith.addf %628, %629 : vector<2x128xf32>
    %c8_i32 = arith.constant 8 : i32
    %631 = tpu.dynamic_rotate %630 by %c8_i32 dim 1 : vector<2x128xf32>, i32 -> vector<2x128xf32>
    %632 = arith.addf %630, %631 : vector<2x128xf32>
    %633 = tpu.iota {dimensions = array<i32: 1>} : vector<2x128xi32>
    %c16_i32_265 = arith.constant 16 : i32
    %c0_i32_266 = arith.constant 0 : i32
    %634 = arith.cmpi eq, %c16_i32_265, %c0_i32_266 : i32
    %c1_i32_267 = arith.constant 1 : i32
    %635 = arith.select %634, %c1_i32_267, %c16_i32_265 : i32
    %636 = vector.broadcast %635 : i32 to vector<2x128xi32>
    %637 = arith.remsi %633, %636 : vector<2x128xi32>
    %c0_i32_268 = arith.constant 0 : i32
    %638 = vector.broadcast %c0_i32_268 : i32 to vector<2x128xi32>
    %639 = arith.cmpi ne, %637, %638 : vector<2x128xi32>
    %c0_i32_269 = arith.constant 0 : i32
    %640 = vector.broadcast %c0_i32_269 : i32 to vector<2x128xi32>
    %641 = arith.cmpi slt, %637, %640 : vector<2x128xi32>
    %c0_i32_270 = arith.constant 0 : i32
    %642 = arith.cmpi slt, %635, %c0_i32_270 : i32
    %643 = vector.broadcast %642 : i1 to vector<2x128xi1>
    %644 = vector.broadcast %643 : vector<2x128xi1> to vector<2x128xi1>
    %645 = arith.xori %641, %644 : vector<2x128xi1>
    %646 = arith.andi %645, %639 : vector<2x128xi1>
    %647 = vector.broadcast %635 : i32 to vector<2x128xi32>
    %648 = arith.addi %637, %647 : vector<2x128xi32>
    %649 = arith.select %646, %648, %637 : vector<2x128xi1>, vector<2x128xi32>
    %c15_i32_271 = arith.constant 15 : i32
    %650 = vector.broadcast %c15_i32_271 : i32 to vector<2x128xi32>
    %651 = arith.cmpi eq, %649, %650 : vector<2x128xi32>
    %cst_272 = arith.constant 0.000000e+00 : f32
    %652 = vector.broadcast %cst_272 : f32 to vector<2x128xf32>
    %653 = arith.select %651, %632, %652 : vector<2x128xi1>, vector<2x128xf32>
    %c127_i32_273 = arith.constant 127 : i32
    %654 = tpu.dynamic_rotate %653 by %c127_i32_273 dim 1 : vector<2x128xf32>, i32 -> vector<2x128xf32>
    %655 = arith.addf %653, %654 : vector<2x128xf32>
    %c126_i32 = arith.constant 126 : i32
    %656 = tpu.dynamic_rotate %655 by %c126_i32 dim 1 : vector<2x128xf32>, i32 -> vector<2x128xf32>
    %657 = arith.addf %655, %656 : vector<2x128xf32>
    %c124_i32 = arith.constant 124 : i32
    %658 = tpu.dynamic_rotate %657 by %c124_i32 dim 1 : vector<2x128xf32>, i32 -> vector<2x128xf32>
    %659 = arith.addf %657, %658 : vector<2x128xf32>
    %c120_i32 = arith.constant 120 : i32
    %660 = tpu.dynamic_rotate %659 by %c120_i32 dim 1 : vector<2x128xf32>, i32 -> vector<2x128xf32>
    %661 = arith.addf %659, %660 : vector<2x128xf32>
    %662 = vector.extract_strided_slice %661 {offsets = [0, 0], sizes = [1, 128], strides = [1, 1]} : vector<2x128xf32> to vector<1x128xf32>
    %cst_274 = arith.constant 0.001953125 : f32
    %663 = vector.broadcast %cst_274 : f32 to vector<1x128xf32>
    %664 = arith.mulf %662, %663 : vector<1x128xf32>
    %665 = vector.extract_strided_slice %661 {offsets = [1, 0], sizes = [1, 128], strides = [1, 1]} : vector<2x128xf32> to vector<1x128xf32>
    %cst_275 = arith.constant 0.001953125 : f32
    %666 = vector.broadcast %cst_275 : f32 to vector<1x128xf32>
    %667 = arith.mulf %665, %666 : vector<1x128xf32>
    %668 = arith.mulf %664, %664 : vector<1x128xf32>
    %669 = arith.subf %667, %668 : vector<1x128xf32>
    %cst_276 = arith.constant 0.000000e+00 : f32
    %670 = vector.broadcast %cst_276 : f32 to vector<1x128xf32>
    %671 = arith.maximumf %669, %670 : vector<1x128xf32>
    %cst_277 = arith.constant 9.99999974E-6 : f32
    %672 = vector.broadcast %cst_277 : f32 to vector<1x128xf32>
    %673 = arith.addf %671, %672 : vector<1x128xf32>
    %674 = math.rsqrt %673 : vector<1x128xf32>
    %c0_278 = arith.constant 0 : index
    %c0_279 = arith.constant 0 : index
    %675 = vector.load %arg2[%c0_278, %c0_279] : memref<1x128xf32, #tpu.memory_space<vmem>>, vector<1x128xf32>
    %676 = arith.mulf %675, %674 : vector<1x128xf32>
    %c0_280 = arith.constant 0 : index
    %c0_281 = arith.constant 0 : index
    %677 = vector.load %arg3[%c0_280, %c0_281] : memref<1x128xf32, #tpu.memory_space<vmem>>, vector<1x128xf32>
    %678 = arith.mulf %664, %676 : vector<1x128xf32>
    %679 = arith.subf %677, %678 : vector<1x128xf32>
    %680 = vector.broadcast %676 : vector<1x128xf32> to vector<16x128xf32>
    %681 = arith.mulf %607, %680 : vector<16x128xf32>
    %682 = vector.broadcast %679 : vector<1x128xf32> to vector<16x128xf32>
    %683 = arith.addf %681, %682 : vector<16x128xf32>
    %cst_282 = arith.constant 0.000000e+00 : f32
    %684 = vector.broadcast %cst_282 : f32 to vector<16x128xf32>
    %685 = arith.maximumf %683, %684 : vector<16x128xf32>
    %c0_283 = arith.constant 0 : index
    %c0_284 = arith.constant 0 : index
    %c0_285 = arith.constant 0 : index
    %686 = vector.load %arg4[%c0_283, %c0_284, %c0_285] : memref<2x16x128xf32, #tpu.memory_space<vmem>>, vector<1x16x128xf32>
    %687 = vector.shape_cast %686 : vector<1x16x128xf32> to vector<16x128xf32>
    %688 = vector.shape_cast %685 : vector<16x128xf32> to vector<1x16x128xf32>
    tpu.vector_store %arg4[%c0_283, %c0_284, %c0_285], %688 {strides = array<i32>} : memref<2x16x128xf32, #tpu.memory_space<vmem>>, vector<1x16x128xf32>,
    %689 = vector.broadcast %676 : vector<1x128xf32> to vector<16x128xf32>
    %690 = arith.mulf %615, %689 : vector<16x128xf32>
    %691 = vector.broadcast %679 : vector<1x128xf32> to vector<16x128xf32>
    %692 = arith.addf %690, %691 : vector<16x128xf32>
    %cst_286 = arith.constant 0.000000e+00 : f32
    %693 = vector.broadcast %cst_286 : f32 to vector<16x128xf32>
    %694 = arith.maximumf %692, %693 : vector<16x128xf32>
    %c1_287 = arith.constant 1 : index
    %c0_288 = arith.constant 0 : index
    %c0_289 = arith.constant 0 : index
    %695 = vector.load %arg4[%c1_287, %c0_288, %c0_289] : memref<2x16x128xf32, #tpu.memory_space<vmem>>, vector<1x16x128xf32>
    %696 = vector.shape_cast %695 : vector<1x16x128xf32> to vector<16x128xf32>
    %697 = vector.shape_cast %694 : vector<16x128xf32> to vector<1x16x128xf32>
    tpu.vector_store %arg4[%c1_287, %c0_288, %c0_289], %697 {strides = array<i32>} : memref<2x16x128xf32, #tpu.memory_space<vmem>>, vector<1x16x128xf32>,
    return
  }
}

</mosaic_0001>

<bundles_post_ra>
// kernel: conv_block_forward.1
= control target key start
LH: loop header
LB: loop body
LE: loop exit
PB: predicated region body
PF: predicated region fallthrough
CT: control target
= control target key end

     0   :  { %s1571_s19 = smov 16   ;;  %s1572_s24 = smov 32   ;;  %vm80_vm0 = vcmask 130048   ;;  %vm83_vm1 = vcmask 261120   ;;  %vm86_vm2 = vcmask 392192   ;;  %vm89_vm3 = vcmask 523264   ;;  %s3211_s0 = inlined_call_operand.vmem [shape: f32[2,4,16,16], index: 0, kind: input, shape index: {}]   ;;  %s3212_s1 = inlined_call_operand.vmem [shape: f32[36,128], index: 1, kind: input, shape index: {}]   ;;  %s3213_s2 = inlined_call_operand.vmem [shape: f32[1,128], index: 2, kind: input, shape index: {}]   ;;  %s3214_s3 = inlined_call_operand.vmem [shape: f32[1,128], index: 3, kind: input, shape index: {}]   ;;  %s3215_s4 = inlined_call_operand.vmem [shape: f32[2,16,128], index: 4, kind: output, shape index: {}]  }
   0x1   :  { %v1615_v0 = vld [vmem:[%s3211_s0 + $0x40] sm:$0xff]  ;;  %v1629_v2 = vld [vmem:[%s3211_s0 + $0x48] sm:$0xff]  ;;  %s1573_s25 = smov 48   ;;  %s1574_s26 = smov 64   ;;  %v1691_v4 = vld [vmem:[%s3211_s0 + $0x18] sm:$0xff]  ;;  %vm92_vm4 = vcmask 654336  }
   0x2   :  { %v1620_v1 = vld [vmem:[%s3211_s0] sm:$0xff]  ;;  %106 = vrot.lane.b32.xlu1 %v1615_v0, %s1571_s19  ;;  %v1634_v3 = vld [vmem:[%s3211_s0 + $0x8] sm:$0xff]  ;;  %s1575_s27 = smov 80   ;;  %s1576_s28 = smov 96   ;;  %v1696_v5 = vld [vmem:[%s3211_s0 + $0x10] sm:$0xff]  ;;  %vm95_vm5 = vcmask 785408  }
   0x3   :  { %38 = vrot.lane.b32.xlu0 %v1620_v1, %s1571_s19  ;;  %s1577_s29 = smov 112   ;;  %v1705_v6 = vld [vmem:[%s3211_s0 + $0x58] sm:$0xff]  ;;  %v1710_v7 = vld [vmem:[%s3211_s0 + $0x50] sm:$0xff]  ;;  %v1767_v8 = vld [vmem:[%s3211_s0 + $0x28] sm:$0xff]  ;;  %vm98_vm6 = vcmask 916480   ;;  %vm1409_vm12 = vcmask 1040384  }
   0x4   :  { %3243 = vst [vmem:[#allocation2_spill] sm:$0xff] %v1767_v8  ;;  %v1772_v9 = vld [vmem:[%s3211_s0 + $0x20] sm:$0xff]  ;;  %v1781_v10 = vld [vmem:[%s3211_s0 + $0x68] sm:$0xff]  ;;  %v1895_v38 = vld [vmem:[%s3211_s0 + $0x38] sm:$0xff]  ;;  %s1581_s6 = smov 4   ;;  %s1582_s7 = smov 8  }
   0x5   :  { %3244 = vst [vmem:[#allocation3_spill] sm:$0xff] %v1772_v9  ;;  %3245 = vst [vmem:[#allocation4_spill] sm:$0xff] %v1781_v10  ;;  %v1786_v11 = vld [vmem:[%s3211_s0 + $0x60] sm:$0xff]  ;;  %v1900_v39 = vld [vmem:[%s3211_s0 + $0x30] sm:$0xff]  ;;  %s1584_s8 = smov 124  }
   0x6   :  { %108 = vrot.lane.b32.xlu1 %v1629_v2, %s1571_s19  ;;  %3246 = vst [vmem:[#allocation5_spill] sm:$0xff] %v1786_v11  ;;  %3247 = vst [vmem:[#allocation6_spill] sm:$0xff] %v1895_v38  ;;  %v1913_v42 = vld [vmem:[%s3211_s0 + $0x78] sm:$0xff]  ;;  %v1918_v43 = vld [vmem:[%s3211_s0 + $0x70] sm:$0xff]  ;;  %s1578_s0 = smov 1  }
   0x7   :  { %40 = vrot.lane.b32.xlu0 %v1634_v3, %s1571_s19  ;;  %3248 = vst [vmem:[#allocation7_spill] sm:$0xff] %v1900_v39  ;;  %3249 = vst [vmem:[#allocation8_spill] sm:$0xff] %v1913_v42 }
   0x8   :  { %3250 = vst [vmem:[#allocation9_spill] sm:$0xff] %v1918_v43 }
   0xa   :  { %46 = vrot.lane.b32.xlu1 %v1634_v3, %s1572_s24 }
   0xb   :  { %44 = vrot.lane.b32.xlu0 %v1620_v1, %s1572_s24 }
   0xe   :  { %114 = vrot.lane.b32.xlu1 %v1629_v2, %s1572_s24 }
   0xf   :  { %112 = vrot.lane.b32.xlu0 %v1615_v0, %s1572_s24 }
  0x12   :  { %52 = vrot.lane.b32.xlu1 %v1634_v3, %s1573_s25 }
  0x13   :  { %50 = vrot.lane.b32.xlu0 %v1620_v1, %s1573_s25 }
  0x16   :  { %120 = vrot.lane.b32.xlu1 %v1629_v2, %s1573_s25 }
  0x17   :  { %118 = vrot.lane.b32.xlu0 %v1615_v0, %s1573_s25 }
  0x1a   :  { %58 = vrot.lane.b32.xlu1 %v1634_v3, %s1574_s26 }
  0x1b   :  { %56 = vrot.lane.b32.xlu0 %v1620_v1, %s1574_s26 }
  0x1e   :  { %126 = vrot.lane.b32.xlu1 %v1629_v2, %s1574_s26 }
  0x1f   :  { %124 = vrot.lane.b32.xlu0 %v1615_v0, %s1574_s26 }
  0x22   :  { %64 = vrot.lane.b32.xlu1 %v1634_v3, %s1575_s27 }
  0x23   :  { %62 = vrot.lane.b32.xlu0 %v1620_v1, %s1575_s27 }
  0x26   :  { %132 = vrot.lane.b32.xlu1 %v1629_v2, %s1575_s27 }
  0x27   :  { %130 = vrot.lane.b32.xlu0 %v1615_v0, %s1575_s27 }
  0x2a   :  { %70 = vrot.lane.b32.xlu1 %v1634_v3, %s1576_s28 }
  0x2b   :  { %68 = vrot.lane.b32.xlu0 %v1620_v1, %s1576_s28 }
  0x2e   :  { %138 = vrot.lane.b32.xlu1 %v1629_v2, %s1576_s28 }
  0x2f   :  { %136 = vrot.lane.b32.xlu0 %v1615_v0, %s1576_s28 }
  0x32   :  { %76 = vrot.lane.b32.xlu1 %v1634_v3, %s1577_s29 }
  0x33   :  { %74 = vrot.lane.b32.xlu0 %v1620_v1, %s1577_s29 }
  0x36   :  { %144 = vrot.lane.b32.xlu1 %v1629_v2, %s1577_s29 }
  0x37   :  { %142 = vrot.lane.b32.xlu0 %v1615_v0, %s1577_s29 }
  0x3a   :  { %389 = vrot.lane.b32.xlu1 %v1691_v4, %s1571_s19 }
  0x3b   :  { %387 = vrot.lane.b32.xlu0 %v1696_v5, %s1571_s19 }
  0x3e   :  { %450 = vrot.lane.b32.xlu1 %v1705_v6, %s1571_s19 }
  0x3f   :  { %448 = vrot.lane.b32.xlu0 %v1710_v7, %s1571_s19 }
  0x42   :  { %395 = vrot.lane.b32.xlu1 %v1691_v4, %s1572_s24 }
  0x43   :  { %393 = vrot.lane.b32.xlu0 %v1696_v5, %s1572_s24 }
  0x46   :  { %456 = vrot.lane.b32.xlu1 %v1705_v6, %s1572_s24 }
  0x47   :  { %454 = vrot.lane.b32.xlu0 %v1710_v7, %s1572_s24 }
  0x4a   :  { %401 = vrot.lane.b32.xlu1 %v1691_v4, %s1573_s25 }
  0x4b   :  { %399 = vrot.lane.b32.xlu0 %v1696_v5, %s1573_s25 }
  0x4e   :  { %462 = vrot.lane.b32.xlu1 %v1705_v6, %s1573_s25 }
  0x4f   :  { %460 = vrot.lane.b32.xlu0 %v1710_v7, %s1573_s25 }
  0x52   :  { %407 = vrot.lane.b32.xlu1 %v1691_v4, %s1574_s26 }
  0x53   :  { %405 = vrot.lane.b32.xlu0 %v1696_v5, %s1574_s26 }
  0x56   :  { %468 = vrot.lane.b32.xlu1 %v1705_v6, %s1574_s26 }
  0x57   :  { %466 = vrot.lane.b32.xlu0 %v1710_v7, %s1574_s26 }
  0x5a   :  { %413 = vrot.lane.b32.xlu1 %v1691_v4, %s1575_s27 }
  0x5b   :  { %411 = vrot.lane.b32.xlu0 %v1696_v5, %s1575_s27 }
  0x5e   :  { %474 = vrot.lane.b32.xlu1 %v1705_v6, %s1575_s27 }
  0x5f   :  { %472 = vrot.lane.b32.xlu0 %v1710_v7, %s1575_s27 }
  0x62   :  { %419 = vrot.lane.b32.xlu1 %v1691_v4, %s1576_s28 }
  0x63   :  { %417 = vrot.lane.b32.xlu0 %v1696_v5, %s1576_s28 }
  0x66   :  { %480 = vrot.lane.b32.xlu1 %v1705_v6, %s1576_s28 }
  0x67   :  { %478 = vrot.lane.b32.xlu0 %v1710_v7, %s1576_s28 }
  0x6a   :  { %425 = vrot.lane.b32.xlu1 %v1691_v4, %s1577_s29 }
  0x6b   :  { %423 = vrot.lane.b32.xlu0 %v1696_v5, %s1577_s29 }
  0x6e   :  { %486 = vrot.lane.b32.xlu1 %v1705_v6, %s1577_s29 }
  0x6f   :  { %484 = vrot.lane.b32.xlu0 %v1710_v7, %s1577_s29 }
  0x72   :  { %724 = vrot.lane.b32.xlu1 %v1767_v8, %s1571_s19 }
  0x73   :  { %722 = vrot.lane.b32.xlu0 %v1772_v9, %s1571_s19 }
  0x74   :  { %v1788_v12 = vpop.permute.xlu1 %106 }
  0x75   :  { %v1790_v13 = vpop.permute.xlu0 %38 }
  0x76   :  { %785 = vrot.lane.b32.xlu1 %v1781_v10, %s1571_s19 }
  0x77   :  { %783 = vrot.lane.b32.xlu0 %v1786_v11, %s1571_s19 }
  0x78   :  { %v1796_v14 = vpop.permute.xlu1 %108 }
  0x79   :  { %v1798_v15 = vpop.permute.xlu0 %40 }
  0x7a   :  { %730 = vrot.lane.b32.xlu1 %v1767_v8, %s1572_s24 }
  0x7b   :  { %728 = vrot.lane.b32.xlu0 %v1772_v9, %s1572_s24 }
  0x7c   :  { %v1804_v16 = vpop.permute.xlu1 %46 }
  0x7d   :  { %v1806_v17 = vpop.permute.xlu0 %44 }
  0x7e   :  { %791 = vrot.lane.b32.xlu1 %v1781_v10, %s1572_s24 }
  0x7f   :  { %789 = vrot.lane.b32.xlu0 %v1786_v11, %s1572_s24 }
  0x80   :  { %v1812_v18 = vpop.permute.xlu1 %114 }
  0x81   :  { %v1814_v19 = vpop.permute.xlu0 %112 }
  0x82   :  { %736 = vrot.lane.b32.xlu1 %v1767_v8, %s1573_s25 }
  0x83   :  { %734 = vrot.lane.b32.xlu0 %v1772_v9, %s1573_s25 }
  0x84   :  { %v1820_v20 = vpop.permute.xlu1 %52 }
  0x85   :  { %v1822_v21 = vpop.permute.xlu0 %50 }
  0x86   :  { %797 = vrot.lane.b32.xlu1 %v1781_v10, %s1573_s25 }
  0x87   :  { %795 = vrot.lane.b32.xlu0 %v1786_v11, %s1573_s25 }
  0x88   :  { %v1828_v22 = vpop.permute.xlu1 %120 }
  0x89   :  { %v1830_v23 = vpop.permute.xlu0 %118 }
  0x8a   :  { %742 = vrot.lane.b32.xlu1 %v1767_v8, %s1574_s26 }
  0x8b   :  { %740 = vrot.lane.b32.xlu0 %v1772_v9, %s1574_s26 }
  0x8c   :  { %v1836_v24 = vpop.permute.xlu1 %58 }
  0x8d   :  { %v1838_v25 = vpop.permute.xlu0 %56 }
  0x8e   :  { %803 = vrot.lane.b32.xlu1 %v1781_v10, %s1574_s26 }
  0x8f   :  { %801 = vrot.lane.b32.xlu0 %v1786_v11, %s1574_s26 }
  0x90   :  { %v1844_v26 = vpop.permute.xlu1 %126 }
  0x91   :  { %v1846_v27 = vpop.permute.xlu0 %124 }
  0x92   :  { %748 = vrot.lane.b32.xlu1 %v1767_v8, %s1575_s27 }
  0x93   :  { %746 = vrot.lane.b32.xlu0 %v1772_v9, %s1575_s27 }
  0x94   :  { %v1852_v28 = vpop.permute.xlu1 %64 }
  0x95   :  { %v1854_v29 = vpop.permute.xlu0 %62 }
  0x96   :  { %809 = vrot.lane.b32.xlu1 %v1781_v10, %s1575_s27 }
  0x97   :  { %807 = vrot.lane.b32.xlu0 %v1786_v11, %s1575_s27 }
  0x98   :  { %v1860_v30 = vpop.permute.xlu1 %132 }
  0x99   :  { %v1862_v31 = vpop.permute.xlu0 %130 }
  0x9a   :  { %754 = vrot.lane.b32.xlu1 %v1767_v8, %s1576_s28 }
  0x9b   :  { %752 = vrot.lane.b32.xlu0 %v1772_v9, %s1576_s28 }
  0x9c   :  { %v1868_v32 = vpop.permute.xlu1 %70 }
  0x9d   :  { %v1870_v33 = vpop.permute.xlu0 %68 }
  0x9e   :  { %815 = vrot.lane.b32.xlu1 %v1781_v10, %s1576_s28 }
  0x9f   :  { %813 = vrot.lane.b32.xlu0 %v1786_v11, %s1576_s28 }
  0xa0   :  { %v1876_v34 = vpop.permute.xlu1 %138 }
  0xa1   :  { %v1878_v35 = vpop.permute.xlu0 %136 }
  0xa2   :  { %760 = vrot.lane.b32.xlu1 %v1767_v8, %s1577_s29 }
  0xa3   :  { %758 = vrot.lane.b32.xlu0 %v1772_v9, %s1577_s29 }
  0xa4   :  { %v1884_v36 = vpop.permute.xlu1 %76 }
  0xa5   :  { %v1886_v37 = vpop.permute.xlu0 %74 }
  0xa6   :  { %821 = vrot.lane.b32.xlu1 %v1781_v10, %s1577_s29  ;;  %v82_v10 = vsel %vm80_vm0, %v1634_v3, %v1798_v15 }
  0xa7   :  { %819 = vrot.lane.b32.xlu0 %v1786_v11, %s1577_s29  ;;  %v81_v11 = vsel %vm80_vm0, %v1620_v1, %v1790_v13  ;;  %v85_v9 = vsel %vm83_vm1, %v82_v10, %v1804_v16  ;;  %v149_v10 = vsel %vm80_vm0, %v1629_v2, %v1796_v14 }
  0xa8   :  { %v1902_v40 = vpop.permute.xlu1 %144  ;;  %v84_v8 = vsel %vm83_vm1, %v81_v11, %v1806_v17  ;;  %v88_v1 = vsel %vm86_vm2, %v85_v9, %v1820_v20  ;;  %v151_v9 = vsel %vm83_vm1, %v149_v10, %v1812_v18 }
  0xa9   :  { %v1904_v41 = vpop.permute.xlu0 %142  ;;  %v87_v3 = vsel %vm86_vm2, %v84_v8, %v1822_v21  ;;  %v91_v11 = vsel %vm89_vm3, %v88_v1, %v1836_v24  ;;  %v148_v8 = vsel %vm80_vm0, %v1615_v0, %v1788_v12  ;;  %v153_v12 = vsel %vm86_vm2, %v151_v9, %v1828_v22 }
  0xaa   :  { %1059 = vrot.lane.b32.xlu1 %v1895_v38, %s1571_s19  ;;  %v90_v13 = vsel %vm89_vm3, %v87_v3, %v1838_v25  ;;  %v94_v2 = vsel %vm92_vm4, %v91_v11, %v1852_v28  ;;  %v150_v17 = vsel %vm83_vm1, %v148_v8, %v1814_v19  ;;  %v155_v25 = vsel %vm89_vm3, %v153_v12, %v1844_v26 }
  0xab   :  { %1057 = vrot.lane.b32.xlu0 %v1900_v39, %s1571_s19  ;;  %v93_v14 = vsel %vm92_vm4, %v90_v13, %v1854_v29  ;;  %v97_v20 = vsel %vm95_vm5, %v94_v2, %v1868_v32  ;;  %v152_v18 = vsel %vm86_vm2, %v150_v17, %v1830_v23  ;;  %v157_v23 = vsel %vm92_vm4, %v155_v25, %v1860_v30 }
  0xac   :  { %v1920_v44 = vpop.permute.xlu1 %389  ;;  %v96_v21 = vsel %vm95_vm5, %v93_v14, %v1870_v33  ;;  %v2053_v19 = vsel %vm98_vm6, %v97_v20, %v1884_v36  ;;  %v154_v28 = vsel %vm89_vm3, %v152_v18, %v1846_v27  ;;  %v159_v33 = vsel %vm95_vm5, %v157_v23, %v1876_v34 }
  0xad   :  { %v1922_v45 = vpop.permute.xlu0 %387  ;;  %3252 = vst [vmem:[#allocation11_spill] sm:$0xff] %v2053_v19  ;;  %v2057_v24 = vsel %vm98_vm6, %v96_v21, %v1886_v37  ;;  %v156_v32 = vsel %vm92_vm4, %v154_v28, %v1862_v31  ;;  %v163_v26 = vrot.slane %v2053_v19, 7  ;;  %v2083_v30 = vsel %vm98_vm6, %v159_v33, %v1902_v40 }
  0xae   :  { %1120 = vrot.lane.b32.xlu1 %v1913_v42, %s1571_s19  ;;  %3253 = vst [vmem:[#allocation12_spill] sm:$0xff] %v2057_v24  ;;  %v158_v36 = vsel %vm95_vm5, %v156_v32, %v1878_v35  ;;  %v162_v27 = vrot.slane %v2057_v24, 7  ;;  %3254 = vst [vmem:[#allocation13_spill] sm:$0xff] %v2083_v30  ;;  %v171_v37 = vrot.slane %v2083_v30, 7 }
  0xaf   :  { %1118 = vrot.lane.b32.xlu0 %v1918_v43, %s1571_s19  ;;  %v2087_v31 = vsel %vm98_vm6, %v158_v36, %v1904_v41  ;;  %s1579_s19 = smov 127   ;;  %v305_v36 = vrot.slane %v2053_v19, 1 }
  0xb0   :  { %v1928_v46 = vpop.permute.xlu1 %450  ;;  %3255 = vst [vmem:[#allocation14_spill] sm:$0xff] %v2087_v31  ;;  %v170_v1 = vrot.slane %v2087_v31, 7 }
  0xb1   :  { %v1930_v47 = vpop.permute.xlu0 %448 }
  0xb2   :  { %1065 = vrot.lane.b32.xlu1 %v1895_v38, %s1572_s24 }
  0xb3   :  { %1063 = vrot.lane.b32.xlu0 %v1900_v39, %s1572_s24 }
  0xb4   :  { %v1936_v48 = vpop.permute.xlu1 %395 }
  0xb5   :  { %v1938_v49 = vpop.permute.xlu0 %393 }
  0xb6   :  { %1126 = vrot.lane.b32.xlu1 %v1913_v42, %s1572_s24 }
  0xb7   :  { %1124 = vrot.lane.b32.xlu0 %v1918_v43, %s1572_s24  ;;  %s1585_s24 = smov 120  }
  0xb8   :  { %v1944_v50 = vpop.permute.xlu1 %456 }
  0xb9   :  { %v1946_v51 = vpop.permute.xlu0 %454 }
  0xba   :  { %1071 = vrot.lane.b32.xlu1 %v1895_v38, %s1573_s25 }
  0xbb   :  { %1069 = vrot.lane.b32.xlu0 %v1900_v39, %s1573_s25 }
  0xbc   :  { %v1952_v52 = vpop.permute.xlu1 %401 }
  0xbd   :  { %v1954_v53 = vpop.permute.xlu0 %399 }
  0xbe   :  { %1132 = vrot.lane.b32.xlu1 %v1913_v42, %s1573_s25 }
  0xbf   :  { %1130 = vrot.lane.b32.xlu0 %v1918_v43, %s1573_s25 }
  0xc0   :  { %v1960_v54 = vpop.permute.xlu1 %462 }
  0xc1   :  { %v1962_v55 = vpop.permute.xlu0 %460 }
  0xc2   :  { %1077 = vrot.lane.b32.xlu1 %v1895_v38, %s1574_s26 }
  0xc3   :  { %1075 = vrot.lane.b32.xlu0 %v1900_v39, %s1574_s26 }
  0xc4   :  { %v1968_v56 = vpop.permute.xlu1 %407 }
  0xc5   :  { %v1970_v57 = vpop.permute.xlu0 %405 }
  0xc6   :  { %1138 = vrot.lane.b32.xlu1 %v1913_v42, %s1574_s26 }
  0xc7   :  { %1136 = vrot.lane.b32.xlu0 %v1918_v43, %s1574_s26 }
  0xc8   :  { %v1976_v58 = vpop.permute.xlu1 %468 }
  0xc9   :  { %v1978_v59 = vpop.permute.xlu0 %466 }
  0xca   :  { %1083 = vrot.lane.b32.xlu1 %v1895_v38, %s1575_s27 }
  0xcb   :  { %1081 = vrot.lane.b32.xlu0 %v1900_v39, %s1575_s27 }
  0xcc   :  { %v1984_v60 = vpop.permute.xlu1 %413 }
  0xcd   :  { %v1986_v61 = vpop.permute.xlu0 %411 }
  0xce   :  { %1144 = vrot.lane.b32.xlu1 %v1913_v42, %s1575_s27 }
  0xcf   :  { %1142 = vrot.lane.b32.xlu0 %v1918_v43, %s1575_s27 }
  0xd0   :  { %v1992_v62 = vpop.permute.xlu1 %474 }
  0xd1   :  { %v1994_v63 = vpop.permute.xlu0 %472 }
  0xd2   :  { %3251 = vst [vmem:[#allocation10_spill] sm:$0xff] %v1994_v63  ;;  %1089 = vrot.lane.b32.xlu1 %v1895_v38, %s1576_s28  ;;  %v3220_v63 = vlaneseq }
  0xd3   :  { %1087 = vrot.lane.b32.xlu0 %v1900_v39, %s1576_s28 }
  0xd4   :  { %v2021_v15 = vpop.permute.xlu1 %419  ;;  %v2045_v0 = vshrl.u32 %v3220_v63, 7 }
  0xd5   :  { %v2023_v16 = vpop.permute.xlu0 %417 }
  0xd6   :  { %1150 = vrot.lane.b32.xlu1 %v1913_v42, %s1576_s28  ;;  %vm164_vm7 = vcmp.lt.s32.totalorder %v2045_v0, 1  ;;  %vm306_vm8 = vcmp.lt.s32.totalorder %v2045_v0, 7 }
  0xd7   :  { %1148 = vrot.lane.b32.xlu0 %v1918_v43, %s1576_s28  ;;  %v166_v40 = vsel %vm164_vm7, %v163_v26, %v162_v27  ;;  %v2112_v11 = vsel %vm164_vm7, %v162_v27, %v163_v26  ;;  %v173_v13 = vsel %vm164_vm7, %v171_v37, %v170_v1  ;;  %v2130_v14 = vsel %vm164_vm7, %v170_v1, %v171_v37 }
  0xd8   :  { %v2063_v29 = vpop.permute.xlu1 %480  ;;  %v2108_v10 = vsel %vm164_vm7, 0.0, %v166_v40  ;;  %v2126_v2 = vsel %vm164_vm7, 0.0, %v173_v13  ;;  %v304_v26 = vrot.slane %v2057_v24, 1  ;;  %v2179_v27 = vadd.s32 8, %v2045_v0 }
  0xd9   :  { %v2065_v22 = vpop.permute.xlu0 %478  ;;  %3256 = vst [vmem:[#allocation15_spill] sm:$0xff] %v2126_v2  ;;  %v314_v37 = vrot.slane %v2083_v30, 1  ;;  %v313_v1 = vrot.slane %v2087_v31, 1 }
  0xda   :  { %1095 = vrot.lane.b32.xlu1 %v1895_v38, %s1577_s29  ;;  %v308_v63 = vsel %vm306_vm8, %v305_v36, %v304_v26  ;;  %vm310_vm9 = vcmp.ge.s32.totalorder %v2179_v27, 15 }
  0xdb   :  { %1093 = vrot.lane.b32.xlu0 %v1900_v39, %s1577_s29  ;;  %v2213_v39 = vsel %vm306_vm8, %v304_v26, %v305_v36 }
  0xdc   :  { %v2090_v34 = vpop.permute.xlu1 %425 }
  0xdd   :  { %v2092_v35 = vpop.permute.xlu0 %423 }
  0xde   :  { %1156 = vrot.lane.b32.xlu1 %v1913_v42, %s1577_s29  ;;  %v430_v42 = vsel %vm80_vm0, %v1691_v4, %v1920_v44 }
  0xdf   :  { %1154 = vrot.lane.b32.xlu0 %v1918_v43, %s1577_s29  ;;  %v316_v43 = vsel %vm306_vm8, %v314_v37, %v313_v1  ;;  %v432_v38 = vsel %vm83_vm1, %v430_v42, %v1936_v48  ;;  %v491_v42 = vsel %vm80_vm0, %v1705_v6, %v1928_v46 }
  0xe0   :  { %v2102_v41 = vpop.permute.xlu1 %486  ;;  %v434_v4 = vsel %vm86_vm2, %v432_v38, %v1952_v52  ;;  %v2229_v44 = vsel %vm310_vm9, 0.0, %v316_v43  ;;  %v2244_v52 = vsel %vm306_vm8, %v313_v1, %v314_v37  ;;  %v490_v43 = vsel %vm80_vm0, %v1710_v7, %v1930_v47 }
  0xe1   :  { %v2104_v3 = vpop.permute.xlu0 %484  ;;  %v493_v6 = vsel %vm83_vm1, %v491_v42, %v1944_v50 }
  0xe2   :  { %179 = vrot.lane.b32.xlu1 %v2112_v11, %s1578_s0  ;;  %v495_v7 = vsel %vm86_vm2, %v493_v6, %v1960_v54 }
  0xe3   :  { %177 = vrot.lane.b32.xlu0 %v2108_v10, %s1578_s0 }
  0xe4   :  { %v2120_v8 = vpop.permute.xlu1 %724 }
  0xe5   :  { %v2122_v9 = vpop.permute.xlu0 %722 }
  0xe6   :  { %194 = vrot.lane.b32.xlu1 %v2130_v14, %s1578_s0 }
  0xe7   :  { %192 = vrot.lane.b32.xlu0 %v2126_v2, %s1578_s0 }
  0xe8   :  { %v2136_v17 = vpop.permute.xlu1 %785 }
  0xe9   :  { %v2138_v20 = vpop.permute.xlu0 %783 }
  0xea   :  { %218 = vrot.lane.b32.xlu1 %v2112_v11, %s1579_s19 }
  0xeb   :  { %216 = vrot.lane.b32.xlu0 %v2108_v10, %s1579_s19 }
  0xec   :  { %v2144_v21 = vpop.permute.xlu1 %730 }
  0xed   :  { %v2146_v12 = vpop.permute.xlu0 %728 }
  0xee   :  { %233 = vrot.lane.b32.xlu1 %v2130_v14, %s1579_s19 }
  0xef   :  { %231 = vrot.lane.b32.xlu0 %v2126_v2, %s1579_s19 }
  0xf0   :  { %v2152_v18 = vpop.permute.xlu1 %791 }
  0xf1   :  { %v2154_v25 = vpop.permute.xlu0 %789 }
  0xf2   :  { %244 = vrot.lane.b32.xlu1 %v2053_v19, %s1578_s0 }
  0xf3   :  { %242 = vrot.lane.b32.xlu0 %v2057_v24, %s1578_s0 }
  0xf4   :  { %v2160_v28 = vpop.permute.xlu1 %736 }
  0xf5   :  { %v2162_v23 = vpop.permute.xlu0 %734 }
  0xf6   :  { %258 = vrot.lane.b32.xlu1 %v2083_v30, %s1578_s0 }
  0xf7   :  { %256 = vrot.lane.b32.xlu0 %v2087_v31, %s1578_s0 }
  0xf8   :  { %v2168_v32 = vpop.permute.xlu1 %797 }
  0xf9   :  { %v2170_v33 = vpop.permute.xlu0 %795 }
  0xfa   :  { %282 = vrot.lane.b32.xlu1 %v2053_v19, %s1579_s19 }
  0xfb   :  { %280 = vrot.lane.b32.xlu0 %v2057_v24, %s1579_s19 }
  0xfc   :  { %v2184_v40 = vpop.permute.xlu1 %742 }
  0xfd   :  { %v2186_v13 = vpop.permute.xlu0 %740 }
  0xfe   :  { %296 = vrot.lane.b32.xlu1 %v2083_v30, %s1579_s19  ;;  %v2209_v30 = vsel %vm310_vm9, 0.0, %v308_v63 }
  0xff   :  { %294 = vrot.lane.b32.xlu0 %v2087_v31, %s1579_s19  ;;  %v429_v31 = vsel %vm80_vm0, %v1696_v5, %v1922_v45  ;;  %v436_v45 = vsel %vm89_vm3, %v434_v4, %v1968_v56  ;;  %v492_v56 = vsel %vm83_vm1, %v490_v43, %v1946_v51 }
 0x100   :  { %v2195_v24 = vpop.permute.xlu1 %803  ;;  %v431_v2 = vsel %vm83_vm1, %v429_v31, %v1938_v49  ;;  %v438_v46 = vsel %vm92_vm4, %v436_v45, %v1984_v60  ;;  %v494_v47 = vsel %vm86_vm2, %v492_v56, %v1962_v55  ;;  %v497_v60 = vsel %vm89_vm3, %v495_v7, %v1976_v58 }
 0x101   :  { %v2197_v19 = vpop.permute.xlu0 %801  ;;  %v433_v5 = vsel %vm86_vm2, %v431_v2, %v1954_v53  ;;  %v499_v55 = vsel %vm92_vm4, %v497_v60, %v1992_v62 }
 0x102   :  { %322 = vrot.lane.b32.xlu1 %v2209_v30, %s1578_s0  ;;  %v435_v48 = vsel %vm89_vm3, %v433_v5, %v1970_v57  ;;  %v440_v57 = vsel %vm95_vm5, %v438_v46, %v2021_v15 }
 0x103   :  { %320 = vrot.lane.b32.xlu0 %v2213_v39, %s1578_s0  ;;  %v437_v53 = vsel %vm92_vm4, %v435_v48, %v1986_v61  ;;  %v2271_v50 = vsel %vm98_vm6, %v440_v57, %v2090_v34  ;;  %v496_v61 = vsel %vm89_vm3, %v494_v47, %v1978_v59  ;;  %v501_v34 = vsel %vm95_vm5, %v499_v55, %v2063_v29 }
 0x104   :  { %v2238_v49 = vpop.permute.xlu1 %748  ;;  %v439_v63 = vsel %vm95_vm5, %v437_v53, %v2023_v16  ;;  %3257 = vst [vmem:[#allocation16_spill] sm:$0xff] %v2271_v50  ;;  %v3259_v16 = vld [vmem:[#allocation10_spill] sm:$0xff]  ;;  %v505_v58 = vrot.slane %v2271_v50, 7  ;;  %v2301_v62 = vsel %vm98_vm6, %v501_v34, %v2102_v41 }
 0x105   :  { %v2240_v38 = vpop.permute.xlu0 %746  ;;  %v2275_v51 = vsel %vm98_vm6, %v439_v63, %v2092_v35  ;;  %v498_v31 = vsel %vm92_vm4, %v496_v61, %v3259_v16  ;;  %3260 = vst [vmem:[#allocation10_spill] sm:$0xff] %v2301_v62  ;;  %v511_v36 = vrot.slane %v2301_v62, 7  ;;  %v643_v16 = vrot.slane %v2271_v50, 1 }
 0x106   :  { %336 = vrot.lane.b32.xlu1 %v2229_v44, %s1578_s0  ;;  %3258 = vst [vmem:[#allocation17_spill] sm:$0xff] %v2275_v51  ;;  %v500_v35 = vsel %vm95_vm5, %v498_v31, %v2065_v22  ;;  %v504_v59 = vrot.slane %v2275_v51, 7  ;;  %v642_v55 = vrot.slane %v2275_v51, 1  ;;  %v649_v31 = vrot.slane %v2301_v62, 1 }
 0x107   :  { %334 = vrot.lane.b32.xlu0 %v2244_v52, %s1578_s0  ;;  %v2305_v29 = vsel %vm98_vm6, %v500_v35, %v2104_v3 }
 0x108   :  { %v2281_v15 = vpop.permute.xlu1 %809  ;;  %3261 = vst [vmem:[#allocation18_spill] sm:$0xff] %v2305_v29  ;;  %v510_v26 = vrot.slane %v2305_v29, 7  ;;  %v507_v41 = vsel %vm164_vm7, %v505_v58, %v504_v59  ;;  %v2329_v4 = vsel %vm164_vm7, %v504_v59, %v505_v58  ;;  %v648_v34 = vrot.slane %v2305_v29, 1 }
 0x109   :  { %v2283_v54 = vpop.permute.xlu0 %807  ;;  %v2325_v1 = vsel %vm164_vm7, 0.0, %v507_v41  ;;  %3262 = vst [vmem:[#allocation19_spill] sm:$0xff] %v2329_v4  ;;  %v645_v59 = vsel %vm306_vm8, %v643_v16, %v642_v55 }
 0x10a   :  { %360 = vrot.lane.b32.xlu1 %v2209_v30, %s1579_s19  ;;  %v513_v5 = vsel %vm164_vm7, %v511_v36, %v510_v26  ;;  %v2347_v43 = vsel %vm164_vm7, %v510_v26, %v511_v36  ;;  %v651_v41 = vsel %vm306_vm8, %v649_v31, %v648_v34 }
 0x10b   :  { %358 = vrot.lane.b32.xlu0 %v2213_v39, %s1579_s19  ;;  %v2343_v48 = vsel %vm164_vm7, 0.0, %v513_v5  ;;  %3264 = vst [vmem:[#allocation21_spill] sm:$0xff] %v2347_v43  ;;  %v3265_v5 = vld [vmem:[#allocation2_spill] sm:$0xff] }
 0x10c   :  { %v2307_v2 = vpop.permute.xlu1 %754  ;;  %3263 = vst [vmem:[#allocation20_spill] sm:$0xff] %v2343_v48 }
 0x10d   :  { %v2309_v22 = vpop.permute.xlu0 %752 }
 0x10e   :  { %374 = vrot.lane.b32.xlu1 %v2229_v44, %s1579_s19 }
 0x10f   :  { %372 = vrot.lane.b32.xlu0 %v2244_v52, %s1579_s19 }
 0x110   :  { %v2319_v37 = vpop.permute.xlu1 %815 }
 0x111   :  { %v2321_v3 = vpop.permute.xlu0 %813 }
 0x112   :  { %519 = vrot.lane.b32.xlu1 %v2329_v4, %s1578_s0 }
 0x113   :  { %517 = vrot.lane.b32.xlu0 %v2325_v1, %s1578_s0 }
 0x114   :  { %v2337_v42 = vpop.permute.xlu1 %760 }
 0x115   :  { %v2339_v45 = vpop.permute.xlu0 %758 }
 0x116   :  { %533 = vrot.lane.b32.xlu1 %v2347_v43, %s1578_s0 }
 0x117   :  { %531 = vrot.lane.b32.xlu0 %v2343_v48, %s1578_s0 }
 0x118   :  { %v2353_v6 = vpop.permute.xlu1 %821 }
 0x119   :  { %v2355_v46 = vpop.permute.xlu0 %819 }
 0x11a   :  { %557 = vrot.lane.b32.xlu1 %v2329_v4, %s1579_s19 }
 0x11b   :  { %555 = vrot.lane.b32.xlu0 %v2325_v1, %s1579_s19 }
 0x11c   :  { %v2361_v53 = vpop.permute.xlu1 %1059 }
 0x11d   :  { %v2363_v56 = vpop.permute.xlu0 %1057 }
 0x11e   :  { %571 = vrot.lane.b32.xlu1 %v2347_v43, %s1579_s19  ;;  %v2425_v43 = vsel %vm310_vm9, 0.0, %v645_v59 }
 0x11f   :  { %569 = vrot.lane.b32.xlu0 %v2343_v48, %s1579_s19 }
 0x120   :  { %v2369_v57 = vpop.permute.xlu1 %1120 }
 0x121   :  { %v2371_v63 = vpop.permute.xlu0 %1118 }
 0x122   :  { %582 = vrot.lane.b32.xlu1 %v2271_v50, %s1578_s0 }
 0x123   :  { %580 = vrot.lane.b32.xlu0 %v2275_v51, %s1578_s0 }
 0x124   :  { %v2377_v7 = vpop.permute.xlu1 %1065 }
 0x125   :  { %v2379_v47 = vpop.permute.xlu0 %1063 }
 0x126   :  { %596 = vrot.lane.b32.xlu1 %v2301_v62, %s1578_s0 }
 0x127   :  { %594 = vrot.lane.b32.xlu0 %v2305_v29, %s1578_s0 }
 0x128   :  { %v2385_v60 = vpop.permute.xlu1 %1126 }
 0x129   :  { %v2387_v61 = vpop.permute.xlu0 %1124 }
 0x12a   :  { %620 = vrot.lane.b32.xlu1 %v2271_v50, %s1579_s19  ;;  %v3266_v50 = vld [vmem:[#allocation3_spill] sm:$0xff] }
 0x12b   :  { %618 = vrot.lane.b32.xlu0 %v2275_v51, %s1579_s19  ;;  %v765_v51 = vsel %vm80_vm0, %v3265_v5, %v2120_v8 }
 0x12c   :  { %v2397_v35 = vpop.permute.xlu1 %1071  ;;  %v767_v48 = vsel %vm83_vm1, %v765_v51, %v2144_v21  ;;  %v3268_v21 = vld [vmem:[#allocation4_spill] sm:$0xff] }
 0x12d   :  { %v2399_v58 = vpop.permute.xlu0 %1069  ;;  %v769_v8 = vsel %vm86_vm2, %v767_v48, %v2160_v28 }
 0x12e   :  { %634 = vrot.lane.b32.xlu1 %v2301_v62, %s1579_s19  ;;  %v2421_v62 = vsel %vm306_vm8, %v642_v55, %v643_v16  ;;  %v771_v51 = vsel %vm89_vm3, %v769_v8, %v2184_v40 }
 0x12f   :  { %632 = vrot.lane.b32.xlu0 %v2305_v29, %s1579_s19  ;;  %v764_v29 = vsel %vm80_vm0, %v3266_v50, %v2122_v9  ;;  %v2441_v50 = vsel %vm310_vm9, 0.0, %v651_v41  ;;  %v773_v40 = vsel %vm92_vm4, %v771_v51, %v2238_v49 }
 0x130   :  { %v2407_v36 = vpop.permute.xlu1 %1132  ;;  %v766_v4 = vsel %vm83_vm1, %v764_v29, %v2146_v12  ;;  %3267 = vst [vmem:[#allocation2_spill] sm:$0xff] %v2441_v50  ;;  %v826_v12 = vsel %vm80_vm0, %v3268_v21, %v2136_v17 }
 0x131   :  { %v2409_v26 = vpop.permute.xlu0 %1130  ;;  %v768_v9 = vsel %vm86_vm2, %v766_v4, %v2162_v23  ;;  %v2456_v23 = vsel %vm306_vm8, %v648_v34, %v649_v31  ;;  %v3270_v4 = vld [vmem:[#allocation5_spill] sm:$0xff]  ;;  %v828_v17 = vsel %vm83_vm1, %v826_v12, %v2152_v18  ;;  %v775_v31 = vsel %vm95_vm5, %v773_v40, %v2307_v2 }
 0x132   :  { %657 = vrot.lane.b32.xlu1 %v2425_v43, %s1578_s0  ;;  %v770_v29 = vsel %vm89_vm3, %v768_v9, %v2186_v13  ;;  %3269 = vst [vmem:[#allocation3_spill] sm:$0xff] %v2456_v23  ;;  %v825_v48 = vsel %vm80_vm0, %v3270_v4, %v2138_v20  ;;  %v830_v20 = vsel %vm86_vm2, %v828_v17, %v2168_v32 }
 0x133   :  { %655 = vrot.lane.b32.xlu0 %v2421_v62, %s1578_s0  ;;  %v772_v13 = vsel %vm92_vm4, %v770_v29, %v2240_v38  ;;  %v827_v16 = vsel %vm83_vm1, %v825_v48, %v2154_v25  ;;  %v2483_v25 = vsel %vm98_vm6, %v775_v31, %v2337_v42  ;;  %v832_v38 = vsel %vm89_vm3, %v830_v20, %v2195_v24 }
 0x134   :  { %v2450_v55 = vpop.permute.xlu1 %1077  ;;  %v774_v34 = vsel %vm95_vm5, %v772_v13, %v2309_v22  ;;  %v829_v18 = vsel %vm86_vm2, %v827_v16, %v2170_v33  ;;  %v834_v33 = vsel %vm92_vm4, %v832_v38, %v2281_v15  ;;  %v840_v24 = vrot.slane %v2483_v25, 7 }
 0x135   :  { %v2452_v28 = vpop.permute.xlu0 %1075  ;;  %v2487_v49 = vsel %vm98_vm6, %v774_v34, %v2339_v45  ;;  %v831_v2 = vsel %vm89_vm3, %v829_v18, %v2197_v19  ;;  %v836_v45 = vsel %vm95_vm5, %v834_v33, %v2319_v37  ;;  %v3275_v31 = vlaneseq }
 0x136   :  { %671 = vrot.lane.b32.xlu1 %v2441_v50, %s1578_s0  ;;  %v833_v42 = vsel %vm92_vm4, %v831_v2, %v2283_v54  ;;  %v839_v19 = vrot.slane %v2487_v49, 7  ;;  %v2513_v15 = vsel %vm98_vm6, %v836_v45, %v2353_v6  ;;  %v977_v2 = vrot.slane %v2487_v49, 1 }
 0x137   :  { %669 = vrot.lane.b32.xlu0 %v2456_v23, %s1578_s0  ;;  %v835_v59 = vsel %vm95_vm5, %v833_v42, %v2321_v3  ;;  %v846_v41 = vrot.slane %v2513_v15, 7  ;;  %v18_v34 = vand.u32 127, %v3275_v31  ;;  %v978_v33 = vrot.slane %v2483_v25, 1 }
 0x138   :  { %v2493_v22 = vpop.permute.xlu1 %1138  ;;  %v2517_v54 = vsel %vm98_vm6, %v835_v59, %v2355_v46  ;;  %v842_v6 = vsel %vm164_vm7, %v840_v24, %v839_v19  ;;  %v2541_v21 = vsel %vm164_vm7, %v839_v19, %v840_v24  ;;  %v1504_v59 = vld [vmem:[%s3212_s1 + $0x1] ss:$0 sm:$0xff]  ;;  %v984_v19 = vrot.slane %v2513_v15, 1 }
 0x139   :  { %v2495_v32 = vpop.permute.xlu0 %1136  ;;  %v845_v5 = vrot.slane %v2517_v54, 7  ;;  %v2537_v9 = vsel %vm164_vm7, 0.0, %v842_v6  ;;  %3272 = vst [vmem:[#allocation5_spill] sm:$0xff] %v2541_v21  ;;  %v2590_v38 = vand.u32 15, %v18_v34  ;;  %v983_v24 = vrot.slane %v2517_v54, 1 }
 0x13a   :  { %695 = vrot.lane.b32.xlu1 %v2425_v43, %s1579_s19  ;;  %3271 = vst [vmem:[#allocation4_spill] sm:$0xff] %v2537_v9  ;;  %v2609_v6 = vmul.f32 %v1504_v59, %v2112_v11  ;;  %v3279_v11 = vld [vmem:[#allocation8_spill] sm:$0xff] }
 0x13b   :  { %693 = vrot.lane.b32.xlu0 %v2421_v62, %s1579_s19  ;;  %v848_v12 = vsel %vm164_vm7, %v846_v41, %v845_v5  ;;  %v2559_v48 = vsel %vm164_vm7, %v845_v5, %v846_v41  ;;  %vm181_vm10 = vcmp.lt.s32.totalorder %v2590_v38, 1  ;;  %v980_v41 = vsel %vm306_vm8, %v978_v33, %v977_v2 }
 0x13c   :  { %v2519_v37 = vpop.permute.xlu1 %1083  ;;  %v2555_v4 = vsel %vm164_vm7, 0.0, %v848_v12  ;;  %3274 = vst [vmem:[#allocation23_spill] sm:$0xff] %v2559_v48  ;;  %vm220_vm11 = vcmp.ge.s32.totalorder %v2590_v38, 15  ;;  %v207_v5 = vmul.f32 %v1504_v59, %v2108_v10  ;;  %v2612_v12 = vmul.f32 %v1504_v59, %v2130_v14 }
 0x13d   :  { %v2521_v3 = vpop.permute.xlu0 %1081  ;;  %3273 = vst [vmem:[#allocation22_spill] sm:$0xff] %v2555_v4  ;;  %v2623_v10 = vsel %vm306_vm8, %v977_v2, %v978_v33  ;;  %v1161_v14 = vsel %vm80_vm0, %v3279_v11, %v2369_v57  ;;  %vm1423_vm13 = vcmp.eq.s32.totalorder %v2590_v38, 15 }
 0x13e   :  { %709 = vrot.lane.b32.xlu1 %v2441_v50, %s1579_s19 }
 0x13f   :  { %707 = vrot.lane.b32.xlu0 %v2456_v23, %s1579_s19  ;;  %v3278_v23 = vld [vmem:[#allocation7_spill] sm:$0xff] }
 0x140   :  { %v2531_v8 = vpop.permute.xlu1 %1144  ;;  %v1099_v50 = vsel %vm80_vm0, %v3278_v23, %v2363_v56  ;;  %v2638_v56 = vsel %vm306_vm8, %v983_v24, %v984_v19  ;;  %v986_v23 = vsel %vm306_vm8, %v984_v19, %v983_v24 }
 0x141   :  { %v2533_v46 = vpop.permute.xlu0 %1142  ;;  %v1101_v2 = vsel %vm83_vm1, %v1099_v50, %v2379_v47 }
 0x142   :  { %854 = vrot.lane.b32.xlu1 %v2541_v21, %s1578_s0 }
 0x143   :  { %852 = vrot.lane.b32.xlu0 %v2537_v9, %s1578_s0 }
 0x144   :  { %v2549_v51 = vpop.permute.xlu1 %1089 }
 0x145   :  { %v2551_v29 = vpop.permute.xlu0 %1087 }
 0x146   :  { %868 = vrot.lane.b32.xlu1 %v2559_v48, %s1578_s0 }
 0x147   :  { %866 = vrot.lane.b32.xlu0 %v2555_v4, %s1578_s0 }
 0x148   :  { %v2565_v17 = vpop.permute.xlu1 %1150 }
 0x149   :  { %v2567_v40 = vpop.permute.xlu0 %1148 }
 0x14a   :  { %892 = vrot.lane.b32.xlu1 %v2541_v21, %s1579_s19  ;;  %v3277_v21 = vld [vmem:[#allocation6_spill] sm:$0xff] }
 0x14b   :  { %890 = vrot.lane.b32.xlu0 %v2537_v9, %s1579_s19  ;;  %v1100_v9 = vsel %vm80_vm0, %v3277_v21, %v2361_v53  ;;  %v2634_v53 = vsel %vm310_vm9, 0.0, %v980_v41  ;;  %v3280_v21 = vld [vmem:[#allocation9_spill] sm:$0xff] }
 0x14c   :  { %v2573_v13 = vpop.permute.xlu1 %1095  ;;  %v1160_v57 = vsel %vm80_vm0, %v3280_v21, %v2371_v63  ;;  %v1503_v63 = vld [vmem:[%s3212_s1] ss:$0 sm:$0xff] }
 0x14d   :  { %v2575_v16 = vpop.permute.xlu0 %1093  ;;  %v1162_v41 = vsel %vm83_vm1, %v1160_v57, %v2387_v61 }
 0x14e   :  { %906 = vrot.lane.b32.xlu1 %v2559_v48, %s1579_s19  ;;  %v3276_v48 = vld [vmem:[#allocation15_spill] sm:$0xff]  ;;  %v1164_v61 = vsel %vm86_vm2, %v1162_v41, %v2409_v26 }
 0x14f   :  { %904 = vrot.lane.b32.xlu0 %v2555_v4, %s1579_s19  ;;  %v211_v4 = vmul.f32 %v1504_v59, %v3276_v48  ;;  %v1102_v48 = vsel %vm83_vm1, %v1100_v9, %v2377_v7  ;;  %v1163_v59 = vsel %vm83_vm1, %v1161_v14, %v2385_v60  ;;  %v1103_v9 = vsel %vm86_vm2, %v1101_v2, %v2399_v58  ;;  %v1505_v58 = vld [vmem:[%s3212_s1 + $0x2] ss:$0 sm:$0xff] }
 0x150   :  { %v2582_v20 = vpop.permute.xlu1 %1156  ;;  %v1104_v24 = vsel %vm86_vm2, %v1102_v48, %v2397_v35  ;;  %v1165_v60 = vsel %vm86_vm2, %v1163_v59, %v2407_v36  ;;  %v1105_v19 = vsel %vm89_vm3, %v1103_v9, %v2452_v28 }
 0x151   :  { %v2584_v18 = vpop.permute.xlu0 %1154  ;;  %v1106_v35 = vsel %vm89_vm3, %v1104_v24, %v2450_v55  ;;  %v1167_v26 = vsel %vm89_vm3, %v1165_v60, %v2493_v22  ;;  %v1166_v55 = vsel %vm89_vm3, %v1164_v61, %v2495_v32  ;;  %v1107_v11 = vsel %vm92_vm4, %v1105_v19, %v2521_v3 }
 0x152   :  { %917 = vrot.lane.b32.xlu1 %v2483_v25, %s1578_s0  ;;  %v1108_v28 = vsel %vm92_vm4, %v1106_v35, %v2519_v37  ;;  %v1169_v14 = vsel %vm92_vm4, %v1167_v26, %v2531_v8  ;;  %v1168_v21 = vsel %vm92_vm4, %v1166_v55, %v2533_v46  ;;  %v2709_v46 = vsel %vm310_vm9, 0.0, %v986_v23 }
 0x153   :  { %915 = vrot.lane.b32.xlu0 %v2487_v49, %s1578_s0  ;;  %v1110_v3 = vsel %vm95_vm5, %v1108_v28, %v2549_v51 }
 0x154   :  { %v180_v42 = vpop.permute.xlu1 %179 }
 0x155   :  { %v178_v45 = vpop.permute.xlu0 %177 }
 0x156   :  { %931 = vrot.lane.b32.xlu1 %v2513_v15, %s1578_s0  ;;  %v182_v7 = vsel %vm181_vm10, 0.0, %v178_v45  ;;  %v183_v45 = vsel %vm181_vm10, 0.0, %v180_v42 }
 0x157   :  { %929 = vrot.lane.b32.xlu0 %v2517_v54, %s1578_s0  ;;  %v188_v42 = vmul.f32 %v1503_v63, %v182_v7  ;;  %v189_v2 = vmul.f32 %v1503_v63, %v183_v45  ;;  %v2720_v7 = vsel %vm98_vm6, %v1110_v3, %v2573_v13 }
 0x158   :  { %v195_v31 = vpop.permute.xlu1 %194 }
 0x159   :  { %v193_v34 = vpop.permute.xlu0 %192  ;;  %v197_v32 = vsel %vm181_vm10, 0.0, %v195_v31  ;;  %v1109_v31 = vsel %vm95_vm5, %v1107_v11, %v2551_v29  ;;  %v209_v41 = vadd.f32 %v207_v5, %v188_v42  ;;  %v210_v9 = vadd.f32 %v2609_v6, %v189_v2  ;;  %v3282_v2 = vld [vmem:[#allocation12_spill] sm:$0xff] }
 0x15a   :  { %955 = vrot.lane.b32.xlu1 %v2483_v25, %s1579_s19  ;;  %v196_v33 = vsel %vm181_vm10, 0.0, %v193_v34  ;;  %v2724_v23 = vsel %vm98_vm6, %v1109_v31, %v2575_v16  ;;  %v1171_v16 = vsel %vm95_vm5, %v1169_v14, %v2565_v17  ;;  %v1170_v6 = vsel %vm95_vm5, %v1168_v21, %v2567_v40  ;;  %v1507_v17 = vld [vmem:[%s3212_s1 + $0x4] ss:$0 sm:$0xff] }
 0x15b   :  { %953 = vrot.lane.b32.xlu0 %v2487_v49, %s1579_s19  ;;  %v198_v34 = vmul.f32 %v1503_v63, %v196_v33  ;;  %v2751_v40 = vsel %vm98_vm6, %v1170_v6, %v2584_v18  ;;  %v1508_v18 = vld [vmem:[%s3212_s1 + $0x5] ss:$0 sm:$0xff] }
 0x15c   :  { %v219_v47 = vpop.permute.xlu1 %218 }
 0x15d   :  { %v217_v50 = vpop.permute.xlu0 %216  ;;  %v222_v57 = vsel %vm220_vm11, 0.0, %v219_v47  ;;  %v213_v8 = vadd.f32 %v211_v4, %v198_v34  ;;  %v1506_v4 = vld [vmem:[%s3212_s1 + $0x3] ss:$0 sm:$0xff]  ;;  %v199_v47 = vmul.f32 %v1503_v63, %v197_v32  ;;  %v1175_v63 = vrot.slane %v2720_v7, 7 }
 0x15e   :  { %v221_v36 = vsel %vm220_vm11, 0.0, %v217_v50  ;;  %969 = vrot.lane.b32.xlu1 %v2513_v15, %s1579_s19  ;;  %v228_v24 = vmul.f32 %v1505_v58, %v222_v57  ;;  %v271_v32 = vmul.f32 %v1507_v17, %v3282_v2 }
 0x15f   :  { %967 = vrot.lane.b32.xlu0 %v2517_v54, %s1579_s19  ;;  %v227_v37 = vmul.f32 %v1505_v58, %v221_v36  ;;  %v1174_v36 = vrot.slane %v2724_v23, 7  ;;  %v214_v26 = vadd.f32 %v2612_v12, %v199_v47 }
 0x160   :  { %v234_v22 = vpop.permute.xlu1 %233  ;;  %v230_v34 = vadd.f32 %v228_v24, %v210_v9 }
 0x161   :  { %v232_v48 = vpop.permute.xlu0 %231  ;;  %v236_v51 = vsel %vm220_vm11, 0.0, %v234_v22  ;;  %v229_v60 = vadd.f32 %v227_v37, %v209_v41  ;;  %v3281_v22 = vld [vmem:[#allocation11_spill] sm:$0xff]  ;;  %v1177_v31 = vsel %vm164_vm7, %v1175_v63, %v1174_v36  ;;  %v1180_v41 = vrot.slane %v2751_v40, 7 }
 0x162   :  { %v235_v33 = vsel %vm220_vm11, 0.0, %v232_v48  ;;  %992 = vrot.lane.b32.xlu1 %v2634_v53, %s1578_s0  ;;  %v238_v19 = vmul.f32 %v1505_v58, %v236_v51  ;;  %v272_v48 = vmul.f32 %v1507_v17, %v3281_v22  ;;  %v2786_v6 = vsel %vm164_vm7, %v1174_v36, %v1175_v63  ;;  %v1509_v63 = vld [vmem:[%s3212_s1 + $0x6] ss:$0 sm:$0xff] }
 0x163   :  { %v237_v59 = vmul.f32 %v1505_v58, %v235_v33  ;;  %990 = vrot.lane.b32.xlu0 %v2623_v10, %s1578_s0  ;;  %v2743_v58 = vsel %vm98_vm6, %v1171_v16, %v2582_v20  ;;  %v2782_v16 = vsel %vm164_vm7, 0.0, %v1177_v31 }
 0x164   :  { %v245_v29 = vpop.permute.xlu1 %244  ;;  %v240_v21 = vadd.f32 %v238_v19, %v214_v26  ;;  %v1181_v37 = vrot.slane %v2743_v58, 7 }
 0x165   :  { %v239_v50 = vadd.f32 %v237_v59, %v213_v8  ;;  %v243_v5 = vpop.permute.xlu0 %242  ;;  %v247_v61 = vsel %vm181_vm10, 0.0, %v245_v29 }
 0x166   :  { %v246_v35 = vsel %vm181_vm10, 0.0, %v243_v5  ;;  %v253_v13 = vmul.f32 %v1506_v4, %v247_v61  ;;  %1006 = vrot.lane.b32.xlu1 %v2709_v46, %s1578_s0 }
 0x167   :  { %v252_v45 = vmul.f32 %v1506_v4, %v246_v35  ;;  %1004 = vrot.lane.b32.xlu0 %v2638_v56, %s1578_s0 }
 0x168   :  { %v259_v28 = vpop.permute.xlu1 %258  ;;  %v255_v11 = vadd.f32 %v253_v13, %v230_v34 }
 0x169   :  { %v254_v55 = vadd.f32 %v252_v45, %v229_v60  ;;  %v257_v42 = vpop.permute.xlu0 %256  ;;  %v261_v14 = vsel %vm181_vm10, 0.0, %v259_v28  ;;  %v3284_v60 = vld [vmem:[#allocation14_spill] sm:$0xff]  ;;  %v1183_v28 = vsel %vm164_vm7, %v1181_v37, %v1180_v41 }
 0x16a   :  { %v260_v20 = vsel %vm181_vm10, 0.0, %v257_v42  ;;  %v263_v12 = vmul.f32 %v1506_v4, %v261_v14  ;;  %1030 = vrot.lane.b32.xlu1 %v2634_v53, %s1579_s19  ;;  %v274_v24 = vadd.f32 %v272_v48, %v255_v11  ;;  %v275_v61 = vmul.f32 %v1507_v17, %v3284_v60 }
 0x16b   :  { %v262_v57 = vmul.f32 %v1506_v4, %v260_v20  ;;  %1028 = vrot.lane.b32.xlu0 %v2623_v10, %s1579_s19  ;;  %v273_v29 = vadd.f32 %v271_v32, %v254_v55  ;;  %v2807_v22 = vsel %vm164_vm7, 0.0, %v1183_v28  ;;  %v2811_v48 = vsel %vm164_vm7, %v1180_v41, %v1181_v37  ;;  %v1510_v32 = vld [vmem:[%s3212_s1 + $0x7] ss:$0 sm:$0xff] }
 0x16c   :  { %v265_v33 = vadd.f32 %v263_v12, %v240_v21  ;;  %v283_v8 = vpop.permute.xlu1 %282 }
 0x16d   :  { %v264_v3 = vadd.f32 %v262_v57, %v239_v50  ;;  %v281_v59 = vpop.permute.xlu0 %280  ;;  %v285_v51 = vsel %vm220_vm11, 0.0, %v283_v8  ;;  %v3283_v50 = vld [vmem:[#allocation13_spill] sm:$0xff] }
 0x16e   :  { %v284_v4 = vsel %vm220_vm11, 0.0, %v281_v59  ;;  %v291_v47 = vmul.f32 %v1508_v18, %v285_v51  ;;  %1044 = vrot.lane.b32.xlu1 %v2709_v46, %s1579_s19  ;;  %v276_v9 = vmul.f32 %v1507_v17, %v3283_v50  ;;  %v350_v51 = vmul.f32 %v1510_v32, %v2209_v30 }
 0x16f   :  { %v290_v5 = vmul.f32 %v1508_v18, %v284_v4  ;;  %1042 = vrot.lane.b32.xlu0 %v2638_v56, %s1579_s19  ;;  %v277_v17 = vadd.f32 %v275_v61, %v264_v3  ;;  %v1511_v4 = vld [vmem:[%s3212_s1 + $0x8] ss:$0 sm:$0xff] }
 0x170   :  { %v293_v35 = vadd.f32 %v291_v47, %v274_v24  ;;  %v297_v13 = vpop.permute.xlu1 %296  ;;  %v278_v34 = vadd.f32 %v276_v9, %v265_v33  ;;  %v349_v47 = vmul.f32 %v1510_v32, %v2213_v39  ;;  %v354_v39 = vmul.f32 %v1510_v32, %v2229_v44  ;;  %v1516_v44 = vld [vmem:[%s3212_s1 + $0x9] ss:$0 sm:$0xff] }
 0x171   :  { %v292_v19 = vadd.f32 %v290_v5, %v273_v29  ;;  %v295_v45 = vpop.permute.xlu0 %294  ;;  %v299_v26 = vsel %vm220_vm11, 0.0, %v297_v13 }
 0x172   :  { %v298_v55 = vsel %vm220_vm11, 0.0, %v295_v45  ;;  %v301_v42 = vmul.f32 %v1508_v18, %v299_v26  ;;  %1189 = vrot.lane.b32.xlu1 %v2786_v6, %s1578_s0  ;;  %v353_v45 = vmul.f32 %v1510_v32, %v2244_v52 }
 0x173   :  { %v300_v11 = vmul.f32 %v1508_v18, %v298_v55  ;;  %1187 = vrot.lane.b32.xlu0 %v2782_v16, %s1578_s0 }
 0x174   :  { %v303_v36 = vadd.f32 %v301_v42, %v278_v34  ;;  %v323_v20 = vpop.permute.xlu1 %322 }
 0x175   :  { %v302_v14 = vadd.f32 %v300_v11, %v277_v17  ;;  %v321_v21 = vpop.permute.xlu0 %320  ;;  %v325_v12 = vsel %vm181_vm10, 0.0, %v323_v20 }
 0x176   :  { %v324_v57 = vsel %vm181_vm10, 0.0, %v321_v21  ;;  %v331_v18 = vmul.f32 %v1509_v63, %v325_v12  ;;  %1203 = vrot.lane.b32.xlu1 %v2811_v48, %s1578_s0 }
 0x177   :  { %v330_v2 = vmul.f32 %v1509_v63, %v324_v57  ;;  %1201 = vrot.lane.b32.xlu0 %v2807_v22, %s1578_s0  ;;  %v1517_v57 = vld [vmem:[%s3212_s1 + $0xa] ss:$0 sm:$0xff] }
 0x178   :  { %v333_v33 = vadd.f32 %v331_v18, %v293_v35  ;;  %v337_v8 = vpop.permute.xlu1 %336 }
 0x179   :  { %v332_v3 = vadd.f32 %v330_v2, %v292_v19  ;;  %v335_v59 = vpop.permute.xlu0 %334  ;;  %v339_v37 = vsel %vm181_vm10, 0.0, %v337_v8  ;;  %v3285_v8 = vld [vmem:[#allocation19_spill] sm:$0xff] }
 0x17a   :  { %v338_v31 = vsel %vm181_vm10, 0.0, %v335_v59  ;;  %v341_v41 = vmul.f32 %v1509_v63, %v339_v37  ;;  %1227 = vrot.lane.b32.xlu1 %v2786_v6, %s1579_s19  ;;  %v352_v60 = vadd.f32 %v350_v51, %v333_v33  ;;  %v547_v59 = vmul.f32 %v1517_v57, %v3285_v8  ;;  %v1519_v8 = vld [vmem:[%s3212_s1 + $0xc] ss:$0 sm:$0xff] }
 0x17b   :  { %v340_v24 = vmul.f32 %v1509_v63, %v338_v31  ;;  %1225 = vrot.lane.b32.xlu0 %v2782_v16, %s1579_s19  ;;  %v351_v13 = vadd.f32 %v349_v47, %v332_v3  ;;  %v546_v3 = vmul.f32 %v1517_v57, %v2325_v1  ;;  %v1312_v47 = vrot.slane %v2724_v23, 1 }
 0x17c   :  { %v343_v29 = vadd.f32 %v341_v41, %v303_v36  ;;  %v361_v50 = vpop.permute.xlu1 %360 }
 0x17d   :  { %v342_v5 = vadd.f32 %v340_v24, %v302_v14  ;;  %v359_v9 = vpop.permute.xlu0 %358  ;;  %v363_v61 = vsel %vm220_vm11, 0.0, %v361_v50 }
 0x17e   :  { %v362_v35 = vsel %vm220_vm11, 0.0, %v359_v9  ;;  %v369_v19 = vmul.f32 %v1511_v4, %v363_v61  ;;  %1241 = vrot.lane.b32.xlu1 %v2811_v48, %s1579_s19  ;;  %v356_v42 = vadd.f32 %v354_v39, %v343_v29  ;;  %v1313_v29 = vrot.slane %v2720_v7, 1  ;;  %v1518_v9 = vld [vmem:[%s3212_s1 + $0xb] ss:$0 sm:$0xff]  ;;  %v3286_v61 = vld [vmem:[#allocation20_spill] sm:$0xff] }
 0x17f   :  { %v368_v30 = vmul.f32 %v1511_v4, %v362_v35  ;;  %1239 = vrot.lane.b32.xlu0 %v2807_v22, %s1579_s19  ;;  %v355_v36 = vadd.f32 %v353_v45, %v342_v5  ;;  %v550_v35 = vmul.f32 %v1517_v57, %v3286_v61  ;;  %v1520_v61 = vld [vmem:[%s3212_s1 + $0xd] ss:$0 sm:$0xff] }
 0x180   :  { %v371_v34 = vadd.f32 %v369_v19, %v352_v60  ;;  %v375_v55 = vpop.permute.xlu1 %374  ;;  %v3287_v19 = vld [vmem:[#allocation21_spill] sm:$0xff] }
 0x181   :  { %v370_v26 = vadd.f32 %v368_v30, %v351_v13  ;;  %v373_v28 = vpop.permute.xlu0 %372  ;;  %v377_v17 = vsel %vm220_vm11, 0.0, %v375_v55  ;;  %v551_v13 = vmul.f32 %v1517_v57, %v3287_v19 }
 0x182   :  { %v376_v11 = vsel %vm220_vm11, 0.0, %v373_v28  ;;  %v379_v63 = vmul.f32 %v1511_v4, %v377_v17  ;;  %1252 = vrot.lane.b32.xlu1 %v2720_v7, %s1578_s0  ;;  %v1315_v28 = vsel %vm306_vm8, %v1313_v29, %v1312_v47 }
 0x183   :  { %v378_v14 = vmul.f32 %v1511_v4, %v376_v11  ;;  %1250 = vrot.lane.b32.xlu0 %v2724_v23, %s1578_s0 }
 0x184   :  { %v381_v52 = vadd.f32 %v379_v63, %v356_v42  ;;  %v520_v21 = vpop.permute.xlu1 %519  ;;  %v1318_v42 = vrot.slane %v2751_v40, 1 }
 0x185   :  { %v380_v20 = vadd.f32 %v378_v14, %v355_v36  ;;  %v518_v12 = vpop.permute.xlu0 %517  ;;  %v522_v18 = vsel %vm181_vm10, 0.0, %v520_v21  ;;  %v1319_v36 = vrot.slane %v2743_v58, 1 }
 0x186   :  { %v521_v2 = vsel %vm181_vm10, 0.0, %v518_v12  ;;  %v528_v32 = vmul.f32 %v1516_v44, %v522_v18  ;;  %1266 = vrot.lane.b32.xlu1 %v2743_v58, %s1578_s0  ;;  %v2900_v18 = vsel %vm306_vm8, %v1312_v47, %v1313_v29 }
 0x187   :  { %v527_v33 = vmul.f32 %v1516_v44, %v521_v2  ;;  %1264 = vrot.lane.b32.xlu0 %v2751_v40, %s1578_s0  ;;  %v2904_v2 = vsel %vm310_vm9, 0.0, %v1315_v28  ;;  %v3289_v28 = vld [vmem:[#allocation17_spill] sm:$0xff] }
 0x188   :  { %v530_v37 = vadd.f32 %v528_v32, %v371_v34  ;;  %v534_v41 = vpop.permute.xlu1 %533 }
 0x189   :  { %v529_v31 = vadd.f32 %v527_v33, %v370_v26  ;;  %v532_v24 = vpop.permute.xlu0 %531  ;;  %v536_v51 = vsel %vm181_vm10, 0.0, %v534_v41 }
 0x18a   :  { %v535_v4 = vsel %vm181_vm10, 0.0, %v532_v24  ;;  %v538_v5 = vmul.f32 %v1516_v44, %v536_v51  ;;  %1290 = vrot.lane.b32.xlu1 %v2720_v7, %s1579_s19  ;;  %v549_v1 = vadd.f32 %v547_v59, %v530_v37 }
 0x18b   :  { %v537_v50 = vmul.f32 %v1516_v44, %v535_v4  ;;  %1288 = vrot.lane.b32.xlu0 %v2724_v23, %s1579_s19  ;;  %v548_v60 = vadd.f32 %v546_v3, %v529_v31  ;;  %v1321_v3 = vsel %vm306_vm8, %v1319_v36, %v1318_v42  ;;  %v2921_v4 = vsel %vm306_vm8, %v1318_v42, %v1319_v36 }
 0x18c   :  { %v540_v30 = vadd.f32 %v538_v5, %v381_v52  ;;  %v558_v45 = vpop.permute.xlu1 %557  ;;  %v2925_v47 = vsel %vm310_vm9, 0.0, %v1321_v3  ;;  %v609_v42 = vmul.f32 %v1520_v61, %v3289_v28 }
 0x18d   :  { %v539_v39 = vadd.f32 %v537_v50, %v380_v20  ;;  %v556_v34 = vpop.permute.xlu0 %555  ;;  %v560_v26 = vsel %vm220_vm11, 0.0, %v558_v45  ;;  %v1521_v45 = vld [vmem:[%s3212_s1 + $0xe] ss:$0 sm:$0xff] }
 0x18e   :  { %v559_v55 = vsel %vm220_vm11, 0.0, %v556_v34  ;;  %v566_v17 = vmul.f32 %v1518_v9, %v560_v26  ;;  %1304 = vrot.lane.b32.xlu1 %v2743_v58, %s1579_s19  ;;  %v553_v63 = vadd.f32 %v551_v13, %v540_v30  ;;  %v3288_v30 = vld [vmem:[#allocation16_spill] sm:$0xff] }
 0x18f   :  { %v565_v11 = vmul.f32 %v1518_v9, %v559_v55  ;;  %1302 = vrot.lane.b32.xlu0 %v2751_v40, %s1579_s19  ;;  %v552_v14 = vadd.f32 %v550_v35, %v539_v39  ;;  %v610_v39 = vmul.f32 %v1520_v61, %v3288_v30 }
 0x190   :  { %v568_v44 = vadd.f32 %v566_v17, %v549_v1  ;;  %v572_v20 = vpop.permute.xlu1 %571 }
 0x191   :  { %v567_v52 = vadd.f32 %v565_v11, %v548_v60  ;;  %v570_v21 = vpop.permute.xlu0 %569  ;;  %v574_v12 = vsel %vm220_vm11, 0.0, %v572_v20 }
 0x192   :  { %v573_v57 = vsel %vm220_vm11, 0.0, %v570_v21  ;;  %v576_v32 = vmul.f32 %v1518_v9, %v574_v12  ;;  %1327 = vrot.lane.b32.xlu1 %v2904_v2, %s1578_s0  ;;  %v3290_v12 = vld [vmem:[#allocation10_spill] sm:$0xff] }
 0x193   :  { %v575_v33 = vmul.f32 %v1518_v9, %v573_v57  ;;  %1325 = vrot.lane.b32.xlu0 %v2900_v18, %s1578_s0  ;;  %v614_v57 = vmul.f32 %v1520_v61, %v3290_v12 }
 0x194   :  { %v578_v59 = vadd.f32 %v576_v32, %v553_v63  ;;  %v583_v31 = vpop.permute.xlu1 %582 }
 0x195   :  { %v577_v37 = vadd.f32 %v575_v33, %v552_v14  ;;  %v581_v41 = vpop.permute.xlu0 %580  ;;  %v585_v24 = vsel %vm181_vm10, 0.0, %v583_v31  ;;  %v3291_v33 = vld [vmem:[#allocation18_spill] sm:$0xff] }
 0x196   :  { %v584_v51 = vsel %vm181_vm10, 0.0, %v581_v41  ;;  %v591_v29 = vmul.f32 %v1519_v8, %v585_v24  ;;  %1341 = vrot.lane.b32.xlu1 %v2925_v47, %s1578_s0  ;;  %v613_v3 = vmul.f32 %v1520_v61, %v3291_v33 }
 0x197   :  { %v590_v5 = vmul.f32 %v1519_v8, %v584_v51  ;;  %1339 = vrot.lane.b32.xlu0 %v2921_v4, %s1578_s0 }
 0x198   :  { %v593_v50 = vadd.f32 %v591_v29, %v568_v44  ;;  %v597_v9 = vpop.permute.xlu1 %596  ;;  %v1522_v29 = vld [vmem:[%s3212_s1 + $0xf] ss:$0 sm:$0xff] }
 0x199   :  { %v592_v1 = vadd.f32 %v590_v5, %v567_v52  ;;  %v595_v60 = vpop.permute.xlu0 %594  ;;  %v599_v27 = vsel %vm181_vm10, 0.0, %v597_v9 }
 0x19a   :  { %v598_v35 = vsel %vm181_vm10, 0.0, %v595_v60  ;;  %v601_v19 = vmul.f32 %v1519_v8, %v599_v27  ;;  %1365 = vrot.lane.b32.xlu1 %v2904_v2, %s1579_s19  ;;  %v612_v11 = vadd.f32 %v610_v39, %v593_v50 }
 0x19b   :  { %v600_v13 = vmul.f32 %v1519_v8, %v598_v35  ;;  %1363 = vrot.lane.b32.xlu0 %v2900_v18, %s1579_s19  ;;  %v611_v44 = vadd.f32 %v609_v42, %v592_v1  ;;  %v1524_v42 = vld [vmem:[%s3212_s1 + $0x11] ss:$0 sm:$0xff] }
 0x19c   :  { %v603_v34 = vadd.f32 %v601_v19, %v578_v59  ;;  %v621_v55 = vpop.permute.xlu1 %620 }
 0x19d   :  { %v602_v26 = vadd.f32 %v600_v13, %v577_v37  ;;  %v619_v17 = vpop.permute.xlu0 %618  ;;  %v623_v63 = vsel %vm220_vm11, 0.0, %v621_v55 }
 0x19e   :  { %v622_v36 = vsel %vm220_vm11, 0.0, %v619_v17  ;;  %v629_v14 = vmul.f32 %v1521_v45, %v623_v63  ;;  %1379 = vrot.lane.b32.xlu1 %v2925_v47, %s1579_s19  ;;  %v616_v31 = vadd.f32 %v614_v57, %v603_v34 }
 0x19f   :  { %v628_v52 = vmul.f32 %v1521_v45, %v622_v36  ;;  %1377 = vrot.lane.b32.xlu0 %v2921_v4, %s1579_s19  ;;  %v615_v24 = vadd.f32 %v613_v3, %v602_v26 }
 0x1a0   :  { %v631_v20 = vadd.f32 %v629_v14, %v612_v11  ;;  %v635_v32 = vpop.permute.xlu1 %634 }
 0x1a1   :  { %v630_v21 = vadd.f32 %v628_v52, %v611_v44  ;;  %v633_v8 = vpop.permute.xlu0 %632  ;;  %v637_v59 = vsel %vm220_vm11, 0.0, %v635_v32 }
 0x1a2   :  { %v636_v37 = vsel %vm220_vm11, 0.0, %v633_v8  ;;  %v639_v41 = vmul.f32 %v1521_v45, %v637_v59 }
 0x1a3   :  { %v638_v51 = vmul.f32 %v1521_v45, %v636_v37  ;;  %v1523_v45 = vld [vmem:[%s3212_s1 + $0x10] ss:$0 sm:$0xff]  ;;  %v1529_v37 = vld [vmem:[%s3212_s1 + $0x12] ss:$0 sm:$0xff] }
 0x1a4   :  { %v641_v5 = vadd.f32 %v639_v41, %v616_v31  ;;  %v658_v1 = vpop.permute.xlu1 %657  ;;  %v684_v17 = vmul.f32 %v1523_v45, %v2421_v62  ;;  %v685_v11 = vmul.f32 %v1523_v45, %v2425_v43  ;;  %v3292_v31 = vld [vmem:[#allocation2_spill] sm:$0xff] }
 0x1a5   :  { %v640_v50 = vadd.f32 %v638_v51, %v615_v24  ;;  %v656_v9 = vpop.permute.xlu0 %655  ;;  %v660_v60 = vsel %vm181_vm10, 0.0, %v658_v1  ;;  %v689_v41 = vmul.f32 %v1523_v45, %v3292_v31  ;;  %v3293_v24 = vld [vmem:[#allocation3_spill] sm:$0xff] }
 0x1a6   :  { %v659_v61 = vsel %vm181_vm10, 0.0, %v656_v9  ;;  %v666_v27 = vmul.f32 %v1522_v29, %v660_v60  ;;  %v688_v51 = vmul.f32 %v1523_v45, %v3293_v24  ;;  %v3295_v45 = vld [vmem:[#allocation5_spill] sm:$0xff] }
 0x1a7   :  { %v665_v35 = vmul.f32 %v1522_v29, %v659_v61 }
 0x1a8   :  { %v668_v19 = vadd.f32 %v666_v27, %v631_v20  ;;  %v672_v30 = vpop.permute.xlu1 %671 }
 0x1a9   :  { %v667_v13 = vadd.f32 %v665_v35, %v630_v21  ;;  %v670_v39 = vpop.permute.xlu0 %669  ;;  %v674_v34 = vsel %vm181_vm10, 0.0, %v672_v30  ;;  %v3294_v30 = vld [vmem:[#allocation4_spill] sm:$0xff] }
 0x1aa   :  { %v673_v26 = vsel %vm181_vm10, 0.0, %v670_v39  ;;  %v676_v55 = vmul.f32 %v1522_v29, %v674_v34  ;;  %v687_v21 = vadd.f32 %v685_v11, %v668_v19 }
 0x1ab   :  { %v675_v28 = vmul.f32 %v1522_v29, %v673_v26  ;;  %v686_v57 = vadd.f32 %v684_v17, %v667_v13 }
 0x1ac   :  { %v678_v63 = vadd.f32 %v676_v55, %v641_v5  ;;  %v696_v14 = vpop.permute.xlu1 %695 }
 0x1ad   :  { %v677_v36 = vadd.f32 %v675_v28, %v640_v50  ;;  %v694_v44 = vpop.permute.xlu0 %693  ;;  %v698_v52 = vsel %vm220_vm11, 0.0, %v696_v14  ;;  %v1530_v50 = vld [vmem:[%s3212_s1 + $0x13] ss:$0 sm:$0xff] }
 0x1ae   :  { %v697_v20 = vsel %vm220_vm11, 0.0, %v694_v44  ;;  %v704_v12 = vmul.f32 %v1524_v42, %v698_v52  ;;  %v691_v19 = vadd.f32 %v689_v41, %v678_v63  ;;  %v881_v39 = vmul.f32 %v1530_v50, %v3294_v30 }
 0x1af   :  { %v703_v32 = vmul.f32 %v1524_v42, %v697_v20  ;;  %v690_v13 = vadd.f32 %v688_v51, %v677_v36  ;;  %v882_v34 = vmul.f32 %v1530_v50, %v3295_v45 }
 0x1b0   :  { %v706_v33 = vadd.f32 %v704_v12, %v687_v21  ;;  %v710_v8 = vpop.permute.xlu1 %709  ;;  %v3296_v21 = vld [vmem:[#allocation22_spill] sm:$0xff] }
 0x1b1   :  { %v705_v3 = vadd.f32 %v703_v32, %v686_v57  ;;  %v708_v62 = vpop.permute.xlu0 %707  ;;  %v712_v43 = vsel %vm220_vm11, 0.0, %v710_v8  ;;  %v885_v12 = vmul.f32 %v1530_v50, %v3296_v21  ;;  %v3297_v57 = vld [vmem:[#allocation23_spill] sm:$0xff] }
 0x1b2   :  { %v711_v59 = vsel %vm220_vm11, 0.0, %v708_v62  ;;  %v714_v1 = vmul.f32 %v1524_v42, %v712_v43  ;;  %v886_v32 = vmul.f32 %v1530_v50, %v3297_v57  ;;  %v1533_v57 = vld [vmem:[%s3212_s1 + $0x16] ss:$0 sm:$0xff] }
 0x1b3   :  { %v713_v9 = vmul.f32 %v1524_v42, %v711_v59 }
 0x1b4   :  { %v855_v29 = vpop.permute.xlu1 %854  ;;  %v716_v11 = vadd.f32 %v714_v1, %v691_v19 }
 0x1b5   :  { %v853_v5 = vpop.permute.xlu0 %852  ;;  %v857_v60 = vsel %vm181_vm10, 0.0, %v855_v29  ;;  %v715_v42 = vadd.f32 %v713_v9, %v690_v13  ;;  %v1531_v9 = vld [vmem:[%s3212_s1 + $0x14] ss:$0 sm:$0xff] }
 0x1b6   :  { %v856_v61 = vsel %vm181_vm10, 0.0, %v853_v5  ;;  %v863_v27 = vmul.f32 %v1529_v37, %v857_v60 }
 0x1b7   :  { %v862_v35 = vmul.f32 %v1529_v37, %v856_v61 }
 0x1b8   :  { %v865_v26 = vadd.f32 %v863_v27, %v706_v33  ;;  %v869_v28 = vpop.permute.xlu1 %868 }
 0x1b9   :  { %v864_v55 = vadd.f32 %v862_v35, %v705_v3  ;;  %v867_v17 = vpop.permute.xlu0 %866  ;;  %v871_v14 = vsel %vm181_vm10, 0.0, %v869_v28  ;;  %v1532_v35 = vld [vmem:[%s3212_s1 + $0x15] ss:$0 sm:$0xff] }
 0x1ba   :  { %v870_v44 = vsel %vm181_vm10, 0.0, %v867_v17  ;;  %v873_v52 = vmul.f32 %v1529_v37, %v871_v14  ;;  %v884_v63 = vadd.f32 %v882_v34, %v865_v26 }
 0x1bb   :  { %v872_v20 = vmul.f32 %v1529_v37, %v870_v44  ;;  %v883_v36 = vadd.f32 %v881_v39, %v864_v55 }
 0x1bc   :  { %v875_v33 = vadd.f32 %v873_v52, %v716_v11  ;;  %v893_v8 = vpop.permute.xlu1 %892 }
 0x1bd   :  { %v874_v3 = vadd.f32 %v872_v20, %v715_v42  ;;  %v891_v62 = vpop.permute.xlu0 %890  ;;  %v895_v50 = vsel %vm220_vm11, 0.0, %v893_v8 }
 0x1be   :  { %v888_v43 = vadd.f32 %v886_v32, %v875_v33  ;;  %v894_v60 = vsel %vm220_vm11, 0.0, %v891_v62  ;;  %v901_v45 = vmul.f32 %v1531_v9, %v895_v50  ;;  %v1534_v62 = vld [vmem:[%s3212_s1 + $0x17] ss:$0 sm:$0xff] }
 0x1bf   :  { %v887_v59 = vadd.f32 %v885_v12, %v874_v3  ;;  %v900_v34 = vmul.f32 %v1531_v9, %v894_v60 }
 0x1c0   :  { %v907_v31 = vpop.permute.xlu1 %906  ;;  %v903_v52 = vadd.f32 %v901_v45, %v884_v63 }
 0x1c1   :  { %v905_v41 = vpop.permute.xlu0 %904  ;;  %v909_v61 = vsel %vm220_vm11, 0.0, %v907_v31  ;;  %v902_v20 = vadd.f32 %v900_v34, %v883_v36  ;;  %v945_v36 = vmul.f32 %v1533_v57, %v2483_v25 }
 0x1c2   :  { %v908_v27 = vsel %vm220_vm11, 0.0, %v905_v41  ;;  %v911_v26 = vmul.f32 %v1531_v9, %v909_v61  ;;  %v944_v41 = vmul.f32 %v1533_v57, %v2487_v49  ;;  %v949_v61 = vmul.f32 %v1533_v57, %v2513_v15 }
 0x1c3   :  { %v910_v55 = vmul.f32 %v1531_v9, %v908_v27  ;;  %v948_v27 = vmul.f32 %v1533_v57, %v2517_v54 }
 0x1c4   :  { %v918_v24 = vpop.permute.xlu1 %917  ;;  %v913_v32 = vadd.f32 %v911_v26, %v888_v43 }
 0x1c5   :  { %v916_v51 = vpop.permute.xlu0 %915  ;;  %v920_v19 = vsel %vm181_vm10, 0.0, %v918_v24  ;;  %v912_v33 = vadd.f32 %v910_v55, %v887_v59 }
 0x1c6   :  { %v919_v13 = vsel %vm181_vm10, 0.0, %v916_v51  ;;  %v926_v11 = vmul.f32 %v1532_v35, %v920_v19 }
 0x1c7   :  { %v925_v42 = vmul.f32 %v1532_v35, %v919_v13 }
 0x1c8   :  { %v932_v29 = vpop.permute.xlu1 %931  ;;  %v928_v3 = vadd.f32 %v926_v11, %v903_v52 }
 0x1c9   :  { %v930_v5 = vpop.permute.xlu0 %929  ;;  %v934_v28 = vsel %vm181_vm10, 0.0, %v932_v29  ;;  %v927_v8 = vadd.f32 %v925_v42, %v902_v20  ;;  %v1535_v29 = vld [vmem:[%s3212_s1 + $0x18] ss:$0 sm:$0xff] }
 0x1ca   :  { %v933_v17 = vsel %vm181_vm10, 0.0, %v930_v5  ;;  %v936_v21 = vmul.f32 %v1532_v35, %v934_v28  ;;  %v947_v50 = vadd.f32 %v945_v36, %v928_v3 }
 0x1cb   :  { %v935_v12 = vmul.f32 %v1532_v35, %v933_v17  ;;  %v946_v60 = vadd.f32 %v944_v41, %v927_v8 }
 0x1cc   :  { %v956_v1 = vpop.permute.xlu1 %955  ;;  %v938_v43 = vadd.f32 %v936_v21, %v913_v32 }
 0x1cd   :  { %v954_v37 = vpop.permute.xlu0 %953  ;;  %v958_v31 = vsel %vm220_vm11, 0.0, %v956_v1  ;;  %v937_v59 = vadd.f32 %v935_v12, %v912_v33 }
 0x1ce   :  { %v957_v63 = vsel %vm220_vm11, 0.0, %v954_v37  ;;  %v964_v9 = vmul.f32 %v1534_v62, %v958_v31  ;;  %v951_v17 = vadd.f32 %v949_v61, %v938_v43 }
 0x1cf   :  { %v963_v37 = vmul.f32 %v1534_v62, %v957_v63  ;;  %v950_v54 = vadd.f32 %v948_v27, %v937_v59 }
 0x1d0   :  { %v970_v30 = vpop.permute.xlu1 %969  ;;  %v966_v28 = vadd.f32 %v964_v9, %v947_v50 }
 0x1d1   :  { %v968_v39 = vpop.permute.xlu0 %967  ;;  %v972_v25 = vsel %vm220_vm11, 0.0, %v970_v30  ;;  %v965_v15 = vadd.f32 %v963_v37, %v946_v60 }
 0x1d2   :  { %v971_v49 = vsel %vm220_vm11, 0.0, %v968_v39  ;;  %v974_v30 = vmul.f32 %v1534_v62, %v972_v25  ;;  %v1536_v39 = vld [vmem:[%s3212_s1 + $0x19] ss:$0 sm:$0xff] }
 0x1d3   :  { %v973_v55 = vmul.f32 %v1534_v62, %v971_v49  ;;  %v1019_v32 = vmul.f32 %v1536_v39, %v2623_v10  ;;  %v1020_v33 = vmul.f32 %v1536_v39, %v2634_v53  ;;  %v1023_v10 = vmul.f32 %v1536_v39, %v2638_v56 }
 0x1d4   :  { %v993_v14 = vpop.permute.xlu1 %992  ;;  %v976_v3 = vadd.f32 %v974_v30, %v951_v17  ;;  %v1024_v53 = vmul.f32 %v1536_v39, %v2709_v46 }
 0x1d5   :  { %v991_v44 = vpop.permute.xlu0 %990  ;;  %v995_v5 = vsel %vm181_vm10, 0.0, %v993_v14  ;;  %v1537_v14 = vld [vmem:[%s3212_s1 + $0x1a] ss:$0 sm:$0xff]  ;;  %v975_v8 = vadd.f32 %v973_v55, %v950_v54 }
 0x1d6   :  { %v994_v1 = vsel %vm181_vm10, 0.0, %v991_v44  ;;  %v1001_v35 = vmul.f32 %v1535_v29, %v995_v5 }
 0x1d7   :  { %v1000_v19 = vmul.f32 %v1535_v29, %v994_v1  ;;  %v1543_v1 = vld [vmem:[%s3212_s1 + $0x1c] ss:$0 sm:$0xff] }
 0x1d8   :  { %v1007_v24 = vpop.permute.xlu1 %1006  ;;  %v1003_v20 = vadd.f32 %v1001_v35, %v966_v28  ;;  %v1216_v35 = vmul.f32 %v1543_v1, %v2782_v16  ;;  %v1220_v16 = vmul.f32 %v1543_v1, %v2807_v22 }
 0x1d9   :  { %v1005_v51 = vpop.permute.xlu0 %1004  ;;  %v1009_v13 = vsel %vm181_vm10, 0.0, %v1007_v24  ;;  %v1002_v21 = vadd.f32 %v1000_v19, %v965_v15  ;;  %v1217_v19 = vmul.f32 %v1543_v1, %v2786_v6  ;;  %v1221_v6 = vmul.f32 %v1543_v1, %v2811_v48 }
 0x1da   :  { %v1008_v45 = vsel %vm181_vm10, 0.0, %v1005_v51  ;;  %v1011_v11 = vmul.f32 %v1535_v29, %v1009_v13  ;;  %v1542_v51 = vld [vmem:[%s3212_s1 + $0x1b] ss:$0 sm:$0xff]  ;;  %v1022_v43 = vadd.f32 %v1020_v33, %v1003_v20 }
 0x1db   :  { %v1010_v42 = vmul.f32 %v1535_v29, %v1008_v45  ;;  %v1021_v59 = vadd.f32 %v1019_v32, %v1002_v21 }
 0x1dc   :  { %v1031_v34 = vpop.permute.xlu1 %1030  ;;  %v1013_v41 = vadd.f32 %v1011_v11, %v976_v3 }
 0x1dd   :  { %v1029_v26 = vpop.permute.xlu0 %1028  ;;  %v1033_v44 = vsel %vm220_vm11, 0.0, %v1031_v34  ;;  %v1012_v24 = vadd.f32 %v1010_v42, %v975_v8 }
 0x1de   :  { %v1032_v52 = vsel %vm220_vm11, 0.0, %v1029_v26  ;;  %v1039_v62 = vmul.f32 %v1537_v14, %v1033_v44  ;;  %v1026_v61 = vadd.f32 %v1024_v53, %v1013_v41  ;;  %v1546_v53 = vld [vmem:[%s3212_s1 + $0x1f] ss:$0 sm:$0xff] }
 0x1df   :  { %v1038_v31 = vmul.f32 %v1537_v14, %v1032_v52  ;;  %v1025_v27 = vadd.f32 %v1023_v10, %v1012_v24 }
 0x1e0   :  { %v1045_v12 = vpop.permute.xlu1 %1044  ;;  %v1041_v50 = vadd.f32 %v1039_v62, %v1022_v43 }
 0x1e1   :  { %v1043_v57 = vpop.permute.xlu0 %1042  ;;  %v1047_v63 = vsel %vm220_vm11, 0.0, %v1045_v12  ;;  %v1040_v56 = vadd.f32 %v1038_v31, %v1021_v59  ;;  %v1544_v12 = vld [vmem:[%s3212_s1 + $0x1d] ss:$0 sm:$0xff]  ;;  %v1545_v31 = vld [vmem:[%s3212_s1 + $0x1e] ss:$0 sm:$0xff] }
 0x1e2   :  { %v1046_v36 = vsel %vm220_vm11, 0.0, %v1043_v57  ;;  %v1049_v9 = vmul.f32 %v1537_v14, %v1047_v63 }
 0x1e3   :  { %v1048_v37 = vmul.f32 %v1537_v14, %v1046_v36 }
 0x1e4   :  { %v1190_v29 = vpop.permute.xlu1 %1189  ;;  %v1051_v30 = vadd.f32 %v1049_v9, %v1026_v61 }
 0x1e5   :  { %v1188_v5 = vpop.permute.xlu0 %1187  ;;  %v1192_v25 = vsel %vm181_vm10, 0.0, %v1190_v29  ;;  %v1050_v55 = vadd.f32 %v1048_v37, %v1025_v27 }
 0x1e6   :  { %v1191_v49 = vsel %vm181_vm10, 0.0, %v1188_v5  ;;  %v1198_v60 = vmul.f32 %v1542_v51, %v1192_v25 }
 0x1e7   :  { %v1197_v46 = vmul.f32 %v1542_v51, %v1191_v49  ;;  %v1280_v49 = vmul.f32 %v1546_v53, %v2720_v7  ;;  %v1284_v7 = vmul.f32 %v1546_v53, %v2743_v58 }
 0x1e8   :  { %v1200_v13 = vadd.f32 %v1198_v60, %v1041_v50  ;;  %v1204_v34 = vpop.permute.xlu1 %1203  ;;  %v1279_v50 = vmul.f32 %v1546_v53, %v2724_v23  ;;  %v1283_v23 = vmul.f32 %v1546_v53, %v2751_v40  ;;  %v1550_v53 = vld [vmem:[%s3212_s1 + $0x23] ss:$0 sm:$0xff] }
 0x1e9   :  { %v1199_v45 = vadd.f32 %v1197_v46, %v1040_v56  ;;  %v1202_v26 = vpop.permute.xlu0 %1201  ;;  %v1206_v39 = vsel %vm181_vm10, 0.0, %v1204_v34 }
 0x1ea   :  { %v1205_v28 = vsel %vm181_vm10, 0.0, %v1202_v26  ;;  %v1208_v15 = vmul.f32 %v1542_v51, %v1206_v39  ;;  %v1219_v54 = vadd.f32 %v1217_v19, %v1200_v13 }
 0x1eb   :  { %v1207_v17 = vmul.f32 %v1542_v51, %v1205_v28  ;;  %v1218_v11 = vadd.f32 %v1216_v35, %v1199_v45 }
 0x1ec   :  { %v1210_v42 = vadd.f32 %v1208_v15, %v1051_v30  ;;  %v1228_v44 = vpop.permute.xlu1 %1227 }
 0x1ed   :  { %v1209_v14 = vadd.f32 %v1207_v17, %v1050_v55  ;;  %v1226_v52 = vpop.permute.xlu0 %1225  ;;  %v1230_v57 = vsel %vm220_vm11, 0.0, %v1228_v44  ;;  %v1547_v55 = vld [vmem:[%s3212_s1 + $0x20] ss:$0 sm:$0xff] }
 0x1ee   :  { %v1223_v20 = vadd.f32 %v1221_v6, %v1210_v42  ;;  %v1229_v32 = vsel %vm220_vm11, 0.0, %v1226_v52  ;;  %v1236_v3 = vmul.f32 %v1544_v12, %v1230_v57  ;;  %v1548_v42 = vld [vmem:[%s3212_s1 + $0x21] ss:$0 sm:$0xff] }
 0x1ef   :  { %v1222_v21 = vadd.f32 %v1220_v16, %v1209_v14  ;;  %v1235_v48 = vmul.f32 %v1544_v12, %v1229_v32 }
 0x1f0   :  { %v1242_v33 = vpop.permute.xlu1 %1241  ;;  %v1238_v43 = vadd.f32 %v1236_v3, %v1219_v54 }
 0x1f1   :  { %v1240_v22 = vpop.permute.xlu0 %1239  ;;  %v1244_v8 = vsel %vm220_vm11, 0.0, %v1242_v33  ;;  %v1237_v59 = vadd.f32 %v1235_v48, %v1218_v11 }
 0x1f2   :  { %v1243_v62 = vsel %vm220_vm11, 0.0, %v1240_v22  ;;  %v1246_v41 = vmul.f32 %v1544_v12, %v1244_v8 }
 0x1f3   :  { %v1245_v24 = vmul.f32 %v1544_v12, %v1243_v62 }
 0x1f4   :  { %v1253_v63 = vpop.permute.xlu1 %1252  ;;  %v1248_v56 = vadd.f32 %v1246_v41, %v1223_v20 }
 0x1f5   :  { %v1251_v36 = vpop.permute.xlu0 %1250  ;;  %v1255_v51 = vsel %vm181_vm10, 0.0, %v1253_v63  ;;  %v1247_v60 = vadd.f32 %v1245_v24, %v1222_v21 }
 0x1f6   :  { %v1254_v10 = vsel %vm181_vm10, 0.0, %v1251_v36  ;;  %v1261_v29 = vmul.f32 %v1545_v31, %v1255_v51  ;;  %v1549_v36 = vld [vmem:[%s3212_s1 + $0x22] ss:$0 sm:$0xff]  ;;  %s1580_s1 = smov 2  }
 0x1f7   :  { %v1260_v5 = vmul.f32 %v1545_v31, %v1254_v10 }
 0x1f8   :  { %v1263_v1 = vadd.f32 %v1261_v29, %v1238_v43  ;;  %v1267_v37 = vpop.permute.xlu1 %1266 }
 0x1f9   :  { %v1262_v9 = vadd.f32 %v1260_v5, %v1237_v59  ;;  %v1265_v25 = vpop.permute.xlu0 %1264  ;;  %v1269_v46 = vsel %vm181_vm10, 0.0, %v1267_v37 }
 0x1fa   :  { %v1268_v61 = vsel %vm181_vm10, 0.0, %v1265_v25  ;;  %v1271_v27 = vmul.f32 %v1545_v31, %v1269_v46  ;;  %v1282_v19 = vadd.f32 %v1280_v49, %v1263_v1  ;;  %v1354_v1 = vmul.f32 %v1549_v36, %v2900_v18 }
 0x1fb   :  { %v1270_v35 = vmul.f32 %v1545_v31, %v1268_v61  ;;  %v1281_v13 = vadd.f32 %v1279_v50, %v1262_v9  ;;  %v1355_v9 = vmul.f32 %v1549_v36, %v2904_v2  ;;  %v1358_v46 = vmul.f32 %v1549_v36, %v2921_v4 }
 0x1fc   :  { %v1273_v45 = vadd.f32 %v1271_v27, %v1248_v56  ;;  %v1291_v26 = vpop.permute.xlu1 %1290  ;;  %v1359_v61 = vmul.f32 %v1549_v36, %v2925_v47 }
 0x1fd   :  { %v1272_v34 = vadd.f32 %v1270_v35, %v1247_v60  ;;  %v1289_v30 = vpop.permute.xlu0 %1288  ;;  %v1293_v39 = vsel %vm220_vm11, 0.0, %v1291_v26 }
 0x1fe   :  { %v1292_v28 = vsel %vm220_vm11, 0.0, %v1289_v30  ;;  %v1286_v15 = vadd.f32 %v1284_v7, %v1273_v45  ;;  %v1299_v16 = vmul.f32 %v1547_v55, %v1293_v39 }
 0x1ff   :  { %v1285_v17 = vadd.f32 %v1283_v23, %v1272_v34  ;;  %v1298_v6 = vmul.f32 %v1547_v55, %v1292_v28 }
 0x200   :  { %v1305_v54 = vpop.permute.xlu1 %1304  ;;  %v1301_v52 = vadd.f32 %v1299_v16, %v1282_v19 }
 0x201   :  { %v1303_v11 = vpop.permute.xlu0 %1302  ;;  %v1307_v58 = vsel %vm220_vm11, 0.0, %v1305_v54  ;;  %v1300_v20 = vadd.f32 %v1298_v6, %v1281_v13 }
 0x202   :  { %v1306_v40 = vsel %vm220_vm11, 0.0, %v1303_v11  ;;  %v1309_v57 = vmul.f32 %v1547_v55, %v1307_v58 }
 0x203   :  { %v1308_v32 = vmul.f32 %v1547_v55, %v1306_v40 }
 0x204   :  { %v1328_v14 = vpop.permute.xlu1 %1327  ;;  %v1311_v41 = vadd.f32 %v1309_v57, %v1286_v15 }
 0x205   :  { %v1326_v44 = vpop.permute.xlu0 %1325  ;;  %v1330_v21 = vsel %vm181_vm10, 0.0, %v1328_v14  ;;  %v1310_v24 = vadd.f32 %v1308_v32, %v1285_v17 }
 0x206   :  { %v1329_v12 = vsel %vm181_vm10, 0.0, %v1326_v44  ;;  %v1336_v33 = vmul.f32 %v1548_v42, %v1330_v21 }
 0x207   :  { %v1335_v22 = vmul.f32 %v1548_v42, %v1329_v12 }
 0x208   :  { %v1338_v3 = vadd.f32 %v1336_v33, %v1301_v52  ;;  %v1342_v8 = vpop.permute.xlu1 %1341 }
 0x209   :  { %v1337_v48 = vadd.f32 %v1335_v22, %v1300_v20  ;;  %v1340_v62 = vpop.permute.xlu0 %1339  ;;  %v1344_v31 = vsel %vm181_vm10, 0.0, %v1342_v8 }
 0x20a   :  { %v1343_v63 = vsel %vm181_vm10, 0.0, %v1340_v62  ;;  %v1346_v51 = vmul.f32 %v1548_v42, %v1344_v31  ;;  %v1357_v56 = vadd.f32 %v1355_v9, %v1338_v3 }
 0x20b   :  { %v1345_v10 = vmul.f32 %v1548_v42, %v1343_v63  ;;  %v1356_v60 = vadd.f32 %v1354_v1, %v1337_v48 }
 0x20c   :  { %v1348_v43 = vadd.f32 %v1346_v51, %v1311_v41  ;;  %v1366_v29 = vpop.permute.xlu1 %1365 }
 0x20d   :  { %v1347_v59 = vadd.f32 %v1345_v10, %v1310_v24  ;;  %v1364_v5 = vpop.permute.xlu0 %1363  ;;  %v1368_v37 = vsel %vm220_vm11, 0.0, %v1366_v29 }
 0x20e   :  { %v1367_v25 = vsel %vm220_vm11, 0.0, %v1364_v5  ;;  %v1374_v49 = vmul.f32 %v1550_v53, %v1368_v37  ;;  %v1361_v45 = vadd.f32 %v1359_v61, %v1348_v43 }
 0x20f   :  { %v1373_v50 = vmul.f32 %v1550_v53, %v1367_v25  ;;  %v1360_v26 = vadd.f32 %v1358_v46, %v1347_v59 }
 0x210   :  { %v1380_v27 = vpop.permute.xlu1 %1379  ;;  %v3160_v19 = vadd.f32 %v1374_v49, %v1357_v56 }
 0x211   :  { %v1378_v35 = vpop.permute.xlu0 %1377  ;;  %v3162_v18 = vadd.f32 %v1373_v50, %v1356_v60  ;;  %v1382_v2 = vsel %vm220_vm11, 0.0, %v1380_v27  ;;  %v1586_v50 = vmov 1966171168  }
 0x212   :  { %v1381_v13 = vsel %vm220_vm11, 0.0, %v1378_v35  ;;  %v1384_v34 = vmul.f32 %v1550_v53, %v1382_v2  ;;  %v1388_v47 = vmul.f32 %v3160_v19, %v3160_v19  ;;  %v1449_v56 = vunpack.c.l.s4 %v1586_v50  ;;  %v1446_v2 = vld [vmem:[%s3213_s2] sm:$0x1] }
 0x213   :  { %v1383_v30 = vmul.f32 %v1550_v53, %v1381_v13  ;;  %v1387_v23 = vmul.f32 %v3162_v18, %v3162_v18  ;;  %v1471_v13 = vsub.s32 0, %v2045_v0 }
 0x214   :  { %v3168_v7 = vadd.f32 %v1384_v34, %v1361_v45  ;;  %v1450_v60 = vunpack.c.0.s8 %v1449_v56 }
 0x215   :  { %v3170_v4 = vadd.f32 %v1383_v30, %v1360_v26  ;;  %v1465_v26 = vld [vmem:[%s3214_s3] sm:$0x1] }
 0x216   :  { %v1390_v55 = vadd.f32 %v3168_v7, %v3160_v19  ;;  %v1392_v39 = vmul.f32 %v3168_v7, %v3168_v7  ;;  %v1453_v46 = vsub.s32 %v1450_v60, %v2045_v0 }
 0x217   :  { %v1389_v28 = vadd.f32 %v3170_v4, %v3162_v18  ;;  %v1391_v15 = vmul.f32 %v3170_v4, %v3170_v4 }
 0x218   :  { %v1394_v17 = vadd.f32 %v1392_v39, %v1388_v47 }
 0x219   :  { %v1393_v54 = vadd.f32 %v1391_v15, %v1387_v23  ;;  %v1395_v11 = vadd.f32 %v1390_v55, %v1389_v28 }
 0x21b   :  { %v1396_v16 = vrot.slane %v1395_v11, 4  ;;  %v1402_v6 = vadd.f32 %v1394_v17, %v1393_v54 }
 0x21d   :  { %v1397_v58 = vadd.f32 %v1396_v16, %v1395_v11  ;;  %v1403_v40 = vrot.slane %v1402_v6, 4 }
 0x21f   :  { %v1398_v42 = vrot.slane %v1397_v58, 2  ;;  %v1404_v14 = vadd.f32 %v1403_v40, %v1402_v6 }
 0x221   :  { %v1399_v44 = vadd.f32 %v1398_v42, %v1397_v58  ;;  %v1405_v52 = vrot.slane %v1404_v14, 2 }
 0x223   :  { %v1400_v20 = vrot.slane %v1399_v44, 1  ;;  %v1406_v21 = vadd.f32 %v1405_v52, %v1404_v14 }
 0x225   :  { %v1407_v12 = vrot.slane %v1406_v21, 1  ;;  %v1401_v57 = vadd.f32 %v1400_v20, %v1399_v44 }
 0x227   :  { %v1408_v32 = vadd.f32 %v1407_v12, %v1406_v21 }
 0x229   :  { %v1410_v33 = vsel %vm1409_vm12, %v1401_v57, %v1408_v32 }
 0x22a   :  { %1411 = vrot.lane.b32.xlu0 %v1410_v33, %s1578_s0  ;;  %s1583_s0 = smov 126  }
 0x29c   :  { %v1412_v22 = vpop.permute.xlu0 %1411 }
 0x29d   :  { %v1413_v3 = vadd.f32 %v1412_v22, %v1410_v33 }
 0x29f   :  { %1414 = vrot.lane.b32.xlu1 %v1413_v3, %s1580_s1 }
 0x311   :  { %v1415_v48 = vpop.permute.xlu1 %1414 }
 0x312   :  { %v1416_v8 = vadd.f32 %v1415_v48, %v1413_v3 }
 0x314   :  { %1417 = vrot.lane.b32.xlu0 %v1416_v8, %s1581_s6 }
 0x386   :  { %v1418_v62 = vpop.permute.xlu0 %1417 }
 0x387   :  { %v1419_v31 = vadd.f32 %v1418_v62, %v1416_v8 }
 0x389   :  { %1420 = vrot.lane.b32.xlu1 %v1419_v31, %s1582_s7 }
 0x3fb   :  { %v1421_v63 = vpop.permute.xlu1 %1420 }
 0x3fc   :  { %v1422_v36 = vadd.f32 %v1421_v63, %v1419_v31 }
 0x3fe   :  { %v1424_v41 = vsel %vm1423_vm13, %v1422_v36, 0.0 }
 0x3ff   :  { %1425 = vrot.lane.b32.xlu0 %v1424_v41, %s1579_s19 }
 0x471   :  { %v1426_v24 = vpop.permute.xlu0 %1425 }
 0x472   :  { %v1427_v51 = vadd.f32 %v1426_v24, %v1424_v41 }
 0x474   :  { %1428 = vrot.lane.b32.xlu1 %v1427_v51, %s1583_s0 }
 0x4e6   :  { %v1429_v10 = vpop.permute.xlu1 %1428 }
 0x4e7   :  { %v1430_v53 = vadd.f32 %v1429_v10, %v1427_v51 }
 0x4e9   :  { %1431 = vrot.lane.b32.xlu0 %v1430_v53, %s1584_s8 }
 0x55b   :  { %v1432_v43 = vpop.permute.xlu0 %1431 }
 0x55c   :  { %v1433_v59 = vadd.f32 %v1432_v43, %v1430_v53 }
 0x55e   :  { %1434 = vrot.lane.b32.xlu1 %v1433_v59, %s1585_s24 }
 0x5d0   :  { %v1435_v29 = vpop.permute.xlu1 %1434 }
 0x5d1   :  { %v1436_v5 = vadd.f32 %v1435_v29, %v1433_v59 }
 0x5d3   :  { %v1437_v38 = vmul.f32 0.001953125, %v1436_v5 }
 0x5d5   :  { %v1438_v1 = vmul.f32 %v1437_v38, %v1437_v38 }
 0x5d7   :  { %v1440_v9 = vrot.slane %v1438_v1, 7 }
 0x5d9   :  { %v1442_v37 = vsub.f32 %v1437_v38, %v1440_v9 }
 0x5db   :  { %v1443_v25 = vmax.f32 %v1442_v37, 0.0 }
 0x5dd   :  { %v1444_v49 = vadd.f32 1e-05, %v1443_v25 }
 0x5df   :  { %1569 = vrsqrt.f32 %v1444_v49 }
 0x5e9   :  { %v1570_v61 = vpop.eup %1569 }
 0x5ea   :  { %v1454_v27 = vrot.slane %v1570_v61, %v1453_v46 }
 0x5ec   :  { %v1455_v35 = vcombine.high %v1454_v27, %v1454_v27 }
 0x5ee   :  { %v1462_v45 = vrot.slane %v1455_v35, %v1453_v46 }
 0x5f0   :  { %v1464_v34 = vmul.f32 %v1462_v45, %v1446_v2 }
 0x5f2   :  { %v1466_v30 = vmul.f32 %v1464_v34, %v1437_v38  ;;  %v1472_v47 = vrot.slane %v1464_v34, %v1471_v13 }
 0x5f4   :  { %v1467_v23 = vsub.f32 %v1465_v26, %v1466_v30  ;;  %v1474_v55 = vmul.f32 %v1472_v47, %v3162_v18  ;;  %v1475_v39 = vmul.f32 %v1472_v47, %v3160_v19  ;;  %v1488_v15 = vmul.f32 %v1472_v47, %v3170_v4 }
 0x5f5   :  { %v1489_v17 = vmul.f32 %v1472_v47, %v3168_v7 }
 0x5f6   :  { %v1480_v28 = vrot.slane %v1467_v23, %v1471_v13 }
 0x5f8   :  { %v1482_v54 = vadd.f32 %v1480_v28, %v1474_v55  ;;  %v1483_v0 = vadd.f32 %v1480_v28, %v1475_v39  ;;  %v1490_v11 = vadd.f32 %v1488_v15, %v1480_v28  ;;  %v1491_v16 = vadd.f32 %v1489_v17, %v1480_v28 }
 0x5fa   :  { %v1484_v6 = vmax.f32 %v1482_v54, 0.0  ;;  %v1485_v58 = vmax.f32 %v1483_v0, 0.0  ;;  %v1492_v40 = vmax.f32 %v1490_v11, 0.0  ;;  %v1493_v42 = vmax.f32 %v1491_v16, 0.0 }
 0x5fc   :  { %1486 = vst [vmem:[%s3215_s4] sm:$0xff] %v1484_v6  ;;  %1487 = vst [vmem:[%s3215_s4 + $0x8] sm:$0xff] %v1485_v58 }
 0x5fd   :  { %1551 = vst [vmem:[%s3215_s4 + $0x10] sm:$0xff] %v1492_v40  ;;  %1552 = vst [vmem:[%s3215_s4 + $0x18] sm:$0xff] %v1493_v42 }

</bundles_post_ra>
